<compile_context>
chip_gen: v7x
topology: tpu7x:2x2x1
jax: 0.10.0
libtpu: 0.0.40
codegen_flags: <defaults>
</compile_context>

<pallas_src>
import functools

import jax
import jax.numpy as jnp
from jax.experimental import pallas as pl
from jax.experimental.pallas import tpu as pltpu

# TODO(synk): the allennlp ElmoEmbedder (char-CNN + bi-LM over raw strings) has
# no Pallas equivalent; its output is modeled as a dense [B, T, D_elmo] input.
# TODO(synk): no sequence-length mask / packed sequences: all T timesteps update
# (h, c); the PyTorch ElmoLSTMEncoder path would mask / gather the last real step.

_NEG_INF = -1e30


def _round_up(x, m):
    return ((x + m - 1) // m) * m


def _row_tile(n, cap=1024, step=16):
    """Largest multiple-of-`step` divisor of n that is <= cap; else n itself."""
    top = min(cap, n)
    cand = top - (top % step)
    while cand >= step:
        if n % cand == 0:
            return cand
        cand -= step
    return n


def _time_block(t_total, bt, g, max_unroll=32, xw_buf_budget=4 * 2**20):
    """Timesteps per stage-2 grid step: largest divisor of T within VMEM/unroll caps."""
    per_step = bt * g * 2          # bf16 XW bytes per timestep per batch tile
    cap = max(1, min(max_unroll, xw_buf_budget // max(per_step, 1), t_total))
    for cand in range(cap, 0, -1):
        if t_total % cand == 0:
            return cand
    return 1


def _num_batch_tiles(b_pad):
    """2 batch tiles only where a second TensorCore exists (v7x); else 1 —
    on the single-core v5e/v6e batch tiling would only multiply grid overhead."""
    try:
        kind = jax.devices()[0].device_kind.lower()
    except Exception:
        kind = ""
    if ("v7" in kind or "7x" in kind) and b_pad % 32 == 0:
        return 2
    return 1


def _vmem_limit(bytes_needed):
    """Request roughly what the tiles need (+headroom); never above 32 MiB so the
    same budget is safe on v7x's 64 MiB physical VMEM, never below the 16 MiB
    v5e scoped default."""
    return int(min(32 * 2**20, max(16 * 2**20, bytes_needed + 8 * 2**20)))


# ---------------------------------------------------------------------------
# Kernel 1: hoisted input projection (pre-activation gates) for all timesteps.
# ---------------------------------------------------------------------------
def gates_precompute_kernel(tok_ref, elmo_ref, w_tok_ref, w_elmo_ref, b_ref, xw_ref):
    # tok_ref:  [TM, D_tok] bf16   elmo_ref: [TM, D_elmo] bf16 (time-major rows of [T*B])
    # w_*_ref:  bf16 weights       b_ref: [1, 4H] f32
    # xw_ref:   [TM, 4H] bf16 pre-activation gates (f32 MXU accumulation, bias folded in)
    acc = jnp.dot(tok_ref[...], w_tok_ref[...], preferred_element_type=jnp.float32)
    acc = acc + jnp.dot(elmo_ref[...], w_elmo_ref[...], preferred_element_type=jnp.float32)
    xw_ref[...] = (acc + b_ref[...]).astype(xw_ref.dtype)


# ---------------------------------------------------------------------------
# Kernel 2: LSTM recurrence (T_inner timesteps per grid step) + fused classifier head.
# ---------------------------------------------------------------------------
def lstm_recurrence_cls_kernel(xw_ref, w_hh_ref, w_cls_ref, b_cls_ref, labels_ref,
                               logits_ref, probs_ref, nll_ref, h_ref, c_ref):
    # grid = (batch_tiles, T // T_inner); batch "parallel", time "arbitrary".
    # xw_ref:     [T_inner, BT, 4H] bf16 pre-activations for this (batch tile, time block)
    # w_hh_ref:   [H, 4H] bf16
    # w_cls_ref:  [H, C_pad] f32   b_cls_ref: [1, C_pad] f32 (padded classes biased to -1e30)
    # labels_ref: [BT, 1] int32 (-1 for padded batch rows)
    # logits_ref/probs_ref: [BT, C_pad] f32   nll_ref: [BT, 1] f32
    # h_ref/c_ref: [BT, H] f32 VMEM scratch carried across the time axis.
    tb = pl.program_id(1)
    hdim = h_ref.shape[1]
    t_inner = xw_ref.shape[0]

    @pl.when(tb == 0)
    def _init():
        h_ref[...] = jnp.zeros_like(h_ref)
        c_ref[...] = jnp.zeros_like(c_ref)

    h = h_ref[...]
    c = c_ref[...]
    w_hh = w_hh_ref[...]
    # T_inner fully-unrolled LSTM steps per grid step; only the small h @ w_hh
    # matmul + gate math sit on the serial critical path (input projection and
    # bias are precomputed in xw_ref).
    for tt in range(t_inner):                       # static trip count -> unrolled
        gates = xw_ref[tt].astype(jnp.float32) + jnp.dot(
            h.astype(jnp.bfloat16), w_hh, preferred_element_type=jnp.float32)
        # Gate order i, f, g, o (PyTorch LSTM); i/f share one contiguous sigmoid.
        if_g = jax.nn.sigmoid(gates[:, :2 * hdim])
        i_g = if_g[:, :hdim]
        f_g = if_g[:, hdim:]
        g_g = jnp.tanh(gates[:, 2 * hdim:3 * hdim])
        o_g = jax.nn.sigmoid(gates[:, 3 * hdim:])
        c = f_g * c + i_g * g_g
        h = o_g * jnp.tanh(c)
    h_ref[...] = h
    c_ref[...] = c

    @pl.when(tb == pl.num_programs(1) - 1)
    def _classifier_head():
        # Linear head on the final hidden state (the "encoding").
        logits = jnp.dot(h, w_cls_ref[...],
                         preferred_element_type=jnp.float32) + b_cls_ref[...]
        logits_ref[...] = logits

        # Exact softmax normalization (approx reciprocal previously left
        # sum(probs) ~4e-3 off 1.0).  Padded classes: exp(-1e30 - m) == 0.
        m = jnp.max(logits, axis=1, keepdims=True)
        e = jnp.exp(logits - m)
        s = jnp.sum(e, axis=1, keepdims=True)
        probs_ref[...] = e / s

        # Per-row cross-entropy; padded rows (label == -1) and padded classes contribute 0.
        bt, c_pad = logits.shape
        class_ids = jax.lax.broadcasted_iota(jnp.int32, (bt, c_pad), 1)
        one_hot = (class_ids == labels_ref[...]).astype(jnp.float32)
        log_probs = (logits - m) - jnp.log(s)
        nll_ref[...] = -jnp.sum(one_hot * log_probs, axis=1, keepdims=True)


# ---------------------------------------------------------------------------
# Wrapper: padding, pallas_call plumbing, output dict.
# ---------------------------------------------------------------------------
@functools.partial(jax.jit, static_argnames=("is_training", "is_validation"))
def elmo_lstm_classifier_forward(token_emb, elmo_emb, labels, params,
                                 is_training=True, is_validation=False):
    """token_emb: [B, T, D_tok], elmo_emb: [B, T, D_elmo], labels: [B, 1] int."""
    B, T, D_tok = token_emb.shape
    D_elmo = elmo_emb.shape[2]
    H = params["w_hh"].shape[0]
    G = 4 * H
    C = params["w_cls"].shape[1]

    # Batch padded to 16 (bf16 sublane pairing); padded rows get label -1 (zero loss).
    B_pad = _round_up(B, 16)
    if B_pad != B:
        token_emb = jnp.pad(token_emb, ((0, B_pad - B), (0, 0), (0, 0)))
        elmo_emb = jnp.pad(elmo_emb, ((0, B_pad - B), (0, 0), (0, 0)))
        labels = jnp.pad(labels, ((0, B_pad - B), (0, 0)), constant_values=-1)
    labels = labels.astype(jnp.int32)

    # Lane-dense classifier head: pad classes to a multiple of 128; padded logits -> -1e30.
    C_pad = _round_up(C, 128)
    w_cls = jnp.pad(params["w_cls"].astype(jnp.float32), ((0, 0), (0, C_pad - C)))
    b_cls = jnp.pad(params["b_cls"].astype(jnp.float32), ((0, 0), (0, C_pad - C)),
                    constant_values=_NEG_INF)

    # --------------------------------------------------------------
    # Stage 1: bf16 time-major inputs (one fused XLA cast+transpose of the small
    # D_tok/D_elmo tensors -- NOT of the 4H-wide XW), one big gridded matmul,
    # bf16 XW written back already in the layout stage 2 reads.
    # --------------------------------------------------------------
    M = T * B_pad
    tok_tm = token_emb.astype(jnp.bfloat16).transpose(1, 0, 2).reshape(M, D_tok)
    elmo_tm = elmo_emb.astype(jnp.bfloat16).transpose(1, 0, 2).reshape(M, D_elmo)

    TM = _row_tile(M, cap=1024)
    vmem1 = _vmem_limit(
        2 * TM * (D_tok + D_elmo + G) * 2 + (D_tok + D_elmo) * G * 2 + G * 4)

    xw2d = pl.pallas_call(
        gates_precompute_kernel,
        out_shape=jax.ShapeDtypeStruct((M, G), jnp.bfloat16),
        grid=(M // TM,),
        in_specs=[
            pl.BlockSpec((TM, D_tok), lambda i: (i, 0)),
            pl.BlockSpec((TM, D_elmo), lambda i: (i, 0)),
            pl.BlockSpec((D_tok, G), lambda i: (0, 0)),
            pl.BlockSpec((D_elmo, G), lambda i: (0, 0)),
            pl.BlockSpec((1, G), lambda i: (0, 0)),
        ],
        out_specs=pl.BlockSpec((TM, G), lambda i: (i, 0)),
        compiler_params=pltpu.CompilerParams(
            dimension_semantics=("parallel",), vmem_limit_bytes=vmem1),
    )(tok_tm, elmo_tm, params["w_ih_tok"], params["w_ih_elmo"], params["b_gate"])

    # Already time-major: free metadata reshape, no XW transpose through HBM.
    xw3 = xw2d.reshape(T, B_pad, G)

    # --------------------------------------------------------------
    # Stage 2: sequential recurrence, T_inner timesteps per grid step,
    # classifier head fused into the last time block.
    # --------------------------------------------------------------
    n_bt = _num_batch_tiles(B_pad)
    BT = B_pad // n_bt
    T_inner = _time_block(T, BT, G)
    vmem2 = _vmem_limit(
        2 * T_inner * BT * G * 2 + H * G * 2 + H * C_pad * 4 + C_pad * 4
        + 2 * BT * 4 + 2 * (2 * BT * C_pad * 4 + BT * 4) + 2 * BT * H * 4)

    logits_p, probs_p, nll = pl.pallas_call(
        lstm_recurrence_cls_kernel,
        out_shape=(
            jax.ShapeDtypeStruct((B_pad, C_pad), jnp.float32),
            jax.ShapeDtypeStruct((B_pad, C_pad), jnp.float32),
            jax.ShapeDtypeStruct((B_pad, 1), jnp.float32),
        ),
        grid=(n_bt, T // T_inner),
        in_specs=[
            pl.BlockSpec((T_inner, BT, G), lambda b, t: (t, b, 0)),   # XW time block
            pl.BlockSpec((H, G), lambda b, t: (0, 0)),                # w_hh (resident)
            pl.BlockSpec((H, C_pad), lambda b, t: (0, 0)),            # w_cls
            pl.BlockSpec((1, C_pad), lambda b, t: (0, 0)),            # b_cls
            pl.BlockSpec((BT, 1), lambda b, t: (b, 0)),               # labels
        ],
        out_specs=(
            pl.BlockSpec((BT, C_pad), lambda b, t: (b, 0)),
            pl.BlockSpec((BT, C_pad), lambda b, t: (b, 0)),
            pl.BlockSpec((BT, 1), lambda b, t: (b, 0)),
        ),
        scratch_shapes=[
            pltpu.VMEM((BT, H), jnp.float32),   # h carry
            pltpu.VMEM((BT, H), jnp.float32),   # c carry
        ],
        compiler_params=pltpu.CompilerParams(
            dimension_semantics=("parallel", "arbitrary"),
            vmem_limit_bytes=vmem2),
    )(xw3, params["w_hh"], w_cls, b_cls, labels)

    output_dict = {"logits": logits_p[:B, :C], "normalized_probs": probs_p[:B, :C]}
    if is_training or is_validation:
        output_dict["loss"] = jnp.sum(nll[:B, 0]) / jnp.float32(B)
    return output_dict


def init_params(key, d_tok, d_elmo, encoding_dim, num_classes):
    k1, k2, k3, k4, k5, k6 = jax.random.split(key, 6)
    scale = 0.1
    g = 4 * encoding_dim
    return {
        # LSTM weights, pre-transposed for right-multiplication, bf16 for the MXU.
        "w_ih_tok": (scale * jax.random.normal(k1, (d_tok, g), jnp.float32)).astype(jnp.bfloat16),
        "w_ih_elmo": (scale * jax.random.normal(k2, (d_elmo, g), jnp.float32)).astype(jnp.bfloat16),
        "w_hh": (scale * jax.random.normal(k3, (encoding_dim, g), jnp.float32)).astype(jnp.bfloat16),
        "b_gate": scale * jax.random.normal(k4, (1, g), jnp.float32),   # = b_ih + b_hh
        # Classification head (== PyTorch Linear.weight.T / bias), kept f32.
        "w_cls": scale * jax.random.normal(k5, (encoding_dim, num_classes), jnp.float32),
        "b_cls": scale * jax.random.normal(k6, (1, num_classes), jnp.float32),
    }


# ---------------------------------------------------------------------------
# Pure-JAX reference (same bf16 roundings as the kernels) for a correctness check.
# ---------------------------------------------------------------------------
def _reference_forward(token_emb, elmo_emb, labels, params):
    f32 = jnp.float32
    rb = lambda a: a.astype(jnp.bfloat16).astype(f32)   # mimic bf16 MXU inputs / bf16 XW store
    hp = jax.lax.Precision.HIGHEST
    w_tok = params["w_ih_tok"].astype(f32)
    w_elmo = params["w_ih_elmo"].astype(f32)
    w_hh = params["w_hh"].astype(f32)
    H = w_hh.shape[0]

    xw = (jnp.einsum("btd,dg->btg", rb(token_emb), w_tok, precision=hp)
          + jnp.einsum("bte,eg->btg", rb(elmo_emb), w_elmo, precision=hp)
          + params["b_gate"])
    xw = rb(xw)   # the kernel stores pre-activations in bf16

    def step(carry, g_t):
        h, c = carry
        gates = g_t + jnp.dot(rb(h), w_hh, precision=hp)
        i_g = jax.nn.sigmoid(gates[:, 0 * H:1 * H])
        f_g = jax.nn.sigmoid(gates[:, 1 * H:2 * H])
        g_g = jnp.tanh(gates[:, 2 * H:3 * H])
        o_g = jax.nn.sigmoid(gates[:, 3 * H:4 * H])
        c = f_g * c + i_g * g_g
        h = o_g * jnp.tanh(c)
        return (h, c), None

    B = token_emb.shape[0]
    h0 = jnp.zeros((B, H), f32)
    (h, _), _ = jax.lax.scan(step, (h0, h0), jnp.swapaxes(xw, 0, 1))
    logits = jnp.dot(h, params["w_cls"], precision=hp) + params["b_cls"]
    probs = jax.nn.softmax(logits, axis=1)
    logp = jax.nn.log_softmax(logits, axis=1)
    nll = -jnp.take_along_axis(logp, labels.astype(jnp.int32), axis=1)
    return logits, probs, jnp.mean(nll)


if __name__ == "__main__":
    # Small deterministic example shapes (H multiple of 128 -> lane-aligned gates).
    B, T = 8, 12
    D_TOK, D_ELMO = 64, 128
    ENCODING_DIM = 128
    NUM_CLASSES = 5

    key = jax.random.PRNGKey(0)
    k_tok, k_elmo, k_lab, k_par = jax.random.split(key, 4)

    token_emb = jax.random.normal(k_tok, (B, T, D_TOK), jnp.float32)
    elmo_emb = jax.random.normal(k_elmo, (B, T, D_ELMO), jnp.float32)
    labels = jax.random.randint(k_lab, (B, 1), 0, NUM_CLASSES, jnp.int32)

    params = init_params(k_par, D_TOK, D_ELMO, ENCODING_DIM, NUM_CLASSES)

    out = elmo_lstm_classifier_forward(
        token_emb, elmo_emb, labels, params,
        is_training=True, is_validation=False,
    )
    out = jax.block_until_ready(out)

    logits = out["logits"]
    probs = out["normalized_probs"]
    loss = out["loss"]

    assert logits.shape == (B, NUM_CLASSES)
    assert probs.shape == (B, NUM_CLASSES)
    assert bool(jnp.all(jnp.abs(jnp.sum(probs, axis=1) - 1.0) < 3e-3))
    assert bool(jnp.isfinite(loss))

    # Compare against the pure-JAX reference of the same (bf16-weight) model.
    ref_logits, ref_probs, ref_loss = _reference_forward(token_emb, elmo_emb, labels, params)
    assert bool(jnp.max(jnp.abs(logits - ref_logits)) < 2e-2)
    assert bool(jnp.max(jnp.abs(probs - ref_probs)) < 2e-2)
    assert bool(jnp.abs(loss - ref_loss) < 2e-2)

    print("KERNEL_OK")
</pallas_src>

<mosaic_0001>
module attributes {stable_mosaic.version = 11 : i64} {
  func.func @gates_precompute_kernel(%arg0: i32, %arg1: memref<192x64xbf16, #tpu.memory_space<vmem>>, %arg2: memref<192x128xbf16, #tpu.memory_space<vmem>>, %arg3: memref<64x512xbf16, #tpu.memory_space<vmem>>, %arg4: memref<128x512xbf16, #tpu.memory_space<vmem>>, %arg5: memref<1x512xf32, #tpu.memory_space<vmem>>, %arg6: memref<192x512xbf16, #tpu.memory_space<vmem>>) attributes {dimension_semantics = [#tpu.dimension_semantics<parallel>], iteration_bounds = array<i64: 1>, scalar_prefetch = 0 : i64, scratch_operands = 0 : i64, tpu.core_type = #tpu.core_type<tc>, window_params = [{transform_indices = @transform_0, window_bounds = array<i64: 192, 64>}, {transform_indices = @transform_1, window_bounds = array<i64: 192, 128>}, {pipeline_mode = #tpu.pipeline_mode<synchronous>, transform_indices = @transform_2, window_bounds = array<i64: 64, 512>}, {pipeline_mode = #tpu.pipeline_mode<synchronous>, transform_indices = @transform_3, window_bounds = array<i64: 128, 512>}, {pipeline_mode = #tpu.pipeline_mode<synchronous>, transform_indices = @transform_4, window_bounds = array<i64: 1, 512>}, {transform_indices = @transform_5, window_bounds = array<i64: 192, 512>}]} {
    %c0 = arith.constant 0 : index
    %c0_0 = arith.constant 0 : index
    %0 = vector.load %arg1[%c0, %c0_0] : memref<192x64xbf16, #tpu.memory_space<vmem>>, vector<192x64xbf16>
    %c0_1 = arith.constant 0 : index
    %c0_2 = arith.constant 0 : index
    %1 = vector.load %arg3[%c0_1, %c0_2] : memref<64x512xbf16, #tpu.memory_space<vmem>>, vector<64x512xbf16>
    %cst = arith.constant dense<0.000000e+00> : vector<192x512xf32>
    %2 = tpu.matmul %0, %1, %cst {dimension_numbers = #tpu.dot_dimension_numbers<[1], [0], [0], [1], [0, 0, 1, 1], [], []>} : vector<192x64xbf16>, vector<64x512xbf16>, vector<192x512xf32> -> vector<192x512xf32>
    %c0_3 = arith.constant 0 : index
    %c0_4 = arith.constant 0 : index
    %3 = vector.load %arg2[%c0_3, %c0_4] : memref<192x128xbf16, #tpu.memory_space<vmem>>, vector<192x128xbf16>
    %c0_5 = arith.constant 0 : index
    %c0_6 = arith.constant 0 : index
    %4 = vector.load %arg4[%c0_5, %c0_6] : memref<128x512xbf16, #tpu.memory_space<vmem>>, vector<128x512xbf16>
    %cst_7 = arith.constant dense<0.000000e+00> : vector<192x512xf32>
    %5 = tpu.matmul %3, %4, %cst_7 {dimension_numbers = #tpu.dot_dimension_numbers<[1], [0], [0], [1], [0, 0, 1, 1], [], []>} : vector<192x128xbf16>, vector<128x512xbf16>, vector<192x512xf32> -> vector<192x512xf32>
    %6 = arith.addf %2, %5 : vector<192x512xf32>
    %c0_8 = arith.constant 0 : index
    %c0_9 = arith.constant 0 : index
    %7 = vector.load %arg5[%c0_8, %c0_9] : memref<1x512xf32, #tpu.memory_space<vmem>>, vector<1x512xf32>
    %8 = vector.broadcast %7 : vector<1x512xf32> to vector<192x512xf32>
    %9 = arith.addf %6, %8 : vector<192x512xf32>
    %10 = arith.truncf %9 : vector<192x512xf32> to vector<192x512xbf16>
    %c0_10 = arith.constant 0 : index
    %c0_11 = arith.constant 0 : index
    %11 = vector.load %arg6[%c0_10, %c0_11] : memref<192x512xbf16, #tpu.memory_space<vmem>>, vector<192x512xbf16>
    tpu.vector_store %arg6[%c0_10, %c0_11], %10 {strides = array<i32>} : memref<192x512xbf16, #tpu.memory_space<vmem>>, vector<192x512xbf16>,
    return
  }
  func.func @transform_0(%arg0: i32) -> (i32, i32) {
    %c0_i32 = arith.constant 0 : i32
    %c0_i32_0 = arith.constant 0 : i32
    return %arg0, %c0_i32 : i32, i32
  }
  func.func @transform_1(%arg0: i32) -> (i32, i32) {
    %c0_i32 = arith.constant 0 : i32
    %c0_i32_0 = arith.constant 0 : i32
    return %arg0, %c0_i32 : i32, i32
  }
  func.func @transform_2(%arg0: i32) -> (i32, i32) {
    %c0_i32 = arith.constant 0 : i32
    %c0_i32_0 = arith.constant 0 : i32
    %c0_i32_1 = arith.constant 0 : i32
    return %c0_i32, %c0_i32_0 : i32, i32
  }
  func.func @transform_3(%arg0: i32) -> (i32, i32) {
    %c0_i32 = arith.constant 0 : i32
    %c0_i32_0 = arith.constant 0 : i32
    %c0_i32_1 = arith.constant 0 : i32
    return %c0_i32, %c0_i32_0 : i32, i32
  }
  func.func @transform_4(%arg0: i32) -> (i32, i32) {
    %c0_i32 = arith.constant 0 : i32
    %c0_i32_0 = arith.constant 0 : i32
    %c0_i32_1 = arith.constant 0 : i32
    return %c0_i32, %c0_i32_0 : i32, i32
  }
  func.func @transform_5(%arg0: i32) -> (i32, i32) {
    %c0_i32 = arith.constant 0 : i32
    %c0_i32_0 = arith.constant 0 : i32
    return %arg0, %c0_i32 : i32, i32
  }
}

module attributes {stable_mosaic.version = 11 : i64} {
  func.func @lstm_recurrence_cls_kernel(%arg0: i32, %arg1: i32, %arg2: memref<12x16x512xbf16, #tpu.memory_space<vmem>>, %arg3: memref<128x512xbf16, #tpu.memory_space<vmem>>, %arg4: memref<128x128xf32, #tpu.memory_space<vmem>>, %arg5: memref<1x128xf32, #tpu.memory_space<vmem>>, %arg6: memref<16x1xi32, #tpu.memory_space<vmem>>, %arg7: memref<16x128xf32, #tpu.memory_space<vmem>>, %arg8: memref<16x128xf32, #tpu.memory_space<vmem>>, %arg9: memref<16x1xf32, #tpu.memory_space<vmem>>, %arg10: memref<16x128xf32, #tpu.memory_space<vmem>>, %arg11: memref<16x128xf32, #tpu.memory_space<vmem>>) attributes {dimension_semantics = [#tpu.dimension_semantics<parallel>, #tpu.dimension_semantics<arbitrary>], iteration_bounds = array<i64: 1, 1>, scalar_prefetch = 0 : i64, scratch_operands = 2 : i64, tpu.core_type = #tpu.core_type<tc>, window_params = [{transform_indices = @transform_0, window_bounds = array<i64: 12, 16, 512>}, {pipeline_mode = #tpu.pipeline_mode<synchronous>, transform_indices = @transform_1, window_bounds = array<i64: 128, 512>}, {pipeline_mode = #tpu.pipeline_mode<synchronous>, transform_indices = @transform_2, window_bounds = array<i64: 128, 128>}, {pipeline_mode = #tpu.pipeline_mode<synchronous>, transform_indices = @transform_3, window_bounds = array<i64: 1, 128>}, {transform_indices = @transform_4, window_bounds = array<i64: 16, 1>}, {transform_indices = @transform_5, window_bounds = array<i64: 16, 128>}, {transform_indices = @transform_6, window_bounds = array<i64: 16, 128>}, {transform_indices = @transform_7, window_bounds = array<i64: 16, 1>}]} {
    %c0_i32 = arith.constant 0 : i32
    %0 = arith.cmpi eq, %arg1, %c0_i32 : i32
    %1 = arith.extui %0 : i1 to i32
    %c0_i32_0 = arith.constant 0 : i32
    %2 = arith.cmpi ne, %1, %c0_i32_0 : i32
    scf.if %2 {
      %cst_72 = arith.constant 0.000000e+00 : f32
      %335 = vector.broadcast %cst_72 : f32 to vector<16x128xf32>
      %c0_73 = arith.constant 0 : index
      %c0_74 = arith.constant 0 : index
      %336 = vector.load %arg10[%c0_73, %c0_74] : memref<16x128xf32, #tpu.memory_space<vmem>>, vector<16x128xf32>
      tpu.vector_store %arg10[%c0_73, %c0_74], %335 {strides = array<i32>} : memref<16x128xf32, #tpu.memory_space<vmem>>, vector<16x128xf32>,
      %cst_75 = arith.constant 0.000000e+00 : f32
      %337 = vector.broadcast %cst_75 : f32 to vector<16x128xf32>
      %c0_76 = arith.constant 0 : index
      %c0_77 = arith.constant 0 : index
      %338 = vector.load %arg11[%c0_76, %c0_77] : memref<16x128xf32, #tpu.memory_space<vmem>>, vector<16x128xf32>
      tpu.vector_store %arg11[%c0_76, %c0_77], %337 {strides = array<i32>} : memref<16x128xf32, #tpu.memory_space<vmem>>, vector<16x128xf32>,
    } else {
    }
    %c0 = arith.constant 0 : index
    %c0_1 = arith.constant 0 : index
    %3 = vector.load %arg10[%c0, %c0_1] : memref<16x128xf32, #tpu.memory_space<vmem>>, vector<16x128xf32>
    %c0_2 = arith.constant 0 : index
    %c0_3 = arith.constant 0 : index
    %4 = vector.load %arg11[%c0_2, %c0_3] : memref<16x128xf32, #tpu.memory_space<vmem>>, vector<16x128xf32>
    %c0_4 = arith.constant 0 : index
    %c0_5 = arith.constant 0 : index
    %5 = vector.load %arg3[%c0_4, %c0_5] : memref<128x512xbf16, #tpu.memory_space<vmem>>, vector<128x512xbf16>
    %c0_6 = arith.constant 0 : index
    %c0_7 = arith.constant 0 : index
    %c0_8 = arith.constant 0 : index
    %6 = vector.load %arg2[%c0_6, %c0_7, %c0_8] : memref<12x16x512xbf16, #tpu.memory_space<vmem>>, vector<1x16x512xbf16>
    %7 = vector.shape_cast %6 : vector<1x16x512xbf16> to vector<16x512xbf16>
    %8 = arith.extf %7 : vector<16x512xbf16> to vector<16x512xf32>
    %9 = arith.truncf %3 : vector<16x128xf32> to vector<16x128xbf16>
    %cst = arith.constant dense<0.000000e+00> : vector<16x512xf32>
    %10 = tpu.matmul %9, %5, %cst {dimension_numbers = #tpu.dot_dimension_numbers<[1], [0], [0], [1], [0, 0, 1, 1], [], []>} : vector<16x128xbf16>, vector<128x512xbf16>, vector<16x512xf32> -> vector<16x512xf32>
    %11 = arith.addf %8, %10 : vector<16x512xf32>
    %12 = vector.extract_strided_slice %11 {offsets = [0, 0], sizes = [16, 256], strides = [1, 1]} : vector<16x512xf32> to vector<16x256xf32>
    %13 = arith.negf %12 : vector<16x256xf32>
    %14 = math.exp %13 : vector<16x256xf32>
    %cst_9 = arith.constant 1.000000e+00 : f32
    %15 = vector.broadcast %cst_9 : f32 to vector<16x256xf32>
    %16 = arith.addf %15, %14 : vector<16x256xf32>
    %17 = arith.divf %15, %16 : vector<16x256xf32>
    %18 = vector.extract_strided_slice %17 {offsets = [0, 0], sizes = [16, 128], strides = [1, 1]} : vector<16x256xf32> to vector<16x128xf32>
    %19 = vector.extract_strided_slice %17 {offsets = [0, 128], sizes = [16, 128], strides = [1, 1]} : vector<16x256xf32> to vector<16x128xf32>
    %20 = vector.extract_strided_slice %11 {offsets = [0, 256], sizes = [16, 128], strides = [1, 1]} : vector<16x512xf32> to vector<16x128xf32>
    %21 = math.tanh %20 : vector<16x128xf32>
    %22 = vector.extract_strided_slice %11 {offsets = [0, 384], sizes = [16, 128], strides = [1, 1]} : vector<16x512xf32> to vector<16x128xf32>
    %23 = arith.negf %22 : vector<16x128xf32>
    %24 = math.exp %23 : vector<16x128xf32>
    %cst_10 = arith.constant 1.000000e+00 : f32
    %25 = vector.broadcast %cst_10 : f32 to vector<16x128xf32>
    %26 = arith.addf %25, %24 : vector<16x128xf32>
    %27 = arith.divf %25, %26 : vector<16x128xf32>
    %28 = arith.mulf %19, %4 : vector<16x128xf32>
    %29 = arith.mulf %18, %21 : vector<16x128xf32>
    %30 = arith.addf %28, %29 : vector<16x128xf32>
    %31 = math.tanh %30 : vector<16x128xf32>
    %32 = arith.mulf %27, %31 : vector<16x128xf32>
    %c1 = arith.constant 1 : index
    %c0_11 = arith.constant 0 : index
    %c0_12 = arith.constant 0 : index
    %33 = vector.load %arg2[%c1, %c0_11, %c0_12] : memref<12x16x512xbf16, #tpu.memory_space<vmem>>, vector<1x16x512xbf16>
    %34 = vector.shape_cast %33 : vector<1x16x512xbf16> to vector<16x512xbf16>
    %35 = arith.extf %34 : vector<16x512xbf16> to vector<16x512xf32>
    %36 = arith.truncf %32 : vector<16x128xf32> to vector<16x128xbf16>
    %cst_13 = arith.constant dense<0.000000e+00> : vector<16x512xf32>
    %37 = tpu.matmul %36, %5, %cst_13 {dimension_numbers = #tpu.dot_dimension_numbers<[1], [0], [0], [1], [0, 0, 1, 1], [], []>} : vector<16x128xbf16>, vector<128x512xbf16>, vector<16x512xf32> -> vector<16x512xf32>
    %38 = arith.addf %35, %37 : vector<16x512xf32>
    %39 = vector.extract_strided_slice %38 {offsets = [0, 0], sizes = [16, 256], strides = [1, 1]} : vector<16x512xf32> to vector<16x256xf32>
    %40 = arith.negf %39 : vector<16x256xf32>
    %41 = math.exp %40 : vector<16x256xf32>
    %cst_14 = arith.constant 1.000000e+00 : f32
    %42 = vector.broadcast %cst_14 : f32 to vector<16x256xf32>
    %43 = arith.addf %42, %41 : vector<16x256xf32>
    %44 = arith.divf %42, %43 : vector<16x256xf32>
    %45 = vector.extract_strided_slice %44 {offsets = [0, 0], sizes = [16, 128], strides = [1, 1]} : vector<16x256xf32> to vector<16x128xf32>
    %46 = vector.extract_strided_slice %44 {offsets = [0, 128], sizes = [16, 128], strides = [1, 1]} : vector<16x256xf32> to vector<16x128xf32>
    %47 = vector.extract_strided_slice %38 {offsets = [0, 256], sizes = [16, 128], strides = [1, 1]} : vector<16x512xf32> to vector<16x128xf32>
    %48 = math.tanh %47 : vector<16x128xf32>
    %49 = vector.extract_strided_slice %38 {offsets = [0, 384], sizes = [16, 128], strides = [1, 1]} : vector<16x512xf32> to vector<16x128xf32>
    %50 = arith.negf %49 : vector<16x128xf32>
    %51 = math.exp %50 : vector<16x128xf32>
    %cst_15 = arith.constant 1.000000e+00 : f32
    %52 = vector.broadcast %cst_15 : f32 to vector<16x128xf32>
    %53 = arith.addf %52, %51 : vector<16x128xf32>
    %54 = arith.divf %52, %53 : vector<16x128xf32>
    %55 = arith.mulf %46, %30 : vector<16x128xf32>
    %56 = arith.mulf %45, %48 : vector<16x128xf32>
    %57 = arith.addf %55, %56 : vector<16x128xf32>
    %58 = math.tanh %57 : vector<16x128xf32>
    %59 = arith.mulf %54, %58 : vector<16x128xf32>
    %c2 = arith.constant 2 : index
    %c0_16 = arith.constant 0 : index
    %c0_17 = arith.constant 0 : index
    %60 = vector.load %arg2[%c2, %c0_16, %c0_17] : memref<12x16x512xbf16, #tpu.memory_space<vmem>>, vector<1x16x512xbf16>
    %61 = vector.shape_cast %60 : vector<1x16x512xbf16> to vector<16x512xbf16>
    %62 = arith.extf %61 : vector<16x512xbf16> to vector<16x512xf32>
    %63 = arith.truncf %59 : vector<16x128xf32> to vector<16x128xbf16>
    %cst_18 = arith.constant dense<0.000000e+00> : vector<16x512xf32>
    %64 = tpu.matmul %63, %5, %cst_18 {dimension_numbers = #tpu.dot_dimension_numbers<[1], [0], [0], [1], [0, 0, 1, 1], [], []>} : vector<16x128xbf16>, vector<128x512xbf16>, vector<16x512xf32> -> vector<16x512xf32>
    %65 = arith.addf %62, %64 : vector<16x512xf32>
    %66 = vector.extract_strided_slice %65 {offsets = [0, 0], sizes = [16, 256], strides = [1, 1]} : vector<16x512xf32> to vector<16x256xf32>
    %67 = arith.negf %66 : vector<16x256xf32>
    %68 = math.exp %67 : vector<16x256xf32>
    %cst_19 = arith.constant 1.000000e+00 : f32
    %69 = vector.broadcast %cst_19 : f32 to vector<16x256xf32>
    %70 = arith.addf %69, %68 : vector<16x256xf32>
    %71 = arith.divf %69, %70 : vector<16x256xf32>
    %72 = vector.extract_strided_slice %71 {offsets = [0, 0], sizes = [16, 128], strides = [1, 1]} : vector<16x256xf32> to vector<16x128xf32>
    %73 = vector.extract_strided_slice %71 {offsets = [0, 128], sizes = [16, 128], strides = [1, 1]} : vector<16x256xf32> to vector<16x128xf32>
    %74 = vector.extract_strided_slice %65 {offsets = [0, 256], sizes = [16, 128], strides = [1, 1]} : vector<16x512xf32> to vector<16x128xf32>
    %75 = math.tanh %74 : vector<16x128xf32>
    %76 = vector.extract_strided_slice %65 {offsets = [0, 384], sizes = [16, 128], strides = [1, 1]} : vector<16x512xf32> to vector<16x128xf32>
    %77 = arith.negf %76 : vector<16x128xf32>
    %78 = math.exp %77 : vector<16x128xf32>
    %cst_20 = arith.constant 1.000000e+00 : f32
    %79 = vector.broadcast %cst_20 : f32 to vector<16x128xf32>
    %80 = arith.addf %79, %78 : vector<16x128xf32>
    %81 = arith.divf %79, %80 : vector<16x128xf32>
    %82 = arith.mulf %73, %57 : vector<16x128xf32>
    %83 = arith.mulf %72, %75 : vector<16x128xf32>
    %84 = arith.addf %82, %83 : vector<16x128xf32>
    %85 = math.tanh %84 : vector<16x128xf32>
    %86 = arith.mulf %81, %85 : vector<16x128xf32>
    %c3 = arith.constant 3 : index
    %c0_21 = arith.constant 0 : index
    %c0_22 = arith.constant 0 : index
    %87 = vector.load %arg2[%c3, %c0_21, %c0_22] : memref<12x16x512xbf16, #tpu.memory_space<vmem>>, vector<1x16x512xbf16>
    %88 = vector.shape_cast %87 : vector<1x16x512xbf16> to vector<16x512xbf16>
    %89 = arith.extf %88 : vector<16x512xbf16> to vector<16x512xf32>
    %90 = arith.truncf %86 : vector<16x128xf32> to vector<16x128xbf16>
    %cst_23 = arith.constant dense<0.000000e+00> : vector<16x512xf32>
    %91 = tpu.matmul %90, %5, %cst_23 {dimension_numbers = #tpu.dot_dimension_numbers<[1], [0], [0], [1], [0, 0, 1, 1], [], []>} : vector<16x128xbf16>, vector<128x512xbf16>, vector<16x512xf32> -> vector<16x512xf32>
    %92 = arith.addf %89, %91 : vector<16x512xf32>
    %93 = vector.extract_strided_slice %92 {offsets = [0, 0], sizes = [16, 256], strides = [1, 1]} : vector<16x512xf32> to vector<16x256xf32>
    %94 = arith.negf %93 : vector<16x256xf32>
    %95 = math.exp %94 : vector<16x256xf32>
    %cst_24 = arith.constant 1.000000e+00 : f32
    %96 = vector.broadcast %cst_24 : f32 to vector<16x256xf32>
    %97 = arith.addf %96, %95 : vector<16x256xf32>
    %98 = arith.divf %96, %97 : vector<16x256xf32>
    %99 = vector.extract_strided_slice %98 {offsets = [0, 0], sizes = [16, 128], strides = [1, 1]} : vector<16x256xf32> to vector<16x128xf32>
    %100 = vector.extract_strided_slice %98 {offsets = [0, 128], sizes = [16, 128], strides = [1, 1]} : vector<16x256xf32> to vector<16x128xf32>
    %101 = vector.extract_strided_slice %92 {offsets = [0, 256], sizes = [16, 128], strides = [1, 1]} : vector<16x512xf32> to vector<16x128xf32>
    %102 = math.tanh %101 : vector<16x128xf32>
    %103 = vector.extract_strided_slice %92 {offsets = [0, 384], sizes = [16, 128], strides = [1, 1]} : vector<16x512xf32> to vector<16x128xf32>
    %104 = arith.negf %103 : vector<16x128xf32>
    %105 = math.exp %104 : vector<16x128xf32>
    %cst_25 = arith.constant 1.000000e+00 : f32
    %106 = vector.broadcast %cst_25 : f32 to vector<16x128xf32>
    %107 = arith.addf %106, %105 : vector<16x128xf32>
    %108 = arith.divf %106, %107 : vector<16x128xf32>
    %109 = arith.mulf %100, %84 : vector<16x128xf32>
    %110 = arith.mulf %99, %102 : vector<16x128xf32>
    %111 = arith.addf %109, %110 : vector<16x128xf32>
    %112 = math.tanh %111 : vector<16x128xf32>
    %113 = arith.mulf %108, %112 : vector<16x128xf32>
    %c4 = arith.constant 4 : index
    %c0_26 = arith.constant 0 : index
    %c0_27 = arith.constant 0 : index
    %114 = vector.load %arg2[%c4, %c0_26, %c0_27] : memref<12x16x512xbf16, #tpu.memory_space<vmem>>, vector<1x16x512xbf16>
    %115 = vector.shape_cast %114 : vector<1x16x512xbf16> to vector<16x512xbf16>
    %116 = arith.extf %115 : vector<16x512xbf16> to vector<16x512xf32>
    %117 = arith.truncf %113 : vector<16x128xf32> to vector<16x128xbf16>
    %cst_28 = arith.constant dense<0.000000e+00> : vector<16x512xf32>
    %118 = tpu.matmul %117, %5, %cst_28 {dimension_numbers = #tpu.dot_dimension_numbers<[1], [0], [0], [1], [0, 0, 1, 1], [], []>} : vector<16x128xbf16>, vector<128x512xbf16>, vector<16x512xf32> -> vector<16x512xf32>
    %119 = arith.addf %116, %118 : vector<16x512xf32>
    %120 = vector.extract_strided_slice %119 {offsets = [0, 0], sizes = [16, 256], strides = [1, 1]} : vector<16x512xf32> to vector<16x256xf32>
    %121 = arith.negf %120 : vector<16x256xf32>
    %122 = math.exp %121 : vector<16x256xf32>
    %cst_29 = arith.constant 1.000000e+00 : f32
    %123 = vector.broadcast %cst_29 : f32 to vector<16x256xf32>
    %124 = arith.addf %123, %122 : vector<16x256xf32>
    %125 = arith.divf %123, %124 : vector<16x256xf32>
    %126 = vector.extract_strided_slice %125 {offsets = [0, 0], sizes = [16, 128], strides = [1, 1]} : vector<16x256xf32> to vector<16x128xf32>
    %127 = vector.extract_strided_slice %125 {offsets = [0, 128], sizes = [16, 128], strides = [1, 1]} : vector<16x256xf32> to vector<16x128xf32>
    %128 = vector.extract_strided_slice %119 {offsets = [0, 256], sizes = [16, 128], strides = [1, 1]} : vector<16x512xf32> to vector<16x128xf32>
    %129 = math.tanh %128 : vector<16x128xf32>
    %130 = vector.extract_strided_slice %119 {offsets = [0, 384], sizes = [16, 128], strides = [1, 1]} : vector<16x512xf32> to vector<16x128xf32>
    %131 = arith.negf %130 : vector<16x128xf32>
    %132 = math.exp %131 : vector<16x128xf32>
    %cst_30 = arith.constant 1.000000e+00 : f32
    %133 = vector.broadcast %cst_30 : f32 to vector<16x128xf32>
    %134 = arith.addf %133, %132 : vector<16x128xf32>
    %135 = arith.divf %133, %134 : vector<16x128xf32>
    %136 = arith.mulf %127, %111 : vector<16x128xf32>
    %137 = arith.mulf %126, %129 : vector<16x128xf32>
    %138 = arith.addf %136, %137 : vector<16x128xf32>
    %139 = math.tanh %138 : vector<16x128xf32>
    %140 = arith.mulf %135, %139 : vector<16x128xf32>
    %c5 = arith.constant 5 : index
    %c0_31 = arith.constant 0 : index
    %c0_32 = arith.constant 0 : index
    %141 = vector.load %arg2[%c5, %c0_31, %c0_32] : memref<12x16x512xbf16, #tpu.memory_space<vmem>>, vector<1x16x512xbf16>
    %142 = vector.shape_cast %141 : vector<1x16x512xbf16> to vector<16x512xbf16>
    %143 = arith.extf %142 : vector<16x512xbf16> to vector<16x512xf32>
    %144 = arith.truncf %140 : vector<16x128xf32> to vector<16x128xbf16>
    %cst_33 = arith.constant dense<0.000000e+00> : vector<16x512xf32>
    %145 = tpu.matmul %144, %5, %cst_33 {dimension_numbers = #tpu.dot_dimension_numbers<[1], [0], [0], [1], [0, 0, 1, 1], [], []>} : vector<16x128xbf16>, vector<128x512xbf16>, vector<16x512xf32> -> vector<16x512xf32>
    %146 = arith.addf %143, %145 : vector<16x512xf32>
    %147 = vector.extract_strided_slice %146 {offsets = [0, 0], sizes = [16, 256], strides = [1, 1]} : vector<16x512xf32> to vector<16x256xf32>
    %148 = arith.negf %147 : vector<16x256xf32>
    %149 = math.exp %148 : vector<16x256xf32>
    %cst_34 = arith.constant 1.000000e+00 : f32
    %150 = vector.broadcast %cst_34 : f32 to vector<16x256xf32>
    %151 = arith.addf %150, %149 : vector<16x256xf32>
    %152 = arith.divf %150, %151 : vector<16x256xf32>
    %153 = vector.extract_strided_slice %152 {offsets = [0, 0], sizes = [16, 128], strides = [1, 1]} : vector<16x256xf32> to vector<16x128xf32>
    %154 = vector.extract_strided_slice %152 {offsets = [0, 128], sizes = [16, 128], strides = [1, 1]} : vector<16x256xf32> to vector<16x128xf32>
    %155 = vector.extract_strided_slice %146 {offsets = [0, 256], sizes = [16, 128], strides = [1, 1]} : vector<16x512xf32> to vector<16x128xf32>
    %156 = math.tanh %155 : vector<16x128xf32>
    %157 = vector.extract_strided_slice %146 {offsets = [0, 384], sizes = [16, 128], strides = [1, 1]} : vector<16x512xf32> to vector<16x128xf32>
    %158 = arith.negf %157 : vector<16x128xf32>
    %159 = math.exp %158 : vector<16x128xf32>
    %cst_35 = arith.constant 1.000000e+00 : f32
    %160 = vector.broadcast %cst_35 : f32 to vector<16x128xf32>
    %161 = arith.addf %160, %159 : vector<16x128xf32>
    %162 = arith.divf %160, %161 : vector<16x128xf32>
    %163 = arith.mulf %154, %138 : vector<16x128xf32>
    %164 = arith.mulf %153, %156 : vector<16x128xf32>
    %165 = arith.addf %163, %164 : vector<16x128xf32>
    %166 = math.tanh %165 : vector<16x128xf32>
    %167 = arith.mulf %162, %166 : vector<16x128xf32>
    %c6 = arith.constant 6 : index
    %c0_36 = arith.constant 0 : index
    %c0_37 = arith.constant 0 : index
    %168 = vector.load %arg2[%c6, %c0_36, %c0_37] : memref<12x16x512xbf16, #tpu.memory_space<vmem>>, vector<1x16x512xbf16>
    %169 = vector.shape_cast %168 : vector<1x16x512xbf16> to vector<16x512xbf16>
    %170 = arith.extf %169 : vector<16x512xbf16> to vector<16x512xf32>
    %171 = arith.truncf %167 : vector<16x128xf32> to vector<16x128xbf16>
    %cst_38 = arith.constant dense<0.000000e+00> : vector<16x512xf32>
    %172 = tpu.matmul %171, %5, %cst_38 {dimension_numbers = #tpu.dot_dimension_numbers<[1], [0], [0], [1], [0, 0, 1, 1], [], []>} : vector<16x128xbf16>, vector<128x512xbf16>, vector<16x512xf32> -> vector<16x512xf32>
    %173 = arith.addf %170, %172 : vector<16x512xf32>
    %174 = vector.extract_strided_slice %173 {offsets = [0, 0], sizes = [16, 256], strides = [1, 1]} : vector<16x512xf32> to vector<16x256xf32>
    %175 = arith.negf %174 : vector<16x256xf32>
    %176 = math.exp %175 : vector<16x256xf32>
    %cst_39 = arith.constant 1.000000e+00 : f32
    %177 = vector.broadcast %cst_39 : f32 to vector<16x256xf32>
    %178 = arith.addf %177, %176 : vector<16x256xf32>
    %179 = arith.divf %177, %178 : vector<16x256xf32>
    %180 = vector.extract_strided_slice %179 {offsets = [0, 0], sizes = [16, 128], strides = [1, 1]} : vector<16x256xf32> to vector<16x128xf32>
    %181 = vector.extract_strided_slice %179 {offsets = [0, 128], sizes = [16, 128], strides = [1, 1]} : vector<16x256xf32> to vector<16x128xf32>
    %182 = vector.extract_strided_slice %173 {offsets = [0, 256], sizes = [16, 128], strides = [1, 1]} : vector<16x512xf32> to vector<16x128xf32>
    %183 = math.tanh %182 : vector<16x128xf32>
    %184 = vector.extract_strided_slice %173 {offsets = [0, 384], sizes = [16, 128], strides = [1, 1]} : vector<16x512xf32> to vector<16x128xf32>
    %185 = arith.negf %184 : vector<16x128xf32>
    %186 = math.exp %185 : vector<16x128xf32>
    %cst_40 = arith.constant 1.000000e+00 : f32
    %187 = vector.broadcast %cst_40 : f32 to vector<16x128xf32>
    %188 = arith.addf %187, %186 : vector<16x128xf32>
    %189 = arith.divf %187, %188 : vector<16x128xf32>
    %190 = arith.mulf %181, %165 : vector<16x128xf32>
    %191 = arith.mulf %180, %183 : vector<16x128xf32>
    %192 = arith.addf %190, %191 : vector<16x128xf32>
    %193 = math.tanh %192 : vector<16x128xf32>
    %194 = arith.mulf %189, %193 : vector<16x128xf32>
    %c7 = arith.constant 7 : index
    %c0_41 = arith.constant 0 : index
    %c0_42 = arith.constant 0 : index
    %195 = vector.load %arg2[%c7, %c0_41, %c0_42] : memref<12x16x512xbf16, #tpu.memory_space<vmem>>, vector<1x16x512xbf16>
    %196 = vector.shape_cast %195 : vector<1x16x512xbf16> to vector<16x512xbf16>
    %197 = arith.extf %196 : vector<16x512xbf16> to vector<16x512xf32>
    %198 = arith.truncf %194 : vector<16x128xf32> to vector<16x128xbf16>
    %cst_43 = arith.constant dense<0.000000e+00> : vector<16x512xf32>
    %199 = tpu.matmul %198, %5, %cst_43 {dimension_numbers = #tpu.dot_dimension_numbers<[1], [0], [0], [1], [0, 0, 1, 1], [], []>} : vector<16x128xbf16>, vector<128x512xbf16>, vector<16x512xf32> -> vector<16x512xf32>
    %200 = arith.addf %197, %199 : vector<16x512xf32>
    %201 = vector.extract_strided_slice %200 {offsets = [0, 0], sizes = [16, 256], strides = [1, 1]} : vector<16x512xf32> to vector<16x256xf32>
    %202 = arith.negf %201 : vector<16x256xf32>
    %203 = math.exp %202 : vector<16x256xf32>
    %cst_44 = arith.constant 1.000000e+00 : f32
    %204 = vector.broadcast %cst_44 : f32 to vector<16x256xf32>
    %205 = arith.addf %204, %203 : vector<16x256xf32>
    %206 = arith.divf %204, %205 : vector<16x256xf32>
    %207 = vector.extract_strided_slice %206 {offsets = [0, 0], sizes = [16, 128], strides = [1, 1]} : vector<16x256xf32> to vector<16x128xf32>
    %208 = vector.extract_strided_slice %206 {offsets = [0, 128], sizes = [16, 128], strides = [1, 1]} : vector<16x256xf32> to vector<16x128xf32>
    %209 = vector.extract_strided_slice %200 {offsets = [0, 256], sizes = [16, 128], strides = [1, 1]} : vector<16x512xf32> to vector<16x128xf32>
    %210 = math.tanh %209 : vector<16x128xf32>
    %211 = vector.extract_strided_slice %200 {offsets = [0, 384], sizes = [16, 128], strides = [1, 1]} : vector<16x512xf32> to vector<16x128xf32>
    %212 = arith.negf %211 : vector<16x128xf32>
    %213 = math.exp %212 : vector<16x128xf32>
    %cst_45 = arith.constant 1.000000e+00 : f32
    %214 = vector.broadcast %cst_45 : f32 to vector<16x128xf32>
    %215 = arith.addf %214, %213 : vector<16x128xf32>
    %216 = arith.divf %214, %215 : vector<16x128xf32>
    %217 = arith.mulf %208, %192 : vector<16x128xf32>
    %218 = arith.mulf %207, %210 : vector<16x128xf32>
    %219 = arith.addf %217, %218 : vector<16x128xf32>
    %220 = math.tanh %219 : vector<16x128xf32>
    %221 = arith.mulf %216, %220 : vector<16x128xf32>
    %c8 = arith.constant 8 : index
    %c0_46 = arith.constant 0 : index
    %c0_47 = arith.constant 0 : index
    %222 = vector.load %arg2[%c8, %c0_46, %c0_47] : memref<12x16x512xbf16, #tpu.memory_space<vmem>>, vector<1x16x512xbf16>
    %223 = vector.shape_cast %222 : vector<1x16x512xbf16> to vector<16x512xbf16>
    %224 = arith.extf %223 : vector<16x512xbf16> to vector<16x512xf32>
    %225 = arith.truncf %221 : vector<16x128xf32> to vector<16x128xbf16>
    %cst_48 = arith.constant dense<0.000000e+00> : vector<16x512xf32>
    %226 = tpu.matmul %225, %5, %cst_48 {dimension_numbers = #tpu.dot_dimension_numbers<[1], [0], [0], [1], [0, 0, 1, 1], [], []>} : vector<16x128xbf16>, vector<128x512xbf16>, vector<16x512xf32> -> vector<16x512xf32>
    %227 = arith.addf %224, %226 : vector<16x512xf32>
    %228 = vector.extract_strided_slice %227 {offsets = [0, 0], sizes = [16, 256], strides = [1, 1]} : vector<16x512xf32> to vector<16x256xf32>
    %229 = arith.negf %228 : vector<16x256xf32>
    %230 = math.exp %229 : vector<16x256xf32>
    %cst_49 = arith.constant 1.000000e+00 : f32
    %231 = vector.broadcast %cst_49 : f32 to vector<16x256xf32>
    %232 = arith.addf %231, %230 : vector<16x256xf32>
    %233 = arith.divf %231, %232 : vector<16x256xf32>
    %234 = vector.extract_strided_slice %233 {offsets = [0, 0], sizes = [16, 128], strides = [1, 1]} : vector<16x256xf32> to vector<16x128xf32>
    %235 = vector.extract_strided_slice %233 {offsets = [0, 128], sizes = [16, 128], strides = [1, 1]} : vector<16x256xf32> to vector<16x128xf32>
    %236 = vector.extract_strided_slice %227 {offsets = [0, 256], sizes = [16, 128], strides = [1, 1]} : vector<16x512xf32> to vector<16x128xf32>
    %237 = math.tanh %236 : vector<16x128xf32>
    %238 = vector.extract_strided_slice %227 {offsets = [0, 384], sizes = [16, 128], strides = [1, 1]} : vector<16x512xf32> to vector<16x128xf32>
    %239 = arith.negf %238 : vector<16x128xf32>
    %240 = math.exp %239 : vector<16x128xf32>
    %cst_50 = arith.constant 1.000000e+00 : f32
    %241 = vector.broadcast %cst_50 : f32 to vector<16x128xf32>
    %242 = arith.addf %241, %240 : vector<16x128xf32>
    %243 = arith.divf %241, %242 : vector<16x128xf32>
    %244 = arith.mulf %235, %219 : vector<16x128xf32>
    %245 = arith.mulf %234, %237 : vector<16x128xf32>
    %246 = arith.addf %244, %245 : vector<16x128xf32>
    %247 = math.tanh %246 : vector<16x128xf32>
    %248 = arith.mulf %243, %247 : vector<16x128xf32>
    %c9 = arith.constant 9 : index
    %c0_51 = arith.constant 0 : index
    %c0_52 = arith.constant 0 : index
    %249 = vector.load %arg2[%c9, %c0_51, %c0_52] : memref<12x16x512xbf16, #tpu.memory_space<vmem>>, vector<1x16x512xbf16>
    %250 = vector.shape_cast %249 : vector<1x16x512xbf16> to vector<16x512xbf16>
    %251 = arith.extf %250 : vector<16x512xbf16> to vector<16x512xf32>
    %252 = arith.truncf %248 : vector<16x128xf32> to vector<16x128xbf16>
    %cst_53 = arith.constant dense<0.000000e+00> : vector<16x512xf32>
    %253 = tpu.matmul %252, %5, %cst_53 {dimension_numbers = #tpu.dot_dimension_numbers<[1], [0], [0], [1], [0, 0, 1, 1], [], []>} : vector<16x128xbf16>, vector<128x512xbf16>, vector<16x512xf32> -> vector<16x512xf32>
    %254 = arith.addf %251, %253 : vector<16x512xf32>
    %255 = vector.extract_strided_slice %254 {offsets = [0, 0], sizes = [16, 256], strides = [1, 1]} : vector<16x512xf32> to vector<16x256xf32>
    %256 = arith.negf %255 : vector<16x256xf32>
    %257 = math.exp %256 : vector<16x256xf32>
    %cst_54 = arith.constant 1.000000e+00 : f32
    %258 = vector.broadcast %cst_54 : f32 to vector<16x256xf32>
    %259 = arith.addf %258, %257 : vector<16x256xf32>
    %260 = arith.divf %258, %259 : vector<16x256xf32>
    %261 = vector.extract_strided_slice %260 {offsets = [0, 0], sizes = [16, 128], strides = [1, 1]} : vector<16x256xf32> to vector<16x128xf32>
    %262 = vector.extract_strided_slice %260 {offsets = [0, 128], sizes = [16, 128], strides = [1, 1]} : vector<16x256xf32> to vector<16x128xf32>
    %263 = vector.extract_strided_slice %254 {offsets = [0, 256], sizes = [16, 128], strides = [1, 1]} : vector<16x512xf32> to vector<16x128xf32>
    %264 = math.tanh %263 : vector<16x128xf32>
    %265 = vector.extract_strided_slice %254 {offsets = [0, 384], sizes = [16, 128], strides = [1, 1]} : vector<16x512xf32> to vector<16x128xf32>
    %266 = arith.negf %265 : vector<16x128xf32>
    %267 = math.exp %266 : vector<16x128xf32>
    %cst_55 = arith.constant 1.000000e+00 : f32
    %268 = vector.broadcast %cst_55 : f32 to vector<16x128xf32>
    %269 = arith.addf %268, %267 : vector<16x128xf32>
    %270 = arith.divf %268, %269 : vector<16x128xf32>
    %271 = arith.mulf %262, %246 : vector<16x128xf32>
    %272 = arith.mulf %261, %264 : vector<16x128xf32>
    %273 = arith.addf %271, %272 : vector<16x128xf32>
    %274 = math.tanh %273 : vector<16x128xf32>
    %275 = arith.mulf %270, %274 : vector<16x128xf32>
    %c10 = arith.constant 10 : index
    %c0_56 = arith.constant 0 : index
    %c0_57 = arith.constant 0 : index
    %276 = vector.load %arg2[%c10, %c0_56, %c0_57] : memref<12x16x512xbf16, #tpu.memory_space<vmem>>, vector<1x16x512xbf16>
    %277 = vector.shape_cast %276 : vector<1x16x512xbf16> to vector<16x512xbf16>
    %278 = arith.extf %277 : vector<16x512xbf16> to vector<16x512xf32>
    %279 = arith.truncf %275 : vector<16x128xf32> to vector<16x128xbf16>
    %cst_58 = arith.constant dense<0.000000e+00> : vector<16x512xf32>
    %280 = tpu.matmul %279, %5, %cst_58 {dimension_numbers = #tpu.dot_dimension_numbers<[1], [0], [0], [1], [0, 0, 1, 1], [], []>} : vector<16x128xbf16>, vector<128x512xbf16>, vector<16x512xf32> -> vector<16x512xf32>
    %281 = arith.addf %278, %280 : vector<16x512xf32>
    %282 = vector.extract_strided_slice %281 {offsets = [0, 0], sizes = [16, 256], strides = [1, 1]} : vector<16x512xf32> to vector<16x256xf32>
    %283 = arith.negf %282 : vector<16x256xf32>
    %284 = math.exp %283 : vector<16x256xf32>
    %cst_59 = arith.constant 1.000000e+00 : f32
    %285 = vector.broadcast %cst_59 : f32 to vector<16x256xf32>
    %286 = arith.addf %285, %284 : vector<16x256xf32>
    %287 = arith.divf %285, %286 : vector<16x256xf32>
    %288 = vector.extract_strided_slice %287 {offsets = [0, 0], sizes = [16, 128], strides = [1, 1]} : vector<16x256xf32> to vector<16x128xf32>
    %289 = vector.extract_strided_slice %287 {offsets = [0, 128], sizes = [16, 128], strides = [1, 1]} : vector<16x256xf32> to vector<16x128xf32>
    %290 = vector.extract_strided_slice %281 {offsets = [0, 256], sizes = [16, 128], strides = [1, 1]} : vector<16x512xf32> to vector<16x128xf32>
    %291 = math.tanh %290 : vector<16x128xf32>
    %292 = vector.extract_strided_slice %281 {offsets = [0, 384], sizes = [16, 128], strides = [1, 1]} : vector<16x512xf32> to vector<16x128xf32>
    %293 = arith.negf %292 : vector<16x128xf32>
    %294 = math.exp %293 : vector<16x128xf32>
    %cst_60 = arith.constant 1.000000e+00 : f32
    %295 = vector.broadcast %cst_60 : f32 to vector<16x128xf32>
    %296 = arith.addf %295, %294 : vector<16x128xf32>
    %297 = arith.divf %295, %296 : vector<16x128xf32>
    %298 = arith.mulf %289, %273 : vector<16x128xf32>
    %299 = arith.mulf %288, %291 : vector<16x128xf32>
    %300 = arith.addf %298, %299 : vector<16x128xf32>
    %301 = math.tanh %300 : vector<16x128xf32>
    %302 = arith.mulf %297, %301 : vector<16x128xf32>
    %c11 = arith.constant 11 : index
    %c0_61 = arith.constant 0 : index
    %c0_62 = arith.constant 0 : index
    %303 = vector.load %arg2[%c11, %c0_61, %c0_62] : memref<12x16x512xbf16, #tpu.memory_space<vmem>>, vector<1x16x512xbf16>
    %304 = vector.shape_cast %303 : vector<1x16x512xbf16> to vector<16x512xbf16>
    %305 = arith.extf %304 : vector<16x512xbf16> to vector<16x512xf32>
    %306 = arith.truncf %302 : vector<16x128xf32> to vector<16x128xbf16>
    %cst_63 = arith.constant dense<0.000000e+00> : vector<16x512xf32>
    %307 = tpu.matmul %306, %5, %cst_63 {dimension_numbers = #tpu.dot_dimension_numbers<[1], [0], [0], [1], [0, 0, 1, 1], [], []>} : vector<16x128xbf16>, vector<128x512xbf16>, vector<16x512xf32> -> vector<16x512xf32>
    %308 = arith.addf %305, %307 : vector<16x512xf32>
    %309 = vector.extract_strided_slice %308 {offsets = [0, 0], sizes = [16, 256], strides = [1, 1]} : vector<16x512xf32> to vector<16x256xf32>
    %310 = arith.negf %309 : vector<16x256xf32>
    %311 = math.exp %310 : vector<16x256xf32>
    %cst_64 = arith.constant 1.000000e+00 : f32
    %312 = vector.broadcast %cst_64 : f32 to vector<16x256xf32>
    %313 = arith.addf %312, %311 : vector<16x256xf32>
    %314 = arith.divf %312, %313 : vector<16x256xf32>
    %315 = vector.extract_strided_slice %314 {offsets = [0, 0], sizes = [16, 128], strides = [1, 1]} : vector<16x256xf32> to vector<16x128xf32>
    %316 = vector.extract_strided_slice %314 {offsets = [0, 128], sizes = [16, 128], strides = [1, 1]} : vector<16x256xf32> to vector<16x128xf32>
    %317 = vector.extract_strided_slice %308 {offsets = [0, 256], sizes = [16, 128], strides = [1, 1]} : vector<16x512xf32> to vector<16x128xf32>
    %318 = math.tanh %317 : vector<16x128xf32>
    %319 = vector.extract_strided_slice %308 {offsets = [0, 384], sizes = [16, 128], strides = [1, 1]} : vector<16x512xf32> to vector<16x128xf32>
    %320 = arith.negf %319 : vector<16x128xf32>
    %321 = math.exp %320 : vector<16x128xf32>
    %cst_65 = arith.constant 1.000000e+00 : f32
    %322 = vector.broadcast %cst_65 : f32 to vector<16x128xf32>
    %323 = arith.addf %322, %321 : vector<16x128xf32>
    %324 = arith.divf %322, %323 : vector<16x128xf32>
    %325 = arith.mulf %316, %300 : vector<16x128xf32>
    %326 = arith.mulf %315, %318 : vector<16x128xf32>
    %327 = arith.addf %325, %326 : vector<16x128xf32>
    %328 = math.tanh %327 : vector<16x128xf32>
    %329 = arith.mulf %324, %328 : vector<16x128xf32>
    %c0_66 = arith.constant 0 : index
    %c0_67 = arith.constant 0 : index
    %330 = vector.load %arg10[%c0_66, %c0_67] : memref<16x128xf32, #tpu.memory_space<vmem>>, vector<16x128xf32>
    tpu.vector_store %arg10[%c0_66, %c0_67], %329 {strides = array<i32>} : memref<16x128xf32, #tpu.memory_space<vmem>>, vector<16x128xf32>,
    %c0_68 = arith.constant 0 : index
    %c0_69 = arith.constant 0 : index
    %331 = vector.load %arg11[%c0_68, %c0_69] : memref<16x128xf32, #tpu.memory_space<vmem>>, vector<16x128xf32>
    tpu.vector_store %arg11[%c0_68, %c0_69], %327 {strides = array<i32>} : memref<16x128xf32, #tpu.memory_space<vmem>>, vector<16x128xf32>,
    %c0_i32_70 = arith.constant 0 : i32
    %332 = arith.cmpi eq, %arg1, %c0_i32_70 : i32
    %333 = arith.extui %332 : i1 to i32
    %c0_i32_71 = arith.constant 0 : i32
    %334 = arith.cmpi ne, %333, %c0_i32_71 : i32
    scf.if %334 {
      %c0_72 = arith.constant 0 : index
      %c0_73 = arith.constant 0 : index
      %335 = vector.load %arg4[%c0_72, %c0_73] : memref<128x128xf32, #tpu.memory_space<vmem>>, vector<128x128xf32>
      %cst_74 = arith.constant dense<0.000000e+00> : vector<16x128xf32>
      %336 = tpu.matmul %329, %335, %cst_74 {dimension_numbers = #tpu.dot_dimension_numbers<[1], [0], [0], [1], [0, 0, 1, 1], [], []>} : vector<16x128xf32>, vector<128x128xf32>, vector<16x128xf32> -> vector<16x128xf32>
      %c0_75 = arith.constant 0 : index
      %c0_76 = arith.constant 0 : index
      %337 = vector.load %arg5[%c0_75, %c0_76] : memref<1x128xf32, #tpu.memory_space<vmem>>, vector<1x128xf32>
      %338 = vector.broadcast %337 : vector<1x128xf32> to vector<16x128xf32>
      %339 = arith.addf %336, %338 : vector<16x128xf32>
      %c0_77 = arith.constant 0 : index
      %c0_78 = arith.constant 0 : index
      %340 = vector.load %arg7[%c0_77, %c0_78] : memref<16x128xf32, #tpu.memory_space<vmem>>, vector<16x128xf32>
      tpu.vector_store %arg7[%c0_77, %c0_78], %339 {strides = array<i32>} : memref<16x128xf32, #tpu.memory_space<vmem>>, vector<16x128xf32>,
      %cst_79 = arith.constant dense<0xFF800000> : vector<16xf32>
      %341 = vector.multi_reduction <maximumf>, %339, %cst_79 [1] : vector<16x128xf32> to vector<16xf32>
      %342 = vector.shape_cast %341 : vector<16xf32> to vector<16x1xf32>
      %343 = vector.broadcast %342 : vector<16x1xf32> to vector<16x128xf32>
      %344 = arith.subf %339, %343 : vector<16x128xf32>
      %345 = math.exp %344 : vector<16x128xf32>
      %cst_80 = arith.constant dense<0.000000e+00> : vector<16xf32>
      %346 = vector.multi_reduction <add>, %345, %cst_80 [1] : vector<16x128xf32> to vector<16xf32>
      %347 = vector.shape_cast %346 : vector<16xf32> to vector<16x1xf32>
      %348 = vector.broadcast %347 : vector<16x1xf32> to vector<16x128xf32>
      %349 = arith.divf %345, %348 : vector<16x128xf32>
      %c0_81 = arith.constant 0 : index
      %c0_82 = arith.constant 0 : index
      %350 = vector.load %arg8[%c0_81, %c0_82] : memref<16x128xf32, #tpu.memory_space<vmem>>, vector<16x128xf32>
      tpu.vector_store %arg8[%c0_81, %c0_82], %349 {strides = array<i32>} : memref<16x128xf32, #tpu.memory_space<vmem>>, vector<16x128xf32>,
      %351 = tpu.iota {dimensions = array<i32: 1>} : vector<16x128xi32>
      %c0_83 = arith.constant 0 : index
      %c0_84 = arith.constant 0 : index
      %352 = vector.load %arg6[%c0_83, %c0_84] : memref<16x1xi32, #tpu.memory_space<vmem>>, vector<16x1xi32>
      %353 = vector.broadcast %352 : vector<16x1xi32> to vector<16x128xi32>
      %354 = arith.cmpi eq, %351, %353 : vector<16x128xi32>
      %355 = arith.extui %354 : vector<16x128xi1> to vector<16x128xi32>
      %356 = arith.sitofp %355 : vector<16x128xi32> to vector<16x128xf32>
      %357 = vector.broadcast %342 : vector<16x1xf32> to vector<16x128xf32>
      %358 = arith.subf %339, %357 : vector<16x128xf32>
      %359 = math.log %347 : vector<16x1xf32>
      %360 = vector.broadcast %359 : vector<16x1xf32> to vector<16x128xf32>
      %361 = arith.subf %358, %360 : vector<16x128xf32>
      %362 = arith.mulf %356, %361 : vector<16x128xf32>
      %cst_85 = arith.constant dense<0.000000e+00> : vector<16xf32>
      %363 = vector.multi_reduction <add>, %362, %cst_85 [1] : vector<16x128xf32> to vector<16xf32>
      %364 = vector.shape_cast %363 : vector<16xf32> to vector<16x1xf32>
      %cst_86 = arith.constant 0.000000e+00 : f32
      %365 = vector.broadcast %cst_86 : f32 to vector<16x1xf32>
      %366 = arith.subf %365, %364 : vector<16x1xf32>
      %c0_87 = arith.constant 0 : index
      %c0_88 = arith.constant 0 : index
      %367 = vector.load %arg9[%c0_87, %c0_88] : memref<16x1xf32, #tpu.memory_space<vmem>>, vector<16x1xf32>
      tpu.vector_store %arg9[%c0_87, %c0_88], %366 {strides = array<i32>} : memref<16x1xf32, #tpu.memory_space<vmem>>, vector<16x1xf32>,
    } else {
    }
    return
  }
  func.func @transform_0(%arg0: i32, %arg1: i32) -> (i32, i32, i32) {
    %c0_i32 = arith.constant 0 : i32
    %c0_i32_0 = arith.constant 0 : i32
    return %arg1, %arg0, %c0_i32 : i32, i32, i32
  }
  func.func @transform_1(%arg0: i32, %arg1: i32) -> (i32, i32) {
    %c0_i32 = arith.constant 0 : i32
    %c0_i32_0 = arith.constant 0 : i32
    %c0_i32_1 = arith.constant 0 : i32
    return %c0_i32, %c0_i32_0 : i32, i32
  }
  func.func @transform_2(%arg0: i32, %arg1: i32) -> (i32, i32) {
    %c0_i32 = arith.constant 0 : i32
    %c0_i32_0 = arith.constant 0 : i32
    %c0_i32_1 = arith.constant 0 : i32
    return %c0_i32, %c0_i32_0 : i32, i32
  }
  func.func @transform_3(%arg0: i32, %arg1: i32) -> (i32, i32) {
    %c0_i32 = arith.constant 0 : i32
    %c0_i32_0 = arith.constant 0 : i32
    %c0_i32_1 = arith.constant 0 : i32
    return %c0_i32, %c0_i32_0 : i32, i32
  }
  func.func @transform_4(%arg0: i32, %arg1: i32) -> (i32, i32) {
    %c0_i32 = arith.constant 0 : i32
    %c0_i32_0 = arith.constant 0 : i32
    return %arg0, %c0_i32 : i32, i32
  }
  func.func @transform_5(%arg0: i32, %arg1: i32) -> (i32, i32) {
    %c0_i32 = arith.constant 0 : i32
    %c0_i32_0 = arith.constant 0 : i32
    return %arg0, %c0_i32 : i32, i32
  }
  func.func @transform_6(%arg0: i32, %arg1: i32) -> (i32, i32) {
    %c0_i32 = arith.constant 0 : i32
    %c0_i32_0 = arith.constant 0 : i32
    return %arg0, %c0_i32 : i32, i32
  }
  func.func @transform_7(%arg0: i32, %arg1: i32) -> (i32, i32) {
    %c0_i32 = arith.constant 0 : i32
    %c0_i32_0 = arith.constant 0 : i32
    return %arg0, %c0_i32 : i32, i32
  }
}

</mosaic_0001>

<bundles_post_ra>
// kernel: elmo_lstm_classifier_forward.2
= control target key start
LH: loop header
LB: loop body
LE: loop exit
PB: predicated region body
PF: predicated region fallthrough
CT: control target
= control target key end

     0   :  { %v1981_v1 = vmov 0   ;;  %vm795_vm0 = vcmask 523264   ;;  %s2551_s3 = inlined_call_operand.vmem [shape: bf16[128,512], index: 3, kind: input, shape index: {}]   ;;  %s2552_s1 = inlined_call_operand.vmem [shape: bf16[192,128], index: 1, kind: input, shape index: {}]   ;;  %s2553_s2 = inlined_call_operand.vmem [shape: bf16[64,512], index: 2, kind: input, shape index: {}]   ;;  %s2554_s0 = inlined_call_operand.vmem [shape: bf16[192,64], index: 0, kind: input, shape index: {}]   ;;  %s2555_s4 = inlined_call_operand.vmem [shape: f32[1,512], index: 4, kind: input, shape index: {}]   ;;  %s2556_s5 = inlined_call_operand.vmem [shape: bf16[192,512], index: 5, kind: output, shape index: {}]  }
   0x1   :  { %v1885_v0 = vld [vmem:[%s2551_s3 + $0x4] ss:$16 sps:$4 sm:$0xff]   ;;  %381 = vmatprep.mubr.bf16.mxu0 %v1981_v1  ;;  %534 = vmatprep.mubr.bf16.mxu1 %v1981_v1  ;;  %v1887_v2 = vld [vmem:[%s2551_s3 + $0xc] ss:$16 sps:$4 sm:$0xff]   ;;  %v1889_v3 = vld [vmem:[%s2551_s3] ss:$16 sps:$4 sm:$0xff]  }
   0x2   :  { %349 = vmatprep.subr.bf16.mxu0 %v1885_v0  ;;  %v1890_v4 = vld [vmem:[%s2551_s3 + $0x8] ss:$16 sps:$4 sm:$0xff]   ;;  %502 = vmatprep.subr.bf16.mxu1 %v1887_v2  ;;  %v1891_v5 = vld [vmem:[%s2551_s3 + $0x24] ss:$16 sps:$4 sm:$0xff]   ;;  %v1893_v6 = vld [vmem:[%s2551_s3 + $0x2c] ss:$16 sps:$4 sm:$0xff]  }
   0x3   :  { %350 = vmatpush1.bf16.msra.mxu0 %v1889_v3  ;;  %503 = vmatpush1.bf16.msra.mxu1 %v1890_v4  ;;  %v1895_v7 = vld [vmem:[%s2551_s3 + $0x20] ss:$16 sps:$4 sm:$0xff]   ;;  %v1896_v8 = vld [vmem:[%s2551_s3 + $0x28] ss:$16 sps:$4 sm:$0xff]   ;;  %v1897_v9 = vld [vmem:[%s2551_s3 + $0x44] ss:$16 sps:$4 sm:$0xff]  }
   0x4   :  { %351 = vmatprep.subr.bf16.mxu0 %v1891_v5  ;;  %504 = vmatprep.subr.bf16.mxu1 %v1893_v6  ;;  %v1899_v10 = vld [vmem:[%s2551_s3 + $0x4c] ss:$16 sps:$4 sm:$0xff]   ;;  %v1901_v11 = vld [vmem:[%s2551_s3 + $0x40] ss:$16 sps:$4 sm:$0xff]   ;;  %v1902_v12 = vld [vmem:[%s2551_s3 + $0x48] ss:$16 sps:$4 sm:$0xff]  }
   0x5   :  { %v1903_v13 = vld [vmem:[%s2551_s3 + $0x64] ss:$16 sps:$4 sm:$0xff]   ;;  %v1905_v14 = vld [vmem:[%s2551_s3 + $0x6c] ss:$16 sps:$4 sm:$0xff]   ;;  %v1907_v15 = vld [vmem:[%s2551_s3 + $0x60] ss:$16 sps:$4 sm:$0xff]  }
   0x6   :  { %v1908_v16 = vld [vmem:[%s2551_s3 + $0x68] ss:$16 sps:$4 sm:$0xff]   ;;  %v1909_v17 = vld [vmem:[%s2551_s3 + $0x84] ss:$16 sps:$4 sm:$0xff]   ;;  %v1911_v18 = vld [vmem:[%s2551_s3 + $0x8c] ss:$16 sps:$4 sm:$0xff]  }
   0x7   :  { %352 = vmatpush1.bf16.msra.mxu0 %v1895_v7  ;;  %505 = vmatpush1.bf16.msra.mxu1 %v1896_v8  ;;  %v1913_v19 = vld [vmem:[%s2551_s3 + $0x80] ss:$16 sps:$4 sm:$0xff]   ;;  %v1914_v20 = vld [vmem:[%s2551_s3 + $0x88] ss:$16 sps:$4 sm:$0xff]   ;;  %v1915_v21 = vld [vmem:[%s2551_s3 + $0xa4] ss:$16 sps:$4 sm:$0xff]  }
   0x8   :  { %353 = vmatprep.subr.bf16.mxu0 %v1897_v9  ;;  %506 = vmatprep.subr.bf16.mxu1 %v1899_v10  ;;  %v1917_v22 = vld [vmem:[%s2551_s3 + $0xac] ss:$16 sps:$4 sm:$0xff]   ;;  %v1919_v23 = vld [vmem:[%s2551_s3 + $0xa0] ss:$16 sps:$4 sm:$0xff]   ;;  %v1920_v24 = vld [vmem:[%s2551_s3 + $0xa8] ss:$16 sps:$4 sm:$0xff]   ;;  %v1140_v10 = vlaneseq }
   0x9   :  { %v1921_v25 = vld [vmem:[%s2551_s3 + $0xc4] ss:$16 sps:$4 sm:$0xff]   ;;  %v1923_v26 = vld [vmem:[%s2551_s3 + $0xcc] ss:$16 sps:$4 sm:$0xff]   ;;  %v1925_v27 = vld [vmem:[%s2551_s3 + $0xc0] ss:$16 sps:$4 sm:$0xff]  }
   0xa   :  { %v1926_v28 = vld [vmem:[%s2551_s3 + $0xc8] ss:$16 sps:$4 sm:$0xff]   ;;  %v1927_v29 = vld [vmem:[%s2551_s3 + $0xe4] ss:$16 sps:$4 sm:$0xff]   ;;  %v1929_v30 = vld [vmem:[%s2551_s3 + $0xec] ss:$16 sps:$4 sm:$0xff]  }
   0xb   :  { %354 = vmatpush1.bf16.msra.mxu0 %v1901_v11  ;;  %507 = vmatpush1.bf16.msra.mxu1 %v1902_v12  ;;  %v1931_v31 = vld [vmem:[%s2551_s3 + $0xe0] ss:$16 sps:$4 sm:$0xff]   ;;  %v1932_v32 = vld [vmem:[%s2551_s3 + $0xe8] ss:$16 sps:$4 sm:$0xff]   ;;  %v1936_v33 = vld [vmem:[%s2553_s2 + $0x4] ss:$16 sps:$4 sm:$0xff]  }
   0xc   :  { %355 = vmatprep.subr.bf16.mxu0 %v1903_v13  ;;  %508 = vmatprep.subr.bf16.mxu1 %v1905_v14  ;;  %v1939_v34 = vld [vmem:[%s2553_s2 + $0xc] ss:$16 sps:$4 sm:$0xff]   ;;  %v1933_v35 = vld [vmem:[%s2552_s1] sm:$0xff]   ;;  %v1937_v37 = vld [vmem:[%s2553_s2 + $0x8] ss:$16 sps:$4 sm:$0xff]   ;;  %v1141_v11 = vshrl.u32 %v1140_v10, 7 }
   0xd   :  { %v1934_v36 = vld [vmem:[%s2553_s2] ss:$16 sps:$4 sm:$0xff]   ;;  %v1945_v39 = vld [vmem:[%s2553_s2 + $0x24] ss:$16 sps:$4 sm:$0xff]   ;;  %v1948_v40 = vld [vmem:[%s2553_s2 + $0x2c] ss:$16 sps:$4 sm:$0xff]  }
   0xe   :  { %v1943_v38 = vld [vmem:[%s2553_s2 + $0x20] ss:$16 sps:$4 sm:$0xff]   ;;  %v1946_v41 = vld [vmem:[%s2553_s2 + $0x28] ss:$16 sps:$4 sm:$0xff]   ;;  %v1954_v42 = vld [vmem:[%s2553_s2 + $0x44] ss:$16 sps:$4 sm:$0xff]  }
   0xf   :  { %356 = vmatpush1.bf16.msra.mxu0 %v1907_v15  ;;  %509 = vmatpush1.bf16.msra.mxu1 %v1908_v16  ;;  %v1957_v43 = vld [vmem:[%s2553_s2 + $0x4c] ss:$16 sps:$4 sm:$0xff]   ;;  %v1952_v45 = vld [vmem:[%s2553_s2 + $0x40] ss:$16 sps:$4 sm:$0xff]   ;;  %v1955_v46 = vld [vmem:[%s2553_s2 + $0x48] ss:$16 sps:$4 sm:$0xff]  }
  0x10   :  { %357 = vmatprep.subr.bf16.mxu0 %v1909_v17  ;;  %510 = vmatprep.subr.bf16.mxu1 %v1911_v18  ;;  %v1940_v44 = vld [vmem:[%s2552_s1 + $0x8] sm:$0xff]   ;;  %v1963_v47 = vld [vmem:[%s2553_s2 + $0x64] ss:$16 sps:$4 sm:$0xff]   ;;  %v1961_v49 = vld [vmem:[%s2553_s2 + $0x60] ss:$16 sps:$4 sm:$0xff]   ;;  %v1142_v12 = vsub.s32 0, %v1141_v11 }
  0x11   :  { %v1966_v48 = vld [vmem:[%s2553_s2 + $0x6c] ss:$16 sps:$4 sm:$0xff]   ;;  %v1964_v50 = vld [vmem:[%s2553_s2 + $0x68] ss:$16 sps:$4 sm:$0xff]   ;;  %v1941_v51 = vld [vmem:[%s2552_s1 + $0x10] sm:$0xff]   ;;  %v1150_v13 = vsub.s32 2, %v1141_v11 }
  0x12   :  { %v1942_v52 = vld [vmem:[%s2552_s1 + $0x18] sm:$0xff]   ;;  %v1949_v53 = vld [vmem:[%s2552_s1 + $0x20] sm:$0xff]   ;;  %v1950_v54 = vld [vmem:[%s2552_s1 + $0x28] sm:$0xff]   ;;  %v1146_v15 = vsub.s32 1, %v1141_v11  ;;  %v1154_v16 = vsub.s32 3, %v1141_v11 }
  0x13   :  { %358 = vmatpush1.bf16.msra.mxu0 %v1913_v19  ;;  %511 = vmatpush1.bf16.msra.mxu1 %v1914_v20  ;;  %v1951_v55 = vld [vmem:[%s2552_s1 + $0x30] sm:$0xff]   ;;  %v1958_v56 = vld [vmem:[%s2552_s1 + $0x38] sm:$0xff]   ;;  %v1959_v57 = vld [vmem:[%s2552_s1 + $0x40] sm:$0xff]  }
  0x14   :  { %359 = vmatprep.subr.bf16.mxu0 %v1915_v21  ;;  %512 = vmatprep.subr.bf16.mxu1 %v1917_v22  ;;  %v1960_v58 = vld [vmem:[%s2552_s1 + $0x48] sm:$0xff]   ;;  %v1967_v59 = vld [vmem:[%s2552_s1 + $0x50] sm:$0xff]   ;;  %v1968_v60 = vld [vmem:[%s2552_s1 + $0x58] sm:$0xff]  }
  0x15   :  { %v1969_v61 = vld [vmem:[%s2554_s0] sm:$0xff]   ;;  %v1970_v62 = vld [vmem:[%s2554_s0 + $0x8] sm:$0xff]   ;;  %v1971_v63 = vld [vmem:[%s2554_s0 + $0x10] sm:$0xff]  }
  0x16   :  { %v1972_v0 = vld [vmem:[%s2554_s0 + $0x18] sm:$0xff]   ;;  %v1973_v2 = vld [vmem:[%s2554_s0 + $0x20] sm:$0xff]   ;;  %v1974_v3 = vld [vmem:[%s2554_s0 + $0x28] sm:$0xff]  }
  0x17   :  { %360 = vmatpush1.bf16.msra.mxu0 %v1919_v23  ;;  %513 = vmatpush1.bf16.msra.mxu1 %v1920_v24  ;;  %v1975_v4 = vld [vmem:[%s2554_s0 + $0x30] sm:$0xff]   ;;  %v1976_v5 = vld [vmem:[%s2554_s0 + $0x38] sm:$0xff]   ;;  %v1977_v6 = vld [vmem:[%s2554_s0 + $0x40] sm:$0xff]  }
  0x18   :  { %361 = vmatprep.subr.bf16.mxu0 %v1921_v25  ;;  %514 = vmatprep.subr.bf16.mxu1 %v1923_v26  ;;  %v1978_v7 = vld [vmem:[%s2554_s0 + $0x48] sm:$0xff]   ;;  %v1979_v8 = vld [vmem:[%s2554_s0 + $0x50] sm:$0xff]   ;;  %v1980_v9 = vld [vmem:[%s2554_s0 + $0x58] sm:$0xff]  }
  0x19   :  { %v1138_v14 = vld [vmem:[%s2555_s4] sm:$0xf] }
  0x1a   :  { %v2303_v17 = vrot.slane %v1138_v14, %v1142_v12  ;;  %v2307_v18 = vrot.slane %v1138_v14, %v1146_v15  ;;  %v2309_v19 = vrot.slane %v1138_v14, %v1154_v16 }
  0x1b   :  { %362 = vmatpush1.bf16.msra.mxu0 %v1925_v27  ;;  %515 = vmatpush1.bf16.msra.mxu1 %v1926_v28 }
  0x1c   :  { %363 = vmatprep.subr.bf16.mxu0 %v1927_v29  ;;  %516 = vmatprep.subr.bf16.mxu1 %v1929_v30 }
  0x1f   :  { %364 = vmatpush1.bf16.msra.mxu0 %v1931_v31  ;;  %517 = vmatpush1.bf16.msra.mxu1 %v1932_v32 }
  0x20   :  { %832 = vmatprep.subr.bf16.mxu0 %v1936_v33  ;;  %985 = vmatprep.subr.bf16.mxu1 %v1939_v34 }
  0x22   :  { %382 = vmatmul.mubr.bf16.vlgmr.msra.gmra.mrb[0].mxu0 %v1933_v35  ;;  %535 = vmatmul.mubr.bf16.vlgmr.msra.gmra.mrb[0].mxu1 %v1933_v35 }
  0x23   :  { %833 = vmatpush1.bf16.msra.mxu0 %v1934_v36  ;;  %986 = vmatpush1.bf16.msra.mxu1 %v1937_v37 }
  0x24   :  { %391 = vmatprep.mubr.bf16.mxu0 %v1981_v1  ;;  %544 = vmatprep.mubr.bf16.mxu1 %v1981_v1 }
  0x25   :  { %834 = vmatprep.subr.bf16.mxu0 %v1945_v39  ;;  %987 = vmatprep.subr.bf16.mxu1 %v1948_v40 }
  0x27   :  { %835 = vmatpush1.bf16.msra.mxu0 %v1943_v38  ;;  %988 = vmatpush1.bf16.msra.mxu1 %v1946_v41 }
  0x28   :  { %836 = vmatprep.subr.bf16.mxu0 %v1954_v42  ;;  %989 = vmatprep.subr.bf16.mxu1 %v1957_v43 }
  0x2a   :  { %392 = vmatmul.mubr.bf16.gmra.mrb[4].mxu0 %v1940_v44  ;;  %545 = vmatmul.mubr.bf16.gmra.mrb[4].mxu1 %v1940_v44 }
  0x2b   :  { %401 = vmatprep.mubr.bf16.mxu0 %v1981_v1  ;;  %554 = vmatprep.mubr.bf16.mxu1 %v1981_v1 }
  0x2c   :  { %837 = vmatpush1.bf16.msra.mxu0 %v1952_v45  ;;  %990 = vmatpush1.bf16.msra.mxu1 %v1955_v46 }
  0x2d   :  { %838 = vmatprep.subr.bf16.mxu0 %v1963_v47  ;;  %991 = vmatprep.subr.bf16.mxu1 %v1966_v48 }
  0x30   :  { %839 = vmatpush1.bf16.msra.mxu0 %v1961_v49  ;;  %992 = vmatpush1.bf16.msra.mxu1 %v1964_v50 }
  0x32   :  { %402 = vmatmul.mubr.bf16.gmra.mrb[8].mxu0 %v1941_v51  ;;  %555 = vmatmul.mubr.bf16.gmra.mrb[8].mxu1 %v1941_v51 }
  0x33   :  { %411 = vmatprep.mubr.bf16.mxu0 %v1981_v1  ;;  %564 = vmatprep.mubr.bf16.mxu1 %v1981_v1 }
  0x3a   :  { %412 = vmatmul.mubr.bf16.gmra.mrb[12].mxu0 %v1942_v52  ;;  %565 = vmatmul.mubr.bf16.gmra.mrb[12].mxu1 %v1942_v52 }
  0x3b   :  { %421 = vmatprep.mubr.bf16.mxu0 %v1981_v1  ;;  %574 = vmatprep.mubr.bf16.mxu1 %v1981_v1 }
  0x42   :  { %422 = vmatmul.mubr.bf16.gmra.mrb[16].mxu0 %v1949_v53  ;;  %575 = vmatmul.mubr.bf16.gmra.mrb[16].mxu1 %v1949_v53 }
  0x43   :  { %431 = vmatprep.mubr.bf16.mxu0 %v1981_v1  ;;  %584 = vmatprep.mubr.bf16.mxu1 %v1981_v1 }
  0x4a   :  { %432 = vmatmul.mubr.bf16.gmra.mrb[20].mxu0 %v1950_v54  ;;  %585 = vmatmul.mubr.bf16.gmra.mrb[20].mxu1 %v1950_v54 }
  0x4b   :  { %441 = vmatprep.mubr.bf16.mxu0 %v1981_v1  ;;  %594 = vmatprep.mubr.bf16.mxu1 %v1981_v1 }
  0x52   :  { %442 = vmatmul.mubr.bf16.gmra.mrb[24].mxu0 %v1951_v55  ;;  %595 = vmatmul.mubr.bf16.gmra.mrb[24].mxu1 %v1951_v55 }
  0x53   :  { %451 = vmatprep.mubr.bf16.mxu0 %v1981_v1  ;;  %604 = vmatprep.mubr.bf16.mxu1 %v1981_v1 }
  0x5a   :  { %452 = vmatmul.mubr.bf16.gmra.mrb[28].mxu0 %v1958_v56  ;;  %605 = vmatmul.mubr.bf16.gmra.mrb[28].mxu1 %v1958_v56 }
  0x5b   :  { %461 = vmatprep.mubr.bf16.mxu0 %v1981_v1  ;;  %614 = vmatprep.mubr.bf16.mxu1 %v1981_v1 }
  0x62   :  { %462 = vmatmul.mubr.bf16.gmra.mrb[32].mxu0 %v1959_v57  ;;  %615 = vmatmul.mubr.bf16.gmra.mrb[32].mxu1 %v1959_v57 }
  0x63   :  { %471 = vmatprep.mubr.bf16.mxu0 %v1981_v1  ;;  %624 = vmatprep.mubr.bf16.mxu1 %v1981_v1 }
  0x6a   :  { %472 = vmatmul.mubr.bf16.gmra.mrb[36].mxu0 %v1960_v58  ;;  %625 = vmatmul.mubr.bf16.gmra.mrb[36].mxu1 %v1960_v58 }
  0x6b   :  { %481 = vmatprep.mubr.bf16.mxu0 %v1981_v1  ;;  %634 = vmatprep.mubr.bf16.mxu1 %v1981_v1 }
  0x72   :  { %482 = vmatmul.mubr.bf16.gmra.mrb[40].mxu0 %v1967_v59  ;;  %635 = vmatmul.mubr.bf16.gmra.mrb[40].mxu1 %v1967_v59 }
  0x73   :  { %491 = vmatprep.mubr.bf16.mxu0 %v1981_v1  ;;  %644 = vmatprep.mubr.bf16.mxu1 %v1981_v1 }
  0x7a   :  { %492 = vmatmul.mubr.bf16.gmra.mrb[44].mxu0 %v1968_v60  ;;  %645 = vmatmul.mubr.bf16.gmra.mrb[44].mxu1 %v1968_v60 }
  0x7b   :  { %864 = vmatprep.mubr.bf16.mxu0 %v1981_v1  ;;  %1017 = vmatprep.mubr.bf16.mxu1 %v1981_v1 }
  0x82   :  { %1668 = vmatmul.mubr.msk.bf16.vlgmr.msra.gmra.mrb[0].mxu0 %vm795_vm0, %v1969_v61  ;;  %1680 = vmatmul.mubr.msk.bf16.vlgmr.msra.gmra.mrb[0].mxu1 %vm795_vm0, %v1969_v61 }
  0x83   :  { %874 = vmatprep.mubr.bf16.mxu0 %v1981_v1  ;;  %1027 = vmatprep.mubr.bf16.mxu1 %v1981_v1 }
  0x8a   :  { %1669 = vmatmul.mubr.msk.bf16.gmra.mrb[4].mxu0 %vm795_vm0, %v1970_v62  ;;  %1681 = vmatmul.mubr.msk.bf16.gmra.mrb[4].mxu1 %vm795_vm0, %v1970_v62 }
  0x8b   :  { %884 = vmatprep.mubr.bf16.mxu0 %v1981_v1  ;;  %1037 = vmatprep.mubr.bf16.mxu1 %v1981_v1 }
  0x92   :  { %1670 = vmatmul.mubr.msk.bf16.gmra.mrb[8].mxu0 %vm795_vm0, %v1971_v63  ;;  %1682 = vmatmul.mubr.msk.bf16.gmra.mrb[8].mxu1 %vm795_vm0, %v1971_v63 }
  0x93   :  { %894 = vmatprep.mubr.bf16.mxu0 %v1981_v1  ;;  %1047 = vmatprep.mubr.bf16.mxu1 %v1981_v1 }
  0x9a   :  { %1671 = vmatmul.mubr.msk.bf16.gmra.mrb[12].mxu0 %vm795_vm0, %v1972_v0  ;;  %1683 = vmatmul.mubr.msk.bf16.gmra.mrb[12].mxu1 %vm795_vm0, %v1972_v0 }
  0x9b   :  { %904 = vmatprep.mubr.bf16.mxu0 %v1981_v1  ;;  %1057 = vmatprep.mubr.bf16.mxu1 %v1981_v1 }
  0xa2   :  { %1672 = vmatmul.mubr.msk.bf16.gmra.mrb[16].mxu0 %vm795_vm0, %v1973_v2  ;;  %1684 = vmatmul.mubr.msk.bf16.gmra.mrb[16].mxu1 %vm795_vm0, %v1973_v2 }
  0xa3   :  { %914 = vmatprep.mubr.bf16.mxu0 %v1981_v1  ;;  %1067 = vmatprep.mubr.bf16.mxu1 %v1981_v1 }
  0xaa   :  { %1673 = vmatmul.mubr.msk.bf16.gmra.mrb[20].mxu0 %vm795_vm0, %v1974_v3  ;;  %1685 = vmatmul.mubr.msk.bf16.gmra.mrb[20].mxu1 %vm795_vm0, %v1974_v3 }
  0xab   :  { %924 = vmatprep.mubr.bf16.mxu0 %v1981_v1  ;;  %1077 = vmatprep.mubr.bf16.mxu1 %v1981_v1 }
  0xb2   :  { %1674 = vmatmul.mubr.msk.bf16.gmra.mrb[24].mxu0 %vm795_vm0, %v1975_v4  ;;  %1686 = vmatmul.mubr.msk.bf16.gmra.mrb[24].mxu1 %vm795_vm0, %v1975_v4 }
  0xb3   :  { %934 = vmatprep.mubr.bf16.mxu0 %v1981_v1  ;;  %1087 = vmatprep.mubr.bf16.mxu1 %v1981_v1 }
  0xba   :  { %1675 = vmatmul.mubr.msk.bf16.gmra.mrb[28].mxu0 %vm795_vm0, %v1976_v5  ;;  %1687 = vmatmul.mubr.msk.bf16.gmra.mrb[28].mxu1 %vm795_vm0, %v1976_v5 }
  0xbb   :  { %944 = vmatprep.mubr.bf16.mxu0 %v1981_v1  ;;  %1097 = vmatprep.mubr.bf16.mxu1 %v1981_v1 }
  0xc2   :  { %1676 = vmatmul.mubr.msk.bf16.gmra.mrb[32].mxu0 %vm795_vm0, %v1977_v6  ;;  %1688 = vmatmul.mubr.msk.bf16.gmra.mrb[32].mxu1 %vm795_vm0, %v1977_v6 }
  0xc3   :  { %954 = vmatprep.mubr.bf16.mxu0 %v1981_v1  ;;  %1107 = vmatprep.mubr.bf16.mxu1 %v1981_v1 }
  0xca   :  { %1677 = vmatmul.mubr.msk.bf16.gmra.mrb[36].mxu0 %vm795_vm0, %v1978_v7  ;;  %1689 = vmatmul.mubr.msk.bf16.gmra.mrb[36].mxu1 %vm795_vm0, %v1978_v7 }
  0xcb   :  { %964 = vmatprep.mubr.bf16.mxu0 %v1981_v1  ;;  %1117 = vmatprep.mubr.bf16.mxu1 %v1981_v1 }
  0xd2   :  { %1678 = vmatmul.mubr.msk.bf16.gmra.mrb[40].mxu0 %vm795_vm0, %v1979_v8  ;;  %1690 = vmatmul.mubr.msk.bf16.gmra.mrb[40].mxu1 %vm795_vm0, %v1979_v8 }
  0xd3   :  { %974 = vmatprep.mubr.bf16.mxu0 %v1981_v1  ;;  %1127 = vmatprep.mubr.bf16.mxu1 %v1981_v1  ;;  %v2305_v1 = vrot.slane %v1138_v14, %v1150_v13 }
  0xda   :  { %1679 = vmatmul.mubr.msk.bf16.gmra.mrb[44].mxu0 %vm795_vm0, %v1980_v9  ;;  %1691 = vmatmul.mubr.msk.bf16.gmra.mrb[44].mxu1 %vm795_vm0, %v1980_v9 }
 0x155   :  { %v866_v20 = vpop.f32.mrb[0].mxu0  ;;  %v1019_v21 = vpop.f32.mrb[0].mxu1 }
 0x156   :  { %v1160_v22 = vadd.f32 %v2303_v17, %v866_v20  ;;  %v1162_v23 = vadd.f32 %v2305_v1, %v1019_v21  ;;  %v868_v24 = vpop.f32.mrb[1].mxu0  ;;  %v1021_v25 = vpop.f32.mrb[1].mxu1 }
 0x157   :  { %v1161_v26 = vadd.f32 %v2307_v18, %v868_v24  ;;  %v1163_v27 = vadd.f32 %v2309_v19, %v1021_v25  ;;  %v870_v28 = vpop.f32.mrb[2].mxu0  ;;  %v1023_v29 = vpop.f32.mrb[2].mxu1 }
 0x158   :  { %v1164_v30 = vadd.f32 %v2303_v17, %v870_v28  ;;  %v1166_v31 = vadd.f32 %v2305_v1, %v1023_v29  ;;  %v872_v32 = vpop.f32.mrb[3].mxu0  ;;  %v1025_v33 = vpop.f32.mrb[3].mxu1 }
 0x159   :  { %v1740_v34 = vpack.c.bf16 %v1161_v26, %v1160_v22  ;;  %v1741_v35 = vpack.c.bf16 %v1163_v27, %v1162_v23  ;;  %v1165_v36 = vadd.f32 %v2307_v18, %v872_v32  ;;  %v1167_v37 = vadd.f32 %v2309_v19, %v1025_v33 }
 0x15b   :  { %1544 = vst [vmem:[%s2556_s5] sm:$0xff] %v1740_v34  ;;  %1545 = vst [vmem:[%s2556_s5 + $0x8] sm:$0xff] %v1741_v35  ;;  %v1742_v38 = vpack.c.bf16 %v1165_v36, %v1164_v30  ;;  %v1743_v39 = vpack.c.bf16 %v1167_v37, %v1166_v31 }
 0x15d   :  { %1546 = vst [vmem:[%s2556_s5 + $0x10] sm:$0xff] %v1742_v38  ;;  %1547 = vst [vmem:[%s2556_s5 + $0x18] sm:$0xff] %v1743_v39  ;;  %v876_v40 = vpop.f32.mrb[4].mxu0  ;;  %v1029_v41 = vpop.f32.mrb[4].mxu1 }
 0x15e   :  { %v1168_v42 = vadd.f32 %v2303_v17, %v876_v40  ;;  %v1170_v43 = vadd.f32 %v2305_v1, %v1029_v41  ;;  %v878_v44 = vpop.f32.mrb[5].mxu0  ;;  %v1031_v45 = vpop.f32.mrb[5].mxu1 }
 0x15f   :  { %v1169_v46 = vadd.f32 %v2307_v18, %v878_v44  ;;  %v1171_v47 = vadd.f32 %v2309_v19, %v1031_v45  ;;  %v880_v48 = vpop.f32.mrb[6].mxu0  ;;  %v1033_v49 = vpop.f32.mrb[6].mxu1 }
 0x160   :  { %v1172_v50 = vadd.f32 %v2303_v17, %v880_v48  ;;  %v1174_v51 = vadd.f32 %v2305_v1, %v1033_v49  ;;  %v882_v52 = vpop.f32.mrb[7].mxu0  ;;  %v1035_v53 = vpop.f32.mrb[7].mxu1 }
 0x161   :  { %v1744_v54 = vpack.c.bf16 %v1169_v46, %v1168_v42  ;;  %v1745_v55 = vpack.c.bf16 %v1171_v47, %v1170_v43  ;;  %v1173_v56 = vadd.f32 %v2307_v18, %v882_v52  ;;  %v1175_v57 = vadd.f32 %v2309_v19, %v1035_v53 }
 0x163   :  { %1548 = vst [vmem:[%s2556_s5 + $0x20] sm:$0xff] %v1744_v54  ;;  %1549 = vst [vmem:[%s2556_s5 + $0x28] sm:$0xff] %v1745_v55  ;;  %v1746_v58 = vpack.c.bf16 %v1173_v56, %v1172_v50  ;;  %v1747_v59 = vpack.c.bf16 %v1175_v57, %v1174_v51 }
 0x165   :  { %1550 = vst [vmem:[%s2556_s5 + $0x30] sm:$0xff] %v1746_v58  ;;  %1551 = vst [vmem:[%s2556_s5 + $0x38] sm:$0xff] %v1747_v59  ;;  %v886_v60 = vpop.f32.mrb[8].mxu0  ;;  %v1039_v61 = vpop.f32.mrb[8].mxu1 }
 0x166   :  { %v1176_v62 = vadd.f32 %v2303_v17, %v886_v60  ;;  %v1178_v63 = vadd.f32 %v2305_v1, %v1039_v61  ;;  %v888_v0 = vpop.f32.mrb[9].mxu0  ;;  %v1041_v2 = vpop.f32.mrb[9].mxu1 }
 0x167   :  { %v1177_v3 = vadd.f32 %v2307_v18, %v888_v0  ;;  %v1179_v4 = vadd.f32 %v2309_v19, %v1041_v2  ;;  %v890_v5 = vpop.f32.mrb[10].mxu0  ;;  %v1043_v6 = vpop.f32.mrb[10].mxu1 }
 0x168   :  { %v1180_v7 = vadd.f32 %v2303_v17, %v890_v5  ;;  %v1182_v8 = vadd.f32 %v2305_v1, %v1043_v6  ;;  %v892_v9 = vpop.f32.mrb[11].mxu0  ;;  %v1045_v10 = vpop.f32.mrb[11].mxu1 }
 0x169   :  { %v1748_v11 = vpack.c.bf16 %v1177_v3, %v1176_v62  ;;  %v1749_v12 = vpack.c.bf16 %v1179_v4, %v1178_v63  ;;  %v1181_v13 = vadd.f32 %v2307_v18, %v892_v9  ;;  %v1183_v14 = vadd.f32 %v2309_v19, %v1045_v10 }
 0x16b   :  { %1552 = vst [vmem:[%s2556_s5 + $0x40] sm:$0xff] %v1748_v11  ;;  %1553 = vst [vmem:[%s2556_s5 + $0x48] sm:$0xff] %v1749_v12  ;;  %v1750_v15 = vpack.c.bf16 %v1181_v13, %v1180_v7  ;;  %v1751_v16 = vpack.c.bf16 %v1183_v14, %v1182_v8 }
 0x16d   :  { %1554 = vst [vmem:[%s2556_s5 + $0x50] sm:$0xff] %v1750_v15  ;;  %1555 = vst [vmem:[%s2556_s5 + $0x58] sm:$0xff] %v1751_v16  ;;  %v896_v20 = vpop.f32.mrb[12].mxu0  ;;  %v1049_v21 = vpop.f32.mrb[12].mxu1 }
 0x16e   :  { %v1184_v22 = vadd.f32 %v2303_v17, %v896_v20  ;;  %v1186_v23 = vadd.f32 %v2305_v1, %v1049_v21  ;;  %v898_v24 = vpop.f32.mrb[13].mxu0  ;;  %v1051_v25 = vpop.f32.mrb[13].mxu1 }
 0x16f   :  { %v1185_v26 = vadd.f32 %v2307_v18, %v898_v24  ;;  %v1187_v27 = vadd.f32 %v2309_v19, %v1051_v25  ;;  %v900_v28 = vpop.f32.mrb[14].mxu0  ;;  %v1053_v29 = vpop.f32.mrb[14].mxu1 }
 0x170   :  { %v1188_v30 = vadd.f32 %v2303_v17, %v900_v28  ;;  %v1190_v31 = vadd.f32 %v2305_v1, %v1053_v29  ;;  %v902_v32 = vpop.f32.mrb[15].mxu0  ;;  %v1055_v33 = vpop.f32.mrb[15].mxu1 }
 0x171   :  { %v1752_v34 = vpack.c.bf16 %v1185_v26, %v1184_v22  ;;  %v1753_v35 = vpack.c.bf16 %v1187_v27, %v1186_v23  ;;  %v1189_v36 = vadd.f32 %v2307_v18, %v902_v32  ;;  %v1191_v37 = vadd.f32 %v2309_v19, %v1055_v33 }
 0x173   :  { %1556 = vst [vmem:[%s2556_s5 + $0x60] sm:$0xff] %v1752_v34  ;;  %1557 = vst [vmem:[%s2556_s5 + $0x68] sm:$0xff] %v1753_v35  ;;  %v1754_v38 = vpack.c.bf16 %v1189_v36, %v1188_v30  ;;  %v1755_v39 = vpack.c.bf16 %v1191_v37, %v1190_v31 }
 0x175   :  { %1558 = vst [vmem:[%s2556_s5 + $0x70] sm:$0xff] %v1754_v38  ;;  %1559 = vst [vmem:[%s2556_s5 + $0x78] sm:$0xff] %v1755_v39  ;;  %v906_v40 = vpop.f32.mrb[16].mxu0  ;;  %v1059_v41 = vpop.f32.mrb[16].mxu1 }
 0x176   :  { %v1192_v42 = vadd.f32 %v2303_v17, %v906_v40  ;;  %v1194_v43 = vadd.f32 %v2305_v1, %v1059_v41  ;;  %v908_v44 = vpop.f32.mrb[17].mxu0  ;;  %v1061_v45 = vpop.f32.mrb[17].mxu1 }
 0x177   :  { %v1193_v46 = vadd.f32 %v2307_v18, %v908_v44  ;;  %v1195_v47 = vadd.f32 %v2309_v19, %v1061_v45  ;;  %v910_v48 = vpop.f32.mrb[18].mxu0  ;;  %v1063_v49 = vpop.f32.mrb[18].mxu1 }
 0x178   :  { %v1196_v50 = vadd.f32 %v2303_v17, %v910_v48  ;;  %v1198_v51 = vadd.f32 %v2305_v1, %v1063_v49  ;;  %v912_v52 = vpop.f32.mrb[19].mxu0  ;;  %v1065_v53 = vpop.f32.mrb[19].mxu1 }
 0x179   :  { %v1756_v54 = vpack.c.bf16 %v1193_v46, %v1192_v42  ;;  %v1757_v55 = vpack.c.bf16 %v1195_v47, %v1194_v43  ;;  %v1197_v56 = vadd.f32 %v2307_v18, %v912_v52  ;;  %v1199_v57 = vadd.f32 %v2309_v19, %v1065_v53 }
 0x17b   :  { %1560 = vst [vmem:[%s2556_s5 + $0x80] sm:$0xff] %v1756_v54  ;;  %1561 = vst [vmem:[%s2556_s5 + $0x88] sm:$0xff] %v1757_v55  ;;  %v1758_v58 = vpack.c.bf16 %v1197_v56, %v1196_v50  ;;  %v1759_v59 = vpack.c.bf16 %v1199_v57, %v1198_v51 }
 0x17d   :  { %1562 = vst [vmem:[%s2556_s5 + $0x90] sm:$0xff] %v1758_v58  ;;  %1563 = vst [vmem:[%s2556_s5 + $0x98] sm:$0xff] %v1759_v59  ;;  %v916_v60 = vpop.f32.mrb[20].mxu0  ;;  %v1069_v61 = vpop.f32.mrb[20].mxu1 }
 0x17e   :  { %v1200_v62 = vadd.f32 %v2303_v17, %v916_v60  ;;  %v1202_v63 = vadd.f32 %v2305_v1, %v1069_v61  ;;  %v918_v0 = vpop.f32.mrb[21].mxu0  ;;  %v1071_v2 = vpop.f32.mrb[21].mxu1 }
 0x17f   :  { %v1201_v3 = vadd.f32 %v2307_v18, %v918_v0  ;;  %v1203_v4 = vadd.f32 %v2309_v19, %v1071_v2  ;;  %v920_v5 = vpop.f32.mrb[22].mxu0  ;;  %v1073_v6 = vpop.f32.mrb[22].mxu1 }
 0x180   :  { %v1204_v7 = vadd.f32 %v2303_v17, %v920_v5  ;;  %v1206_v8 = vadd.f32 %v2305_v1, %v1073_v6  ;;  %v922_v9 = vpop.f32.mrb[23].mxu0  ;;  %v1075_v10 = vpop.f32.mrb[23].mxu1 }
 0x181   :  { %v1760_v11 = vpack.c.bf16 %v1201_v3, %v1200_v62  ;;  %v1761_v12 = vpack.c.bf16 %v1203_v4, %v1202_v63  ;;  %v1205_v13 = vadd.f32 %v2307_v18, %v922_v9  ;;  %v1207_v14 = vadd.f32 %v2309_v19, %v1075_v10 }
 0x183   :  { %1564 = vst [vmem:[%s2556_s5 + $0xa0] sm:$0xff] %v1760_v11  ;;  %1565 = vst [vmem:[%s2556_s5 + $0xa8] sm:$0xff] %v1761_v12  ;;  %v1762_v15 = vpack.c.bf16 %v1205_v13, %v1204_v7  ;;  %v1763_v16 = vpack.c.bf16 %v1207_v14, %v1206_v8 }
 0x185   :  { %1566 = vst [vmem:[%s2556_s5 + $0xb0] sm:$0xff] %v1762_v15  ;;  %1567 = vst [vmem:[%s2556_s5 + $0xb8] sm:$0xff] %v1763_v16  ;;  %v926_v20 = vpop.f32.mrb[24].mxu0  ;;  %v1079_v21 = vpop.f32.mrb[24].mxu1 }
 0x186   :  { %v1208_v22 = vadd.f32 %v2303_v17, %v926_v20  ;;  %v1210_v23 = vadd.f32 %v2305_v1, %v1079_v21  ;;  %v928_v24 = vpop.f32.mrb[25].mxu0  ;;  %v1081_v25 = vpop.f32.mrb[25].mxu1 }
 0x187   :  { %v1209_v26 = vadd.f32 %v2307_v18, %v928_v24  ;;  %v1211_v27 = vadd.f32 %v2309_v19, %v1081_v25  ;;  %v930_v28 = vpop.f32.mrb[26].mxu0  ;;  %v1083_v29 = vpop.f32.mrb[26].mxu1 }
 0x188   :  { %v1212_v30 = vadd.f32 %v2303_v17, %v930_v28  ;;  %v1214_v31 = vadd.f32 %v2305_v1, %v1083_v29  ;;  %v932_v32 = vpop.f32.mrb[27].mxu0  ;;  %v1085_v33 = vpop.f32.mrb[27].mxu1 }
 0x189   :  { %v1764_v34 = vpack.c.bf16 %v1209_v26, %v1208_v22  ;;  %v1765_v35 = vpack.c.bf16 %v1211_v27, %v1210_v23  ;;  %v1213_v36 = vadd.f32 %v2307_v18, %v932_v32  ;;  %v1215_v37 = vadd.f32 %v2309_v19, %v1085_v33 }
 0x18b   :  { %1568 = vst [vmem:[%s2556_s5 + $0xc0] sm:$0xff] %v1764_v34  ;;  %1569 = vst [vmem:[%s2556_s5 + $0xc8] sm:$0xff] %v1765_v35  ;;  %v1766_v38 = vpack.c.bf16 %v1213_v36, %v1212_v30  ;;  %v1767_v39 = vpack.c.bf16 %v1215_v37, %v1214_v31 }
 0x18d   :  { %1570 = vst [vmem:[%s2556_s5 + $0xd0] sm:$0xff] %v1766_v38  ;;  %1571 = vst [vmem:[%s2556_s5 + $0xd8] sm:$0xff] %v1767_v39  ;;  %v936_v40 = vpop.f32.mrb[28].mxu0  ;;  %v1089_v41 = vpop.f32.mrb[28].mxu1 }
 0x18e   :  { %v1216_v42 = vadd.f32 %v2303_v17, %v936_v40  ;;  %v1218_v43 = vadd.f32 %v2305_v1, %v1089_v41  ;;  %v938_v44 = vpop.f32.mrb[29].mxu0  ;;  %v1091_v45 = vpop.f32.mrb[29].mxu1 }
 0x18f   :  { %v1217_v46 = vadd.f32 %v2307_v18, %v938_v44  ;;  %v1219_v47 = vadd.f32 %v2309_v19, %v1091_v45  ;;  %v940_v48 = vpop.f32.mrb[30].mxu0  ;;  %v1093_v49 = vpop.f32.mrb[30].mxu1 }
 0x190   :  { %v1220_v50 = vadd.f32 %v2303_v17, %v940_v48  ;;  %v1222_v51 = vadd.f32 %v2305_v1, %v1093_v49  ;;  %v942_v52 = vpop.f32.mrb[31].mxu0  ;;  %v1095_v53 = vpop.f32.mrb[31].mxu1 }
 0x191   :  { %v1768_v54 = vpack.c.bf16 %v1217_v46, %v1216_v42  ;;  %v1769_v55 = vpack.c.bf16 %v1219_v47, %v1218_v43  ;;  %v1221_v56 = vadd.f32 %v2307_v18, %v942_v52  ;;  %v1223_v57 = vadd.f32 %v2309_v19, %v1095_v53 }
 0x193   :  { %1572 = vst [vmem:[%s2556_s5 + $0xe0] sm:$0xff] %v1768_v54  ;;  %1573 = vst [vmem:[%s2556_s5 + $0xe8] sm:$0xff] %v1769_v55  ;;  %v1770_v58 = vpack.c.bf16 %v1221_v56, %v1220_v50  ;;  %v1771_v59 = vpack.c.bf16 %v1223_v57, %v1222_v51 }
 0x195   :  { %1574 = vst [vmem:[%s2556_s5 + $0xf0] sm:$0xff] %v1770_v58  ;;  %1575 = vst [vmem:[%s2556_s5 + $0xf8] sm:$0xff] %v1771_v59  ;;  %v946_v60 = vpop.f32.mrb[32].mxu0  ;;  %v1099_v61 = vpop.f32.mrb[32].mxu1 }
 0x196   :  { %v1224_v62 = vadd.f32 %v2303_v17, %v946_v60  ;;  %v1226_v63 = vadd.f32 %v2305_v1, %v1099_v61  ;;  %v948_v0 = vpop.f32.mrb[33].mxu0  ;;  %v1101_v2 = vpop.f32.mrb[33].mxu1 }
 0x197   :  { %v1225_v3 = vadd.f32 %v2307_v18, %v948_v0  ;;  %v1227_v4 = vadd.f32 %v2309_v19, %v1101_v2  ;;  %v950_v5 = vpop.f32.mrb[34].mxu0  ;;  %v1103_v6 = vpop.f32.mrb[34].mxu1 }
 0x198   :  { %v1228_v7 = vadd.f32 %v2303_v17, %v950_v5  ;;  %v1230_v8 = vadd.f32 %v2305_v1, %v1103_v6  ;;  %v952_v9 = vpop.f32.mrb[35].mxu0  ;;  %v1105_v10 = vpop.f32.mrb[35].mxu1 }
 0x199   :  { %v1772_v11 = vpack.c.bf16 %v1225_v3, %v1224_v62  ;;  %v1773_v12 = vpack.c.bf16 %v1227_v4, %v1226_v63  ;;  %v1229_v13 = vadd.f32 %v2307_v18, %v952_v9  ;;  %v1231_v14 = vadd.f32 %v2309_v19, %v1105_v10 }
 0x19b   :  { %1576 = vst [vmem:[%s2556_s5 + $0x100] sm:$0xff] %v1772_v11  ;;  %1577 = vst [vmem:[%s2556_s5 + $0x108] sm:$0xff] %v1773_v12  ;;  %v1774_v15 = vpack.c.bf16 %v1229_v13, %v1228_v7  ;;  %v1775_v16 = vpack.c.bf16 %v1231_v14, %v1230_v8 }
 0x19d   :  { %1578 = vst [vmem:[%s2556_s5 + $0x110] sm:$0xff] %v1774_v15  ;;  %1579 = vst [vmem:[%s2556_s5 + $0x118] sm:$0xff] %v1775_v16  ;;  %v956_v20 = vpop.f32.mrb[36].mxu0  ;;  %v1109_v21 = vpop.f32.mrb[36].mxu1 }
 0x19e   :  { %v1232_v22 = vadd.f32 %v2303_v17, %v956_v20  ;;  %v1234_v23 = vadd.f32 %v2305_v1, %v1109_v21  ;;  %v958_v24 = vpop.f32.mrb[37].mxu0  ;;  %v1111_v25 = vpop.f32.mrb[37].mxu1 }
 0x19f   :  { %v1233_v26 = vadd.f32 %v2307_v18, %v958_v24  ;;  %v1235_v27 = vadd.f32 %v2309_v19, %v1111_v25  ;;  %v960_v28 = vpop.f32.mrb[38].mxu0  ;;  %v1113_v29 = vpop.f32.mrb[38].mxu1 }
 0x1a0   :  { %v1236_v30 = vadd.f32 %v2303_v17, %v960_v28  ;;  %v1238_v31 = vadd.f32 %v2305_v1, %v1113_v29  ;;  %v962_v32 = vpop.f32.mrb[39].mxu0  ;;  %v1115_v33 = vpop.f32.mrb[39].mxu1 }
 0x1a1   :  { %v1776_v34 = vpack.c.bf16 %v1233_v26, %v1232_v22  ;;  %v1777_v35 = vpack.c.bf16 %v1235_v27, %v1234_v23  ;;  %v1237_v36 = vadd.f32 %v2307_v18, %v962_v32  ;;  %v1239_v37 = vadd.f32 %v2309_v19, %v1115_v33 }
 0x1a3   :  { %1580 = vst [vmem:[%s2556_s5 + $0x120] sm:$0xff] %v1776_v34  ;;  %1581 = vst [vmem:[%s2556_s5 + $0x128] sm:$0xff] %v1777_v35  ;;  %v1778_v38 = vpack.c.bf16 %v1237_v36, %v1236_v30  ;;  %v1779_v39 = vpack.c.bf16 %v1239_v37, %v1238_v31 }
 0x1a5   :  { %1582 = vst [vmem:[%s2556_s5 + $0x130] sm:$0xff] %v1778_v38  ;;  %1583 = vst [vmem:[%s2556_s5 + $0x138] sm:$0xff] %v1779_v39  ;;  %v966_v40 = vpop.f32.mrb[40].mxu0  ;;  %v1119_v41 = vpop.f32.mrb[40].mxu1 }
 0x1a6   :  { %v1240_v42 = vadd.f32 %v2303_v17, %v966_v40  ;;  %v1242_v43 = vadd.f32 %v2305_v1, %v1119_v41  ;;  %v968_v44 = vpop.f32.mrb[41].mxu0  ;;  %v1121_v45 = vpop.f32.mrb[41].mxu1 }
 0x1a7   :  { %v1241_v46 = vadd.f32 %v2307_v18, %v968_v44  ;;  %v1243_v47 = vadd.f32 %v2309_v19, %v1121_v45  ;;  %v970_v48 = vpop.f32.mrb[42].mxu0  ;;  %v1123_v49 = vpop.f32.mrb[42].mxu1 }
 0x1a8   :  { %v1244_v50 = vadd.f32 %v2303_v17, %v970_v48  ;;  %v1246_v51 = vadd.f32 %v2305_v1, %v1123_v49  ;;  %v972_v52 = vpop.f32.mrb[43].mxu0  ;;  %v1125_v53 = vpop.f32.mrb[43].mxu1 }
 0x1a9   :  { %v1780_v54 = vpack.c.bf16 %v1241_v46, %v1240_v42  ;;  %v1781_v55 = vpack.c.bf16 %v1243_v47, %v1242_v43  ;;  %v1245_v56 = vadd.f32 %v2307_v18, %v972_v52  ;;  %v1247_v57 = vadd.f32 %v2309_v19, %v1125_v53 }
 0x1ab   :  { %1584 = vst [vmem:[%s2556_s5 + $0x140] sm:$0xff] %v1780_v54  ;;  %1585 = vst [vmem:[%s2556_s5 + $0x148] sm:$0xff] %v1781_v55  ;;  %v1782_v58 = vpack.c.bf16 %v1245_v56, %v1244_v50  ;;  %v1783_v59 = vpack.c.bf16 %v1247_v57, %v1246_v51 }
 0x1ad   :  { %1586 = vst [vmem:[%s2556_s5 + $0x150] sm:$0xff] %v1782_v58  ;;  %1587 = vst [vmem:[%s2556_s5 + $0x158] sm:$0xff] %v1783_v59  ;;  %v976_v60 = vpop.f32.mrb[44].mxu0  ;;  %v1129_v61 = vpop.f32.mrb[44].mxu1 }
 0x1ae   :  { %v1248_v62 = vadd.f32 %v2303_v17, %v976_v60  ;;  %v1250_v63 = vadd.f32 %v2305_v1, %v1129_v61  ;;  %v978_v0 = vpop.f32.mrb[45].mxu0  ;;  %v1131_v2 = vpop.f32.mrb[45].mxu1 }
 0x1af   :  { %v1249_v3 = vadd.f32 %v2307_v18, %v978_v0  ;;  %v1251_v4 = vadd.f32 %v2309_v19, %v1131_v2  ;;  %v980_v5 = vpop.f32.mrb[46].mxu0  ;;  %v1133_v6 = vpop.f32.mrb[46].mxu1 }
 0x1b0   :  { %v1252_v7 = vadd.f32 %v2303_v17, %v980_v5  ;;  %v1254_v8 = vadd.f32 %v2305_v1, %v1133_v6  ;;  %v982_v9 = vpop.f32.mrb[47].mxu0  ;;  %v1135_v10 = vpop.f32.mrb[47].mxu1 }
 0x1b1   :  { %v1784_v11 = vpack.c.bf16 %v1249_v3, %v1248_v62  ;;  %v1785_v12 = vpack.c.bf16 %v1251_v4, %v1250_v63  ;;  %v1253_v13 = vadd.f32 %v2307_v18, %v982_v9  ;;  %v1255_v14 = vadd.f32 %v2309_v19, %v1135_v10 }
 0x1b3   :  { %1588 = vst [vmem:[%s2556_s5 + $0x160] sm:$0xff] %v1784_v11  ;;  %1589 = vst [vmem:[%s2556_s5 + $0x168] sm:$0xff] %v1785_v12  ;;  %v1786_v15 = vpack.c.bf16 %v1253_v13, %v1252_v7  ;;  %v1787_v17 = vpack.c.bf16 %v1255_v14, %v1254_v8 }
 0x1b5   :  { %1590 = vst [vmem:[%s2556_s5 + $0x170] sm:$0xff] %v1786_v15  ;;  %1591 = vst [vmem:[%s2556_s5 + $0x178] sm:$0xff] %v1787_v17 }

// kernel: elmo_lstm_classifier_forward.3
= control target key start
LH: loop header
LB: loop body
LE: loop exit
PB: predicated region body
PF: predicated region fallthrough
CT: control target
= control target key end

     0   :  { %v3020_v1 = vmov 0   ;;  %v3021_v33 = vmov 0.0|0.0   ;;  %vm2256_vm2 = vcmask 7168   ;;  %s4245_s1 = inlined_call_operand.vmem [shape: bf16[128,512], index: 1, kind: input, shape index: {}]   ;;  %s4246_s0 = inlined_call_operand.vmem [shape: bf16[12,16,512], index: 0, kind: input, shape index: {}]   ;;  %s4247_s2 = inlined_call_operand.vmem [shape: f32[128,128], index: 2, kind: input, shape index: {}]   ;;  %s4248_s3 = inlined_call_operand.vmem [shape: f32[1,128], index: 3, kind: input, shape index: {}]   ;;  %s4249_s5 = inlined_call_operand.vmem [shape: f32[16,128], index: 5, kind: output, shape index: {0}]   ;;  %s4250_s4 = inlined_call_operand.vmem [shape: s32[16,1], index: 4, kind: input, shape index: {}]   ;;  %s4251_s6 = inlined_call_operand.vmem [shape: f32[16,128], index: 6, kind: output, shape index: {1}]   ;;  %s4252_s7 = inlined_call_operand.vmem [shape: f32[16,1], index: 7, kind: output, shape index: {2}]  }
   0x1   :  { %v3066_v0 = vld [vmem:[%s4245_s1 + $0x4] ss:$16 sps:$4 sm:$0xff]   ;;  %273 = vmatprep.mubr.bf16.mxu0 %v3020_v1  ;;  %316 = vmatprep.mubr.bf16.mxu1 %v3020_v1  ;;  %v3073_v2 = vld [vmem:[%s4245_s1] ss:$16 sps:$4 sm:$0xff]   ;;  %v3098_v6 = vld [vmem:[%s4245_s1 + $0xc] ss:$16 sps:$4 sm:$0xff]  }
   0x2   :  { %2511 = vset.pattern.permute.xlu1 %v3020_v1  ;;  %2510 = vset.pattern.permute.xlu0 %v3020_v1  ;;  %v3081_v3 = vld [vmem:[%s4245_s1 + $0x24] ss:$16 sps:$4 sm:$0xff]   ;;  %v3087_v4 = vld [vmem:[%s4245_s1 + $0x20] ss:$16 sps:$4 sm:$0xff]   ;;  %v3103_v7 = vld [vmem:[%s4245_s1 + $0x8] ss:$16 sps:$4 sm:$0xff]  }
   0x3   :  { %241 = vmatprep.subr.bf16.mxu0 %v3066_v0  ;;  %v3093_v5 = vld [vmem:[%s4245_s1 + $0x44] ss:$16 sps:$4 sm:$0xff]   ;;  %v3109_v8 = vld [vmem:[%s4245_s1 + $0x40] ss:$16 sps:$4 sm:$0xff]   ;;  %284 = vmatprep.subr.bf16.mxu1 %v3098_v6  ;;  %v3122_v10 = vld [vmem:[%s4245_s1 + $0x2c] ss:$16 sps:$4 sm:$0xff]  }
   0x4   :  { %242 = vmatpush1.bf16.msra.mxu0 %v3073_v2  ;;  %v3116_v9 = vld [vmem:[%s4245_s1 + $0x64] ss:$16 sps:$4 sm:$0xff]   ;;  %285 = vmatpush1.bf16.msra.mxu1 %v3103_v7  ;;  %v3127_v11 = vld [vmem:[%s4245_s1 + $0x28] ss:$16 sps:$4 sm:$0xff]   ;;  %v3134_v12 = vld [vmem:[%s4245_s1 + $0x60] ss:$16 sps:$4 sm:$0xff]  }
   0x5   :  { %243 = vmatprep.subr.bf16.mxu0 %v3081_v3  ;;  %286 = vmatprep.subr.bf16.mxu1 %v3122_v10  ;;  %v3139_v13 = vld [vmem:[%s4245_s1 + $0x84] ss:$16 sps:$4 sm:$0xff]   ;;  %v3144_v14 = vld [vmem:[%s4245_s1 + $0x4c] ss:$16 sps:$4 sm:$0xff]   ;;  %v3151_v15 = vld [vmem:[%s4245_s1 + $0x48] ss:$16 sps:$4 sm:$0xff]  }
   0x6   :  { %v3157_v16 = vld [vmem:[%s4245_s1 + $0x6c] ss:$16 sps:$4 sm:$0xff]   ;;  %v3163_v17 = vld [vmem:[%s4245_s1 + $0x80] ss:$16 sps:$4 sm:$0xff]   ;;  %v3169_v18 = vld [vmem:[%s4245_s1 + $0xa4] ss:$16 sps:$4 sm:$0xff]  }
   0x7   :  { %v3175_v19 = vld [vmem:[%s4245_s1 + $0x68] ss:$16 sps:$4 sm:$0xff]   ;;  %v3181_v20 = vld [vmem:[%s4245_s1 + $0x8c] ss:$16 sps:$4 sm:$0xff]   ;;  %v3187_v21 = vld [vmem:[%s4245_s1 + $0xa0] ss:$16 sps:$4 sm:$0xff]  }
   0x8   :  { %244 = vmatpush1.bf16.msra.mxu0 %v3087_v4  ;;  %287 = vmatpush1.bf16.msra.mxu1 %v3127_v11  ;;  %v3192_v22 = vld [vmem:[%s4245_s1 + $0xc4] ss:$16 sps:$4 sm:$0xff]   ;;  %v3199_v23 = vld [vmem:[%s4245_s1 + $0x88] ss:$16 sps:$4 sm:$0xff]   ;;  %v3205_v24 = vld [vmem:[%s4245_s1 + $0xac] ss:$16 sps:$4 sm:$0xff]  }
   0x9   :  { %245 = vmatprep.subr.bf16.mxu0 %v3093_v5  ;;  %288 = vmatprep.subr.bf16.mxu1 %v3144_v14  ;;  %v3211_v25 = vld [vmem:[%s4245_s1 + $0xc0] ss:$16 sps:$4 sm:$0xff]   ;;  %v3217_v26 = vld [vmem:[%s4245_s1 + $0xe4] ss:$16 sps:$4 sm:$0xff]   ;;  %v3223_v27 = vld [vmem:[%s4245_s1 + $0xa8] ss:$16 sps:$4 sm:$0xff]  }
   0xa   :  { %v3229_v28 = vld [vmem:[%s4245_s1 + $0xcc] ss:$16 sps:$4 sm:$0xff]   ;;  %v3235_v29 = vld [vmem:[%s4245_s1 + $0xe0] ss:$16 sps:$4 sm:$0xff]   ;;  %v3242_v30 = vld [vmem:[%s4245_s1 + $0xc8] ss:$16 sps:$4 sm:$0xff]  }
   0xb   :  { %v3248_v31 = vld [vmem:[%s4245_s1 + $0xec] ss:$16 sps:$4 sm:$0xff]   ;;  %v3255_v32 = vld [vmem:[%s4245_s1 + $0xe8] ss:$16 sps:$4 sm:$0xff]   ;;  %v68_v34 = vld [vmem:[%s4246_s0] sm:$0xff] }
   0xc   :  { %246 = vmatpush1.bf16.msra.mxu0 %v3109_v8  ;;  %289 = vmatpush1.bf16.msra.mxu1 %v3151_v15  ;;  %v70_v35 = vld [vmem:[%s4246_s0 + $0x10] sm:$0xff]  ;;  %v72_v36 = vunpack.c.l.bf16 %v68_v34  ;;  %v73_v37 = vunpack.c.h.bf16 %v68_v34  ;;  %v69_v43 = vld [vmem:[%s4246_s0 + $0x8] sm:$0xff]  ;;  %v71_v46 = vld [vmem:[%s4246_s0 + $0x18] sm:$0xff] }
   0xd   :  { %247 = vmatprep.subr.bf16.mxu0 %v3116_v9  ;;  %290 = vmatprep.subr.bf16.mxu1 %v3157_v16  ;;  %v76_v38 = vunpack.c.l.bf16 %v70_v35  ;;  %v77_v40 = vunpack.c.h.bf16 %v70_v35  ;;  %v75_v52 = vunpack.c.h.bf16 %v69_v43  ;;  %v79_v55 = vunpack.c.h.bf16 %v71_v46 }
   0xe   :  { %v74_v57 = vunpack.c.l.bf16 %v69_v43  ;;  %v78_v59 = vunpack.c.l.bf16 %v71_v46 }
  0x10   :  { %248 = vmatpush1.bf16.msra.mxu0 %v3134_v12  ;;  %291 = vmatpush1.bf16.msra.mxu1 %v3175_v19 }
  0x11   :  { %249 = vmatprep.subr.bf16.mxu0 %v3139_v13  ;;  %292 = vmatprep.subr.bf16.mxu1 %v3181_v20 }
  0x14   :  { %250 = vmatpush1.bf16.msra.mxu0 %v3163_v17  ;;  %293 = vmatpush1.bf16.msra.mxu1 %v3199_v23 }
  0x15   :  { %251 = vmatprep.subr.bf16.mxu0 %v3169_v18  ;;  %294 = vmatprep.subr.bf16.mxu1 %v3205_v24 }
  0x18   :  { %252 = vmatpush1.bf16.msra.mxu0 %v3187_v21  ;;  %295 = vmatpush1.bf16.msra.mxu1 %v3223_v27 }
  0x19   :  { %253 = vmatprep.subr.bf16.mxu0 %v3192_v22  ;;  %296 = vmatprep.subr.bf16.mxu1 %v3229_v28 }
  0x1c   :  { %254 = vmatpush1.bf16.msra.mxu0 %v3211_v25  ;;  %297 = vmatpush1.bf16.msra.mxu1 %v3242_v30 }
  0x1d   :  { %255 = vmatprep.subr.bf16.mxu0 %v3217_v26  ;;  %298 = vmatprep.subr.bf16.mxu1 %v3248_v31 }
  0x20   :  { %256 = vmatpush1.bf16.msra.mxu0 %v3235_v29  ;;  %299 = vmatpush1.bf16.msra.mxu1 %v3255_v32 }
  0x21   :  { %397 = vmatprep.subr.bf16.mxu0 %v3066_v0  ;;  %440 = vmatprep.subr.bf16.mxu1 %v3098_v6 }
  0x23   :  { %274 = vmatmul.mubr.bf16.vlgmr.msra.gmra.mrb[0].mxu0 %v3021_v33  ;;  %317 = vmatmul.mubr.bf16.vlgmr.msra.gmra.mrb[0].mxu1 %v3021_v33 }
  0x24   :  { %398 = vmatpush1.bf16.msra.mxu0 %v3073_v2  ;;  %429 = vmatprep.mubr.bf16.mxu0 %v3020_v1 }
  0x25   :  { %399 = vmatprep.subr.bf16.mxu0 %v3081_v3  ;;  %441 = vmatpush1.bf16.msra.mxu1 %v3103_v7 }
  0x26   :  { %442 = vmatprep.subr.bf16.mxu1 %v3122_v10  ;;  %472 = vmatprep.mubr.bf16.mxu1 %v3020_v1 }
  0x28   :  { %400 = vmatpush1.bf16.msra.mxu0 %v3087_v4 }
  0x29   :  { %401 = vmatprep.subr.bf16.mxu0 %v3093_v5  ;;  %443 = vmatpush1.bf16.msra.mxu1 %v3127_v11 }
  0x2a   :  { %444 = vmatprep.subr.bf16.mxu1 %v3144_v14 }
  0x2c   :  { %402 = vmatpush1.bf16.msra.mxu0 %v3109_v8 }
  0x2d   :  { %403 = vmatprep.subr.bf16.mxu0 %v3116_v9  ;;  %445 = vmatpush1.bf16.msra.mxu1 %v3151_v15 }
  0x2e   :  { %446 = vmatprep.subr.bf16.mxu1 %v3157_v16 }
  0x30   :  { %404 = vmatpush1.bf16.msra.mxu0 %v3134_v12 }
  0x31   :  { %405 = vmatprep.subr.bf16.mxu0 %v3139_v13  ;;  %447 = vmatpush1.bf16.msra.mxu1 %v3175_v19 }
  0x32   :  { %448 = vmatprep.subr.bf16.mxu1 %v3181_v20 }
  0x34   :  { %406 = vmatpush1.bf16.msra.mxu0 %v3163_v17 }
  0x35   :  { %407 = vmatprep.subr.bf16.mxu0 %v3169_v18  ;;  %449 = vmatpush1.bf16.msra.mxu1 %v3199_v23 }
  0x36   :  { %450 = vmatprep.subr.bf16.mxu1 %v3205_v24 }
  0x38   :  { %408 = vmatpush1.bf16.msra.mxu0 %v3187_v21 }
  0x39   :  { %409 = vmatprep.subr.bf16.mxu0 %v3192_v22  ;;  %451 = vmatpush1.bf16.msra.mxu1 %v3223_v27 }
  0x3a   :  { %452 = vmatprep.subr.bf16.mxu1 %v3229_v28 }
  0x3c   :  { %410 = vmatpush1.bf16.msra.mxu0 %v3211_v25 }
  0x3d   :  { %411 = vmatprep.subr.bf16.mxu0 %v3217_v26  ;;  %453 = vmatpush1.bf16.msra.mxu1 %v3242_v30 }
  0x3e   :  { %454 = vmatprep.subr.bf16.mxu1 %v3248_v31 }
  0x40   :  { %412 = vmatpush1.bf16.msra.mxu0 %v3235_v29 }
  0x41   :  { %553 = vmatprep.subr.bf16.mxu0 %v3066_v0  ;;  %455 = vmatpush1.bf16.msra.mxu1 %v3255_v32 }
  0x42   :  { %596 = vmatprep.subr.bf16.mxu1 %v3098_v6 }
  0xf6   :  { %v275_v39 = vpop.f32.mrb[0].mxu0  ;;  %v318_v54 = vpop.f32.mrb[0].mxu1 }
  0xf7   :  { %v327_v41 = vadd.f32 %v275_v39, %v72_v36  ;;  %v277_v42 = vpop.f32.mrb[1].mxu0  ;;  %v320_v58 = vpop.f32.mrb[1].mxu1  ;;  %v329_v33 = vadd.f32 %v318_v54, %v74_v57 }
  0xf8   :  { %v328_v44 = vadd.f32 %v277_v42, %v73_v37  ;;  %v279_v45 = vpop.f32.mrb[2].mxu0  ;;  %v322_v60 = vpop.f32.mrb[2].mxu1  ;;  %v330_v61 = vadd.f32 %v320_v58, %v75_v52 }
  0xf9   :  { %v2303_v47 = vmul.f32 -1.442695, %v327_v41  ;;  %v331_v48 = vadd.f32 %v279_v45, %v76_v38  ;;  %v281_v49 = vpop.f32.mrb[3].mxu0  ;;  %v324_v62 = vpop.f32.mrb[3].mxu1  ;;  %v333_v34 = vadd.f32 %v322_v60, %v78_v59 }
  0xfa   :  { %v2304_v50 = vmul.f32 -1.442695, %v328_v44  ;;  %v332_v51 = vadd.f32 %v281_v49, %v77_v40  ;;  %v334_v63 = vadd.f32 %v324_v62, %v79_v55  ;;  %v2307_v35 = vmul.f32 -1.442695, %v330_v61 }
  0xfb   :  { %2560 = vpow2.f32 %v2303_v47  ;;  %v2305_v53 = vmul.f32 -1.442695, %v331_v48 }
  0xfc   :  { %2562 = vpow2.f32 %v2304_v50  ;;  %v2306_v56 = vmul.f32 -1.442695, %v332_v51  ;;  %v2308_v36 = vmul.f32 -1.442695, %v334_v63 }
  0xfd   :  { %2564 = vpow2.f32 %v2305_v53 }
  0xfe   :  { %2566 = vpow2.f32 %v2306_v56 }
  0xff   :  { %2568 = vtanh.f32 %v329_v33 }
 0x100   :  { %2570 = vtanh.f32 %v333_v34 }
 0x101   :  { %2572 = vpow2.f32 %v2307_v35 }
 0x102   :  { %2574 = vpow2.f32 %v2308_v36 }
 0x105   :  { %v2561_v37 = vpop.eup %2560 }
 0x106   :  { %v2563_v38 = vpop.eup %2562  ;;  %v347_v39 = vadd.f32 1.0, %v2561_v37  ;;  %v2309_v37 = vld [vmem:[%s4246_s0 + $0x20] sm:$0xff] }
 0x107   :  { %v2565_v40 = vpop.eup %2564  ;;  %v348_v41 = vadd.f32 1.0, %v2563_v38  ;;  %v2311_v38 = vld [vmem:[%s4246_s0 + $0x30] sm:$0xff] }
 0x108   :  { %v2567_v42 = vpop.eup %2566  ;;  %2576 = vrcp.f32 %v347_v39  ;;  %v349_v43 = vadd.f32 1.0, %v2565_v40  ;;  %v388_v39 = vunpack.c.l.bf16 %v2309_v37  ;;  %v389_v40 = vunpack.c.h.bf16 %v2309_v37 }
 0x109   :  { %2578 = vrcp.f32 %v348_v41  ;;  %v350_v44 = vadd.f32 1.0, %v2567_v42  ;;  %v2569_v45 = vpop.eup %2568  ;;  %v392_v41 = vunpack.c.l.bf16 %v2311_v38 }
 0x10a   :  { %2580 = vrcp.f32 %v349_v43  ;;  %v2571_v46 = vpop.eup %2570 }
 0x10b   :  { %2582 = vrcp.f32 %v350_v44  ;;  %v2573_v47 = vpop.eup %2572  ;;  %v393_v44 = vunpack.c.h.bf16 %v2311_v38 }
 0x10c   :  { %v2575_v48 = vpop.eup %2574  ;;  %v367_v52 = vadd.f32 1.0, %v2573_v47 }
 0x10d   :  { %v368_v57 = vadd.f32 1.0, %v2575_v48 }
 0x10e   :  { %2584 = vrcp.f32 %v367_v52 }
 0x112   :  { %v2577_v49 = vpop.eup %2576 }
 0x113   :  { %v2579_v50 = vpop.eup %2578  ;;  %v375_v51 = vmul.f32 %v2577_v49, %v2569_v45 }
 0x114   :  { %v2581_v53 = vpop.eup %2580  ;;  %v373_v54 = vmul.f32 0.0, %v2579_v50 }
 0x115   :  { %v2583_v55 = vpop.eup %2582  ;;  %v376_v56 = vmul.f32 %v2581_v53, %v2571_v46  ;;  %v2310_v46 = vld [vmem:[%s4246_s0 + $0x28] sm:$0xff] }
 0x116   :  { %v374_v58 = vmul.f32 0.0, %v2583_v55  ;;  %v3307_v59 = vadd.f32 %v375_v51, %v373_v54 }
 0x118   :  { %2586 = vtanh.f32 %v3307_v59  ;;  %v3310_v60 = vadd.f32 %v376_v56, %v374_v58  ;;  %v2585_v61 = vpop.eup %2584 }
 0x119   :  { %2588 = vrcp.f32 %v368_v57  ;;  %v391_v57 = vunpack.c.h.bf16 %v2310_v46 }
 0x11a   :  { %2590 = vtanh.f32 %v3310_v60 }
 0x122   :  { %v2587_v62 = vpop.eup %2586 }
 0x123   :  { %v2589_v63 = vpop.eup %2588  ;;  %v381_v34 = vmul.f32 %v2587_v62, %v2585_v61  ;;  %v2312_v62 = vld [vmem:[%s4246_s0 + $0x38] sm:$0xff] }
 0x124   :  { %v2591_v33 = vpop.eup %2590 }
 0x125   :  { %v382_v35 = vmul.f32 %v2591_v33, %v2589_v63  ;;  %v390_v33 = vunpack.c.l.bf16 %v2310_v46 }
 0x127   :  { %v396_v36 = vpack.c.bf16 %v382_v35, %v381_v34  ;;  %v395_v35 = vunpack.c.h.bf16 %v2312_v62 }
 0x129   :  { %430 = vmatmul.mubr.bf16.vlgmr.msra.gmra.mrb[4].mxu0 %v396_v36  ;;  %473 = vmatmul.mubr.bf16.vlgmr.msra.gmra.mrb[4].mxu1 %v396_v36  ;;  %v394_v36 = vunpack.c.l.bf16 %v2312_v62 }
 0x12a   :  { %554 = vmatpush1.bf16.msra.mxu0 %v3073_v2  ;;  %597 = vmatpush1.bf16.msra.mxu1 %v3103_v7 }
 0x12b   :  { %555 = vmatprep.subr.bf16.mxu0 %v3081_v3  ;;  %598 = vmatprep.subr.bf16.mxu1 %v3122_v10 }
 0x12c   :  { %585 = vmatprep.mubr.bf16.mxu0 %v3020_v1  ;;  %628 = vmatprep.mubr.bf16.mxu1 %v3020_v1 }
 0x12e   :  { %556 = vmatpush1.bf16.msra.mxu0 %v3087_v4  ;;  %599 = vmatpush1.bf16.msra.mxu1 %v3127_v11 }
 0x12f   :  { %557 = vmatprep.subr.bf16.mxu0 %v3093_v5  ;;  %600 = vmatprep.subr.bf16.mxu1 %v3144_v14 }
 0x132   :  { %558 = vmatpush1.bf16.msra.mxu0 %v3109_v8  ;;  %601 = vmatpush1.bf16.msra.mxu1 %v3151_v15 }
 0x133   :  { %559 = vmatprep.subr.bf16.mxu0 %v3116_v9  ;;  %602 = vmatprep.subr.bf16.mxu1 %v3157_v16 }
 0x136   :  { %560 = vmatpush1.bf16.msra.mxu0 %v3134_v12  ;;  %603 = vmatpush1.bf16.msra.mxu1 %v3175_v19 }
 0x137   :  { %561 = vmatprep.subr.bf16.mxu0 %v3139_v13  ;;  %604 = vmatprep.subr.bf16.mxu1 %v3181_v20 }
 0x13a   :  { %562 = vmatpush1.bf16.msra.mxu0 %v3163_v17  ;;  %605 = vmatpush1.bf16.msra.mxu1 %v3199_v23 }
 0x13b   :  { %563 = vmatprep.subr.bf16.mxu0 %v3169_v18  ;;  %606 = vmatprep.subr.bf16.mxu1 %v3205_v24 }
 0x13e   :  { %564 = vmatpush1.bf16.msra.mxu0 %v3187_v21  ;;  %607 = vmatpush1.bf16.msra.mxu1 %v3223_v27 }
 0x13f   :  { %565 = vmatprep.subr.bf16.mxu0 %v3192_v22  ;;  %608 = vmatprep.subr.bf16.mxu1 %v3229_v28 }
 0x142   :  { %566 = vmatpush1.bf16.msra.mxu0 %v3211_v25  ;;  %609 = vmatpush1.bf16.msra.mxu1 %v3242_v30 }
 0x143   :  { %567 = vmatprep.subr.bf16.mxu0 %v3217_v26  ;;  %610 = vmatprep.subr.bf16.mxu1 %v3248_v31 }
 0x146   :  { %568 = vmatpush1.bf16.msra.mxu0 %v3235_v29  ;;  %611 = vmatpush1.bf16.msra.mxu1 %v3255_v32 }
 0x147   :  { %709 = vmatprep.subr.bf16.mxu0 %v3066_v0  ;;  %752 = vmatprep.subr.bf16.mxu1 %v3098_v6 }
 0x1fc   :  { %v431_v42 = vpop.f32.mrb[4].mxu0  ;;  %v474_v43 = vpop.f32.mrb[4].mxu1 }
 0x1fd   :  { %v483_v45 = vadd.f32 %v431_v42, %v388_v39  ;;  %v433_v47 = vpop.f32.mrb[5].mxu0  ;;  %v476_v48 = vpop.f32.mrb[5].mxu1  ;;  %v485_v37 = vadd.f32 %v474_v43, %v390_v33 }
 0x1fe   :  { %v484_v49 = vadd.f32 %v433_v47, %v389_v40  ;;  %v435_v50 = vpop.f32.mrb[6].mxu0  ;;  %v478_v51 = vpop.f32.mrb[6].mxu1  ;;  %v486_v34 = vadd.f32 %v476_v48, %v391_v57 }
 0x1ff   :  { %v2313_v52 = vmul.f32 -1.442695, %v483_v45  ;;  %v487_v53 = vadd.f32 %v435_v50, %v392_v41  ;;  %v437_v54 = vpop.f32.mrb[7].mxu0  ;;  %v480_v55 = vpop.f32.mrb[7].mxu1  ;;  %v489_v40 = vadd.f32 %v478_v51, %v394_v36 }
 0x200   :  { %v2314_v56 = vmul.f32 -1.442695, %v484_v49  ;;  %v488_v58 = vadd.f32 %v437_v54, %v393_v44  ;;  %v2317_v38 = vmul.f32 -1.442695, %v486_v34  ;;  %v490_v39 = vadd.f32 %v480_v55, %v395_v35 }
 0x201   :  { %2592 = vpow2.f32 %v2313_v52  ;;  %v2315_v61 = vmul.f32 -1.442695, %v487_v53 }
 0x202   :  { %2594 = vpow2.f32 %v2314_v56  ;;  %v2316_v63 = vmul.f32 -1.442695, %v488_v58  ;;  %v2318_v45 = vmul.f32 -1.442695, %v490_v39 }
 0x203   :  { %2596 = vpow2.f32 %v2315_v61 }
 0x204   :  { %2598 = vpow2.f32 %v2316_v63 }
 0x205   :  { %2600 = vtanh.f32 %v485_v37 }
 0x206   :  { %2602 = vpow2.f32 %v2317_v38 }
 0x207   :  { %2604 = vtanh.f32 %v489_v40 }
 0x20b   :  { %v2593_v41 = vpop.eup %2592 }
 0x20c   :  { %v2595_v42 = vpop.eup %2594  ;;  %v503_v44 = vadd.f32 1.0, %v2593_v41 }
 0x20d   :  { %v504_v47 = vadd.f32 1.0, %v2595_v42  ;;  %v2597_v49 = vpop.eup %2596 }
 0x20e   :  { %2606 = vrcp.f32 %v503_v44  ;;  %v505_v46 = vadd.f32 1.0, %v2597_v49  ;;  %v2599_v48 = vpop.eup %2598  ;;  %v2321_v44 = vld [vmem:[%s4246_s0 + $0x50] sm:$0xff] }
 0x20f   :  { %2608 = vrcp.f32 %v504_v47  ;;  %v506_v50 = vadd.f32 1.0, %v2599_v48  ;;  %v2601_v43 = vpop.eup %2600  ;;  %v548_v49 = vunpack.c.l.bf16 %v2321_v44 }
 0x210   :  { %2610 = vpow2.f32 %v2318_v45  ;;  %v2603_v52 = vpop.eup %2602 }
 0x211   :  { %2612 = vrcp.f32 %v505_v46  ;;  %v2605_v51 = vpop.eup %2604  ;;  %v523_v61 = vadd.f32 1.0, %v2603_v52  ;;  %v2320_v52 = vld [vmem:[%s4246_s0 + $0x48] sm:$0xff] }
 0x212   :  { %2614 = vrcp.f32 %v506_v50  ;;  %v549_v50 = vunpack.c.h.bf16 %v2321_v44 }
 0x213   :  { %2616 = vrcp.f32 %v523_v61 }
 0x218   :  { %v2607_v53 = vpop.eup %2606 }
 0x219   :  { %v2609_v54 = vpop.eup %2608  ;;  %v531_v55 = vmul.f32 %v2607_v53, %v2601_v43 }
 0x21a   :  { %v2611_v56 = vpop.eup %2610  ;;  %v529_v57 = vmul.f32 %v2609_v54, %v3307_v59 }
 0x21b   :  { %v2613_v58 = vpop.eup %2612  ;;  %v524_v34 = vadd.f32 1.0, %v2611_v56 }
 0x21c   :  { %v3360_v62 = vadd.f32 %v531_v55, %v529_v57  ;;  %v532_v63 = vmul.f32 %v2613_v58, %v2605_v51  ;;  %v2615_v33 = vpop.eup %2614 }
 0x21d   :  { %v530_v35 = vmul.f32 %v2615_v33, %v3310_v60  ;;  %v2617_v37 = vpop.eup %2616  ;;  %v2319_v60 = vld [vmem:[%s4246_s0 + $0x40] sm:$0xff] }
 0x21e   :  { %2618 = vtanh.f32 %v3360_v62  ;;  %v544_v45 = vunpack.c.l.bf16 %v2319_v60  ;;  %v545_v47 = vunpack.c.h.bf16 %v2319_v60 }
 0x21f   :  { %v3364_v36 = vadd.f32 %v532_v63, %v530_v35  ;;  %2620 = vrcp.f32 %v524_v34  ;;  %v547_v34 = vunpack.c.h.bf16 %v2320_v52 }
 0x221   :  { %2622 = vtanh.f32 %v3364_v36 }
 0x228   :  { %v2619_v38 = vpop.eup %2618 }
 0x229   :  { %v2621_v59 = vpop.eup %2620  ;;  %v537_v40 = vmul.f32 %v2619_v38, %v2617_v37  ;;  %v2322_v38 = vld [vmem:[%s4246_s0 + $0x58] sm:$0xff] }
 0x22b   :  { %v2623_v39 = vpop.eup %2622 }
 0x22c   :  { %v538_v41 = vmul.f32 %v2623_v39, %v2621_v59  ;;  %v546_v39 = vunpack.c.l.bf16 %v2320_v52 }
 0x22e   :  { %v552_v42 = vpack.c.bf16 %v538_v41, %v537_v40  ;;  %v551_v41 = vunpack.c.h.bf16 %v2322_v38 }
 0x230   :  { %586 = vmatmul.mubr.bf16.vlgmr.msra.gmra.mrb[8].mxu0 %v552_v42  ;;  %629 = vmatmul.mubr.bf16.vlgmr.msra.gmra.mrb[8].mxu1 %v552_v42  ;;  %v550_v42 = vunpack.c.l.bf16 %v2322_v38 }
 0x231   :  { %710 = vmatpush1.bf16.msra.mxu0 %v3073_v2  ;;  %753 = vmatpush1.bf16.msra.mxu1 %v3103_v7 }
 0x232   :  { %711 = vmatprep.subr.bf16.mxu0 %v3081_v3  ;;  %754 = vmatprep.subr.bf16.mxu1 %v3122_v10 }
 0x233   :  { %741 = vmatprep.mubr.bf16.mxu0 %v3020_v1  ;;  %784 = vmatprep.mubr.bf16.mxu1 %v3020_v1 }
 0x235   :  { %712 = vmatpush1.bf16.msra.mxu0 %v3087_v4  ;;  %755 = vmatpush1.bf16.msra.mxu1 %v3127_v11 }
 0x236   :  { %713 = vmatprep.subr.bf16.mxu0 %v3093_v5  ;;  %756 = vmatprep.subr.bf16.mxu1 %v3144_v14 }
 0x239   :  { %714 = vmatpush1.bf16.msra.mxu0 %v3109_v8  ;;  %757 = vmatpush1.bf16.msra.mxu1 %v3151_v15 }
 0x23a   :  { %715 = vmatprep.subr.bf16.mxu0 %v3116_v9  ;;  %758 = vmatprep.subr.bf16.mxu1 %v3157_v16 }
 0x23d   :  { %716 = vmatpush1.bf16.msra.mxu0 %v3134_v12  ;;  %759 = vmatpush1.bf16.msra.mxu1 %v3175_v19 }
 0x23e   :  { %717 = vmatprep.subr.bf16.mxu0 %v3139_v13  ;;  %760 = vmatprep.subr.bf16.mxu1 %v3181_v20 }
 0x241   :  { %718 = vmatpush1.bf16.msra.mxu0 %v3163_v17  ;;  %761 = vmatpush1.bf16.msra.mxu1 %v3199_v23 }
 0x242   :  { %719 = vmatprep.subr.bf16.mxu0 %v3169_v18  ;;  %762 = vmatprep.subr.bf16.mxu1 %v3205_v24 }
 0x245   :  { %720 = vmatpush1.bf16.msra.mxu0 %v3187_v21  ;;  %763 = vmatpush1.bf16.msra.mxu1 %v3223_v27 }
 0x246   :  { %721 = vmatprep.subr.bf16.mxu0 %v3192_v22  ;;  %764 = vmatprep.subr.bf16.mxu1 %v3229_v28 }
 0x249   :  { %722 = vmatpush1.bf16.msra.mxu0 %v3211_v25  ;;  %765 = vmatpush1.bf16.msra.mxu1 %v3242_v30 }
 0x24a   :  { %723 = vmatprep.subr.bf16.mxu0 %v3217_v26  ;;  %766 = vmatprep.subr.bf16.mxu1 %v3248_v31 }
 0x24d   :  { %724 = vmatpush1.bf16.msra.mxu0 %v3235_v29  ;;  %767 = vmatpush1.bf16.msra.mxu1 %v3255_v32 }
 0x24e   :  { %865 = vmatprep.subr.bf16.mxu0 %v3066_v0  ;;  %908 = vmatprep.subr.bf16.mxu1 %v3098_v6 }
 0x303   :  { %v587_v46 = vpop.f32.mrb[8].mxu0  ;;  %v630_v48 = vpop.f32.mrb[8].mxu1 }
 0x304   :  { %v639_v43 = vadd.f32 %v587_v46, %v544_v45  ;;  %v589_v51 = vpop.f32.mrb[9].mxu0  ;;  %v632_v53 = vpop.f32.mrb[9].mxu1  ;;  %v641_v60 = vadd.f32 %v630_v48, %v546_v39 }
 0x305   :  { %v640_v54 = vadd.f32 %v589_v51, %v545_v47  ;;  %v591_v55 = vpop.f32.mrb[10].mxu0  ;;  %v634_v56 = vpop.f32.mrb[10].mxu1  ;;  %v642_v40 = vadd.f32 %v632_v53, %v547_v34 }
 0x306   :  { %v2323_v57 = vmul.f32 -1.442695, %v639_v43  ;;  %v643_v58 = vadd.f32 %v591_v55, %v548_v49  ;;  %v593_v61 = vpop.f32.mrb[11].mxu0  ;;  %v636_v63 = vpop.f32.mrb[11].mxu1  ;;  %v645_v47 = vadd.f32 %v634_v56, %v550_v42 }
 0x307   :  { %v2324_v33 = vmul.f32 -1.442695, %v640_v54  ;;  %v644_v35 = vadd.f32 %v593_v61, %v549_v50  ;;  %v2327_v44 = vmul.f32 -1.442695, %v642_v40  ;;  %v646_v45 = vadd.f32 %v636_v63, %v551_v41 }
 0x308   :  { %2624 = vpow2.f32 %v2323_v57  ;;  %v2325_v37 = vmul.f32 -1.442695, %v643_v58 }
 0x309   :  { %2626 = vpow2.f32 %v2324_v33  ;;  %v2326_v59 = vmul.f32 -1.442695, %v644_v35  ;;  %v2328_v43 = vmul.f32 -1.442695, %v646_v45 }
 0x30a   :  { %2628 = vpow2.f32 %v2325_v37 }
 0x30b   :  { %2630 = vpow2.f32 %v2326_v59 }
 0x30c   :  { %2632 = vtanh.f32 %v641_v60 }
 0x30d   :  { %2634 = vpow2.f32 %v2327_v44 }
 0x30e   :  { %2636 = vtanh.f32 %v645_v47 }
 0x312   :  { %v2625_v49 = vpop.eup %2624 }
 0x313   :  { %v2627_v46 = vpop.eup %2626  ;;  %v659_v50 = vadd.f32 1.0, %v2625_v49 }
 0x314   :  { %v660_v51 = vadd.f32 1.0, %v2627_v46  ;;  %v2629_v54 = vpop.eup %2628 }
 0x315   :  { %2638 = vrcp.f32 %v659_v50  ;;  %v661_v52 = vadd.f32 1.0, %v2629_v54  ;;  %v2631_v53 = vpop.eup %2630 }
 0x316   :  { %2640 = vrcp.f32 %v660_v51  ;;  %v662_v55 = vadd.f32 1.0, %v2631_v53  ;;  %v2633_v48 = vpop.eup %2632 }
 0x317   :  { %2642 = vpow2.f32 %v2328_v43  ;;  %v2635_v57 = vpop.eup %2634 }
 0x318   :  { %2644 = vrcp.f32 %v661_v52  ;;  %v2637_v56 = vpop.eup %2636  ;;  %v679_v37 = vadd.f32 1.0, %v2635_v57 }
 0x319   :  { %2646 = vrcp.f32 %v662_v55 }
 0x31a   :  { %2648 = vrcp.f32 %v679_v37 }
 0x31f   :  { %v2639_v58 = vpop.eup %2638 }
 0x320   :  { %v2641_v61 = vpop.eup %2640  ;;  %v687_v63 = vmul.f32 %v2639_v58, %v2633_v48 }
 0x321   :  { %v2643_v33 = vpop.eup %2642  ;;  %v685_v34 = vmul.f32 %v2641_v61, %v3360_v62 }
 0x322   :  { %v2645_v35 = vpop.eup %2644  ;;  %v680_v40 = vadd.f32 1.0, %v2643_v33 }
 0x323   :  { %v3414_v38 = vadd.f32 %v687_v63, %v685_v34  ;;  %v688_v59 = vmul.f32 %v2645_v35, %v2637_v56  ;;  %v2647_v39 = vpop.eup %2646 }
 0x324   :  { %v686_v41 = vmul.f32 %v2647_v39, %v3364_v36  ;;  %v2649_v60 = vpop.eup %2648 }
 0x325   :  { %2650 = vtanh.f32 %v3414_v38 }
 0x326   :  { %v3418_v42 = vadd.f32 %v688_v59, %v686_v41  ;;  %2652 = vrcp.f32 %v680_v40 }
 0x328   :  { %2654 = vtanh.f32 %v3418_v42 }
 0x32f   :  { %v2651_v44 = vpop.eup %2650 }
 0x330   :  { %v2653_v62 = vpop.eup %2652  ;;  %v693_v47 = vmul.f32 %v2651_v44, %v2649_v60 }
 0x332   :  { %v2655_v45 = vpop.eup %2654 }
 0x333   :  { %v694_v49 = vmul.f32 %v2655_v45, %v2653_v62 }
 0x335   :  { %v708_v46 = vpack.c.bf16 %v694_v49, %v693_v47 }
 0x337   :  { %742 = vmatmul.mubr.bf16.vlgmr.msra.gmra.mrb[12].mxu0 %v708_v46  ;;  %785 = vmatmul.mubr.bf16.vlgmr.msra.gmra.mrb[12].mxu1 %v708_v46 }
 0x338   :  { %866 = vmatpush1.bf16.msra.mxu0 %v3073_v2  ;;  %909 = vmatpush1.bf16.msra.mxu1 %v3103_v7  ;;  %v2329_v2 = vld [vmem:[%s4246_s0 + $0x60] sm:$0xff] }
 0x339   :  { %867 = vmatprep.subr.bf16.mxu0 %v3081_v3  ;;  %910 = vmatprep.subr.bf16.mxu1 %v3122_v10  ;;  %v2331_v3 = vld [vmem:[%s4246_s0 + $0x70] sm:$0xff] }
 0x33a   :  { %897 = vmatprep.mubr.bf16.mxu0 %v3020_v1  ;;  %940 = vmatprep.mubr.bf16.mxu1 %v3020_v1  ;;  %v704_v7 = vunpack.c.l.bf16 %v2331_v3  ;;  %v705_v10 = vunpack.c.h.bf16 %v2331_v3 }
 0x33c   :  { %868 = vmatpush1.bf16.msra.mxu0 %v3087_v4  ;;  %911 = vmatpush1.bf16.msra.mxu1 %v3127_v11  ;;  %v700_v4 = vunpack.c.l.bf16 %v2329_v2 }
 0x33d   :  { %869 = vmatprep.subr.bf16.mxu0 %v3093_v5  ;;  %912 = vmatprep.subr.bf16.mxu1 %v3144_v14  ;;  %v701_v5 = vunpack.c.h.bf16 %v2329_v2 }
 0x340   :  { %870 = vmatpush1.bf16.msra.mxu0 %v3109_v8  ;;  %913 = vmatpush1.bf16.msra.mxu1 %v3151_v15 }
 0x341   :  { %871 = vmatprep.subr.bf16.mxu0 %v3116_v9  ;;  %914 = vmatprep.subr.bf16.mxu1 %v3157_v16 }
 0x344   :  { %872 = vmatpush1.bf16.msra.mxu0 %v3134_v12  ;;  %915 = vmatpush1.bf16.msra.mxu1 %v3175_v19 }
 0x345   :  { %873 = vmatprep.subr.bf16.mxu0 %v3139_v13  ;;  %916 = vmatprep.subr.bf16.mxu1 %v3181_v20 }
 0x348   :  { %874 = vmatpush1.bf16.msra.mxu0 %v3163_v17  ;;  %917 = vmatpush1.bf16.msra.mxu1 %v3199_v23 }
 0x349   :  { %875 = vmatprep.subr.bf16.mxu0 %v3169_v18  ;;  %918 = vmatprep.subr.bf16.mxu1 %v3205_v24  ;;  %v2332_v24 = vld [vmem:[%s4246_s0 + $0x78] sm:$0xff] }
 0x34c   :  { %876 = vmatpush1.bf16.msra.mxu0 %v3187_v21  ;;  %919 = vmatpush1.bf16.msra.mxu1 %v3223_v27 }
 0x34d   :  { %877 = vmatprep.subr.bf16.mxu0 %v3192_v22  ;;  %920 = vmatprep.subr.bf16.mxu1 %v3229_v28  ;;  %v707_v28 = vunpack.c.h.bf16 %v2332_v24 }
 0x350   :  { %878 = vmatpush1.bf16.msra.mxu0 %v3211_v25  ;;  %921 = vmatpush1.bf16.msra.mxu1 %v3242_v30 }
 0x351   :  { %879 = vmatprep.subr.bf16.mxu0 %v3217_v26  ;;  %922 = vmatprep.subr.bf16.mxu1 %v3248_v31 }
 0x354   :  { %880 = vmatpush1.bf16.msra.mxu0 %v3235_v29  ;;  %923 = vmatpush1.bf16.msra.mxu1 %v3255_v32  ;;  %v706_v29 = vunpack.c.l.bf16 %v2332_v24  ;;  %v3588_v24 = vld [vmem:[%s4245_s1 + $0xa4] ss:$16 sps:$4 sm:$0xff]  }
 0x355   :  { %1021 = vmatprep.subr.bf16.mxu0 %v3066_v0  ;;  %1064 = vmatprep.subr.bf16.mxu1 %v3098_v6  ;;  %v2330_v0 = vld [vmem:[%s4246_s0 + $0x68] sm:$0xff] }
 0x356   :  { %v703_v21 = vunpack.c.h.bf16 %v2330_v0  ;;  %v702_v26 = vunpack.c.l.bf16 %v2330_v0  ;;  %v3504_v0 = vld [vmem:[%s4245_s1 + $0x20] ss:$16 sps:$4 sm:$0xff]  }
 0x40a   :  { %v743_v8 = vpop.f32.mrb[12].mxu0  ;;  %v786_v9 = vpop.f32.mrb[12].mxu1 }
 0x40b   :  { %v795_v11 = vadd.f32 %v743_v8, %v700_v4  ;;  %v745_v6 = vpop.f32.mrb[13].mxu0  ;;  %v788_v12 = vpop.f32.mrb[13].mxu1  ;;  %v797_v36 = vadd.f32 %v786_v9, %v702_v26  ;;  %v3484_v9 = vld [vmem:[%s4245_s1 + $0x8] ss:$16 sps:$4 sm:$0xff]   ;;  %v3600_v26 = vld [vmem:[%s4245_s1 + $0xa0] ss:$16 sps:$4 sm:$0xff]  }
 0x40c   :  { %v796_v13 = vadd.f32 %v745_v6, %v701_v5  ;;  %v747_v14 = vpop.f32.mrb[14].mxu0  ;;  %v790_v15 = vpop.f32.mrb[14].mxu1  ;;  %v798_v27 = vadd.f32 %v788_v12, %v703_v21  ;;  %v3510_v6 = vld [vmem:[%s4245_s1 + $0x28] ss:$16 sps:$4 sm:$0xff]   ;;  %v3516_v12 = vld [vmem:[%s4245_s1 + $0x44] ss:$16 sps:$4 sm:$0xff]  }
 0x40d   :  { %v2333_v16 = vmul.f32 -1.442695, %v795_v11  ;;  %v799_v17 = vadd.f32 %v747_v14, %v704_v7  ;;  %v749_v18 = vpop.f32.mrb[15].mxu0  ;;  %v792_v19 = vpop.f32.mrb[15].mxu1  ;;  %v801_v51 = vadd.f32 %v790_v15, %v706_v29  ;;  %v3496_v11 = vld [vmem:[%s4245_s1 + $0x2c] ss:$16 sps:$4 sm:$0xff]  }
 0x40e   :  { %v2334_v20 = vmul.f32 -1.442695, %v796_v13  ;;  %v800_v22 = vadd.f32 %v749_v18, %v705_v10  ;;  %v2337_v50 = vmul.f32 -1.442695, %v798_v27  ;;  %v802_v43 = vadd.f32 %v792_v19, %v707_v28  ;;  %v3490_v10 = vld [vmem:[%s4245_s1 + $0x24] ss:$16 sps:$4 sm:$0xff]  }
 0x40f   :  { %2656 = vpow2.f32 %v2333_v16  ;;  %v2335_v23 = vmul.f32 -1.442695, %v799_v17  ;;  %v3522_v13 = vld [vmem:[%s4245_s1 + $0x4c] ss:$16 sps:$4 sm:$0xff]   ;;  %v3528_v14 = vld [vmem:[%s4245_s1 + $0x40] ss:$16 sps:$4 sm:$0xff]  }
 0x410   :  { %2658 = vpow2.f32 %v2334_v20  ;;  %v2336_v25 = vmul.f32 -1.442695, %v800_v22  ;;  %v2338_v55 = vmul.f32 -1.442695, %v802_v43  ;;  %v3534_v15 = vld [vmem:[%s4245_s1 + $0x48] ss:$16 sps:$4 sm:$0xff]  }
 0x411   :  { %2660 = vpow2.f32 %v2335_v23  ;;  %v3540_v16 = vld [vmem:[%s4245_s1 + $0x64] ss:$16 sps:$4 sm:$0xff]   ;;  %v3546_v17 = vld [vmem:[%s4245_s1 + $0x6c] ss:$16 sps:$4 sm:$0xff]   ;;  %v3552_v18 = vld [vmem:[%s4245_s1 + $0x60] ss:$16 sps:$4 sm:$0xff]  }
 0x412   :  { %2662 = vpow2.f32 %v2336_v25  ;;  %v3558_v19 = vld [vmem:[%s4245_s1 + $0x68] ss:$16 sps:$4 sm:$0xff]   ;;  %v3564_v20 = vld [vmem:[%s4245_s1 + $0x84] ss:$16 sps:$4 sm:$0xff]   ;;  %v3570_v21 = vld [vmem:[%s4245_s1 + $0x8c] ss:$16 sps:$4 sm:$0xff]  }
 0x413   :  { %2664 = vtanh.f32 %v797_v36  ;;  %v3576_v22 = vld [vmem:[%s4245_s1 + $0x80] ss:$16 sps:$4 sm:$0xff]   ;;  %v3582_v23 = vld [vmem:[%s4245_s1 + $0x88] ss:$16 sps:$4 sm:$0xff]   ;;  %v3594_v25 = vld [vmem:[%s4245_s1 + $0xac] ss:$16 sps:$4 sm:$0xff]  }
 0x414   :  { %2666 = vpow2.f32 %v2337_v50  ;;  %v3606_v27 = vld [vmem:[%s4245_s1 + $0xa8] ss:$16 sps:$4 sm:$0xff]   ;;  %v3612_v28 = vld [vmem:[%s4245_s1 + $0xc4] ss:$16 sps:$4 sm:$0xff]   ;;  %v3618_v29 = vld [vmem:[%s4245_s1 + $0xcc] ss:$16 sps:$4 sm:$0xff]  }
 0x415   :  { %2668 = vtanh.f32 %v801_v51  ;;  %v3624_v36 = vld [vmem:[%s4245_s1 + $0xc0] ss:$16 sps:$4 sm:$0xff]   ;;  %v3631_v50 = vld [vmem:[%s4245_s1 + $0xe4] ss:$16 sps:$4 sm:$0xff]  }
 0x416   :  { %v3638_v43 = vld [vmem:[%s4245_s1 + $0xe0] ss:$16 sps:$4 sm:$0xff]  }
 0x417   :  { %v2339_v51 = vld [vmem:[%s4246_s0 + $0x80] sm:$0xff] }
 0x419   :  { %v2657_v54 = vpop.eup %2656 }
 0x41a   :  { %v2659_v52 = vpop.eup %2658  ;;  %v815_v53 = vadd.f32 1.0, %v2657_v54  ;;  %v856_v54 = vunpack.c.l.bf16 %v2339_v51 }
 0x41b   :  { %v816_v48 = vadd.f32 1.0, %v2659_v52  ;;  %v2661_v57 = vpop.eup %2660  ;;  %v857_v52 = vunpack.c.h.bf16 %v2339_v51 }
 0x41c   :  { %2670 = vrcp.f32 %v815_v53  ;;  %v817_v56 = vadd.f32 1.0, %v2661_v57  ;;  %v2663_v58 = vpop.eup %2662 }
 0x41d   :  { %2672 = vrcp.f32 %v816_v48  ;;  %v818_v61 = vadd.f32 1.0, %v2663_v58  ;;  %v2665_v63 = vpop.eup %2664  ;;  %v2340_v58 = vld [vmem:[%s4246_s0 + $0x88] sm:$0xff] }
 0x41e   :  { %2674 = vpow2.f32 %v2338_v55  ;;  %v2667_v33 = vpop.eup %2666 }
 0x41f   :  { %2676 = vrcp.f32 %v817_v56  ;;  %v2669_v34 = vpop.eup %2668  ;;  %v835_v60 = vadd.f32 1.0, %v2667_v33 }
 0x420   :  { %2678 = vrcp.f32 %v818_v61 }
 0x421   :  { %2680 = vrcp.f32 %v835_v60  ;;  %v859_v60 = vunpack.c.h.bf16 %v2340_v58 }
 0x426   :  { %v2671_v35 = vpop.eup %2670 }
 0x427   :  { %v2673_v37 = vpop.eup %2672  ;;  %v843_v59 = vmul.f32 %v2671_v35, %v2665_v63 }
 0x428   :  { %v2675_v39 = vpop.eup %2674  ;;  %v841_v40 = vmul.f32 %v2673_v37, %v3414_v38 }
 0x429   :  { %v2677_v41 = vpop.eup %2676  ;;  %v836_v47 = vadd.f32 1.0, %v2675_v39 }
 0x42a   :  { %v3468_v44 = vadd.f32 %v843_v59, %v841_v40  ;;  %v844_v62 = vmul.f32 %v2677_v41, %v2669_v34  ;;  %v2679_v45 = vpop.eup %2678 }
 0x42b   :  { %v842_v49 = vmul.f32 %v2679_v45, %v3418_v42  ;;  %v2681_v2 = vpop.eup %2680  ;;  %v3478_v42 = vld [vmem:[%s4245_s1] ss:$16 sps:$4 sm:$0xff]  }
 0x42c   :  { %2682 = vtanh.f32 %v3468_v44 }
 0x42d   :  { %v3472_v46 = vadd.f32 %v844_v62, %v842_v49  ;;  %2684 = vrcp.f32 %v836_v47  ;;  %v2342_v47 = vld [vmem:[%s4246_s0 + $0x98] sm:$0xff] }
 0x42f   :  { %2686 = vtanh.f32 %v3472_v46 }
 0x436   :  { %v2683_v3 = vpop.eup %2682 }
 0x437   :  { %v2685_v38 = vpop.eup %2684  ;;  %v849_v5 = vmul.f32 %v2683_v3, %v2681_v2  ;;  %v858_v2 = vunpack.c.l.bf16 %v2340_v58 }
 0x439   :  { %v2687_v4 = vpop.eup %2686 }
 0x43a   :  { %v850_v7 = vmul.f32 %v2687_v4, %v2685_v38  ;;  %v863_v38 = vunpack.c.h.bf16 %v2342_v47  ;;  %v862_v4 = vunpack.c.l.bf16 %v2342_v47 }
 0x43c   :  { %v864_v8 = vpack.c.bf16 %v850_v7, %v849_v5 }
 0x43e   :  { %898 = vmatmul.mubr.bf16.vlgmr.msra.gmra.mrb[16].mxu0 %v864_v8  ;;  %941 = vmatmul.mubr.bf16.vlgmr.msra.gmra.mrb[16].mxu1 %v864_v8 }
 0x43f   :  { %1022 = vmatpush1.bf16.msra.mxu0 %v3478_v42  ;;  %1065 = vmatpush1.bf16.msra.mxu1 %v3484_v9 }
 0x440   :  { %1023 = vmatprep.subr.bf16.mxu0 %v3490_v10  ;;  %1066 = vmatprep.subr.bf16.mxu1 %v3496_v11 }
 0x441   :  { %1053 = vmatprep.mubr.bf16.mxu0 %v3020_v1  ;;  %1096 = vmatprep.mubr.bf16.mxu1 %v3020_v1 }
 0x443   :  { %1024 = vmatpush1.bf16.msra.mxu0 %v3504_v0  ;;  %1067 = vmatpush1.bf16.msra.mxu1 %v3510_v6 }
 0x444   :  { %1025 = vmatprep.subr.bf16.mxu0 %v3516_v12  ;;  %1068 = vmatprep.subr.bf16.mxu1 %v3522_v13 }
 0x447   :  { %1026 = vmatpush1.bf16.msra.mxu0 %v3528_v14  ;;  %1069 = vmatpush1.bf16.msra.mxu1 %v3534_v15 }
 0x448   :  { %1027 = vmatprep.subr.bf16.mxu0 %v3540_v16  ;;  %1070 = vmatprep.subr.bf16.mxu1 %v3546_v17 }
 0x44b   :  { %1028 = vmatpush1.bf16.msra.mxu0 %v3552_v18  ;;  %1071 = vmatpush1.bf16.msra.mxu1 %v3558_v19 }
 0x44c   :  { %1029 = vmatprep.subr.bf16.mxu0 %v3564_v20  ;;  %1072 = vmatprep.subr.bf16.mxu1 %v3570_v21 }
 0x44f   :  { %1030 = vmatpush1.bf16.msra.mxu0 %v3576_v22  ;;  %1073 = vmatpush1.bf16.msra.mxu1 %v3582_v23 }
 0x450   :  { %1031 = vmatprep.subr.bf16.mxu0 %v3588_v24  ;;  %1074 = vmatprep.subr.bf16.mxu1 %v3594_v25 }
 0x453   :  { %1032 = vmatpush1.bf16.msra.mxu0 %v3600_v26  ;;  %1075 = vmatpush1.bf16.msra.mxu1 %v3606_v27 }
 0x454   :  { %1033 = vmatprep.subr.bf16.mxu0 %v3612_v28  ;;  %1076 = vmatprep.subr.bf16.mxu1 %v3618_v29 }
 0x457   :  { %1034 = vmatpush1.bf16.msra.mxu0 %v3624_v36  ;;  %1077 = vmatpush1.bf16.msra.mxu1 %v3242_v30  ;;  %v3645_v30 = vld [vmem:[%s4245_s1 + $0x4] ss:$16 sps:$4 sm:$0xff]  }
 0x458   :  { %1035 = vmatprep.subr.bf16.mxu0 %v3631_v50  ;;  %1078 = vmatprep.subr.bf16.mxu1 %v3248_v31  ;;  %v3651_v31 = vld [vmem:[%s4245_s1 + $0xc] ss:$16 sps:$4 sm:$0xff]  }
 0x45b   :  { %1036 = vmatpush1.bf16.msra.mxu0 %v3638_v43  ;;  %1079 = vmatpush1.bf16.msra.mxu1 %v3255_v32  ;;  %v2341_v32 = vld [vmem:[%s4246_s0 + $0x90] sm:$0xff] }
 0x45c   :  { %1177 = vmatprep.subr.bf16.mxu0 %v3645_v30  ;;  %1220 = vmatprep.subr.bf16.mxu1 %v3651_v31  ;;  %v860_v53 = vunpack.c.l.bf16 %v2341_v32  ;;  %v861_v57 = vunpack.c.h.bf16 %v2341_v32 }
 0x511   :  { %v899_v55 = vpop.f32.mrb[16].mxu0  ;;  %v942_v48 = vpop.f32.mrb[16].mxu1 }
 0x512   :  { %v951_v56 = vadd.f32 %v899_v55, %v856_v54  ;;  %v901_v61 = vpop.f32.mrb[17].mxu0  ;;  %v944_v63 = vpop.f32.mrb[17].mxu1  ;;  %v953_v5 = vadd.f32 %v942_v48, %v858_v2 }
 0x513   :  { %v952_v33 = vadd.f32 %v901_v61, %v857_v52  ;;  %v903_v34 = vpop.f32.mrb[18].mxu0  ;;  %v946_v35 = vpop.f32.mrb[18].mxu1  ;;  %v954_v3 = vadd.f32 %v944_v63, %v859_v60 }
 0x514   :  { %v2343_v37 = vmul.f32 -1.442695, %v951_v56  ;;  %v955_v59 = vadd.f32 %v903_v34, %v860_v53  ;;  %v905_v39 = vpop.f32.mrb[19].mxu0  ;;  %v948_v40 = vpop.f32.mrb[19].mxu1  ;;  %v957_v51 = vadd.f32 %v946_v35, %v862_v4 }
 0x515   :  { %v2344_v41 = vmul.f32 -1.442695, %v952_v33  ;;  %v956_v62 = vadd.f32 %v905_v39, %v861_v57  ;;  %v2347_v7 = vmul.f32 -1.442695, %v954_v3  ;;  %v958_v8 = vadd.f32 %v948_v40, %v863_v38 }
 0x516   :  { %2688 = vpow2.f32 %v2343_v37  ;;  %v2345_v45 = vmul.f32 -1.442695, %v955_v59 }
 0x517   :  { %2690 = vpow2.f32 %v2344_v41  ;;  %v2346_v49 = vmul.f32 -1.442695, %v956_v62  ;;  %v2348_v53 = vmul.f32 -1.442695, %v958_v8 }
 0x518   :  { %2692 = vpow2.f32 %v2345_v45 }
 0x519   :  { %2694 = vpow2.f32 %v2346_v49 }
 0x51a   :  { %2696 = vtanh.f32 %v953_v5 }
 0x51b   :  { %2698 = vpow2.f32 %v2347_v7 }
 0x51c   :  { %2700 = vtanh.f32 %v957_v51  ;;  %v3711_v51 = vld [vmem:[%s4245_s1 + $0xec] ss:$16 sps:$4 sm:$0xff]  }
 0x520   :  { %v2689_v32 = vpop.eup %2688 }
 0x521   :  { %v2691_v54 = vpop.eup %2690  ;;  %v971_v52 = vadd.f32 1.0, %v2689_v32  ;;  %v3718_v32 = vld [vmem:[%s4245_s1 + $0xe8] ss:$16 sps:$4 sm:$0xff]  }
 0x522   :  { %v972_v55 = vadd.f32 1.0, %v2691_v54  ;;  %v2693_v57 = vpop.eup %2692  ;;  %v2349_v54 = vld [vmem:[%s4246_s0 + $0xa0] sm:$0xff] }
 0x523   :  { %2702 = vrcp.f32 %v971_v52  ;;  %v973_v56 = vadd.f32 1.0, %v2693_v57  ;;  %v2695_v58 = vpop.eup %2694  ;;  %v2351_v52 = vld [vmem:[%s4246_s0 + $0xb0] sm:$0xff] }
 0x524   :  { %2704 = vrcp.f32 %v972_v55  ;;  %v974_v61 = vadd.f32 1.0, %v2695_v58  ;;  %v2697_v48 = vpop.eup %2696  ;;  %v1013_v55 = vunpack.c.h.bf16 %v2349_v54  ;;  %v1016_v57 = vunpack.c.l.bf16 %v2351_v52 }
 0x525   :  { %2706 = vpow2.f32 %v2348_v53  ;;  %v2699_v63 = vpop.eup %2698  ;;  %v1012_v53 = vunpack.c.l.bf16 %v2349_v54 }
 0x526   :  { %2708 = vrcp.f32 %v973_v56  ;;  %v2701_v33 = vpop.eup %2700  ;;  %v991_v41 = vadd.f32 1.0, %v2699_v63  ;;  %v2350_v63 = vld [vmem:[%s4246_s0 + $0xa8] sm:$0xff] }
 0x527   :  { %2710 = vrcp.f32 %v974_v61  ;;  %v1017_v61 = vunpack.c.h.bf16 %v2351_v52 }
 0x528   :  { %2712 = vrcp.f32 %v991_v41 }
 0x52d   :  { %v2703_v34 = vpop.eup %2702 }
 0x52e   :  { %v2705_v35 = vpop.eup %2704  ;;  %v999_v37 = vmul.f32 %v2703_v34, %v2697_v48 }
 0x52f   :  { %v2707_v59 = vpop.eup %2706  ;;  %v997_v39 = vmul.f32 %v2705_v35, %v3468_v44 }
 0x530   :  { %v2709_v40 = vpop.eup %2708  ;;  %v992_v47 = vadd.f32 1.0, %v2707_v59 }
 0x531   :  { %v3667_v60 = vadd.f32 %v999_v37, %v997_v39  ;;  %v1000_v62 = vmul.f32 %v2709_v40, %v2701_v33  ;;  %v2711_v45 = vpop.eup %2710 }
 0x532   :  { %v998_v49 = vmul.f32 %v2711_v45, %v3472_v46  ;;  %v2713_v3 = vpop.eup %2712  ;;  %v3704_v46 = vld [vmem:[%s4245_s1 + $0xc8] ss:$16 sps:$4 sm:$0xff]  }
 0x533   :  { %2714 = vtanh.f32 %v3667_v60 }
 0x534   :  { %v3671_v2 = vadd.f32 %v1000_v62, %v998_v49  ;;  %2716 = vrcp.f32 %v992_v47  ;;  %v1015_v47 = vunpack.c.h.bf16 %v2350_v63 }
 0x536   :  { %2718 = vtanh.f32 %v3671_v2 }
 0x53d   :  { %v2715_v38 = vpop.eup %2714 }
 0x53e   :  { %v2717_v44 = vpop.eup %2716  ;;  %v1005_v5 = vmul.f32 %v2715_v38, %v2713_v3  ;;  %v2352_v38 = vld [vmem:[%s4246_s0 + $0xb8] sm:$0xff] }
 0x540   :  { %v2719_v4 = vpop.eup %2718 }
 0x541   :  { %v1006_v7 = vmul.f32 %v2719_v4, %v2717_v44  ;;  %v1014_v4 = vunpack.c.l.bf16 %v2350_v63 }
 0x543   :  { %v1020_v8 = vpack.c.bf16 %v1006_v7, %v1005_v5  ;;  %v1019_v7 = vunpack.c.h.bf16 %v2352_v38 }
 0x545   :  { %1054 = vmatmul.mubr.bf16.vlgmr.msra.gmra.mrb[20].mxu0 %v1020_v8  ;;  %1097 = vmatmul.mubr.bf16.vlgmr.msra.gmra.mrb[20].mxu1 %v1020_v8  ;;  %v1018_v8 = vunpack.c.l.bf16 %v2352_v38 }
 0x546   :  { %1178 = vmatpush1.bf16.msra.mxu0 %v3478_v42  ;;  %1221 = vmatpush1.bf16.msra.mxu1 %v3484_v9 }
 0x547   :  { %1179 = vmatprep.subr.bf16.mxu0 %v3490_v10  ;;  %1222 = vmatprep.subr.bf16.mxu1 %v3496_v11 }
 0x548   :  { %1209 = vmatprep.mubr.bf16.mxu0 %v3020_v1  ;;  %1252 = vmatprep.mubr.bf16.mxu1 %v3020_v1 }
 0x54a   :  { %1180 = vmatpush1.bf16.msra.mxu0 %v3504_v0  ;;  %1223 = vmatpush1.bf16.msra.mxu1 %v3510_v6 }
 0x54b   :  { %1181 = vmatprep.subr.bf16.mxu0 %v3516_v12  ;;  %1224 = vmatprep.subr.bf16.mxu1 %v3522_v13 }
 0x54e   :  { %1182 = vmatpush1.bf16.msra.mxu0 %v3528_v14  ;;  %1225 = vmatpush1.bf16.msra.mxu1 %v3534_v15 }
 0x54f   :  { %1183 = vmatprep.subr.bf16.mxu0 %v3540_v16  ;;  %1226 = vmatprep.subr.bf16.mxu1 %v3546_v17 }
 0x552   :  { %1184 = vmatpush1.bf16.msra.mxu0 %v3552_v18  ;;  %1227 = vmatpush1.bf16.msra.mxu1 %v3558_v19 }
 0x553   :  { %1185 = vmatprep.subr.bf16.mxu0 %v3564_v20  ;;  %1228 = vmatprep.subr.bf16.mxu1 %v3570_v21 }
 0x556   :  { %1186 = vmatpush1.bf16.msra.mxu0 %v3576_v22  ;;  %1229 = vmatpush1.bf16.msra.mxu1 %v3582_v23 }
 0x557   :  { %1187 = vmatprep.subr.bf16.mxu0 %v3588_v24  ;;  %1230 = vmatprep.subr.bf16.mxu1 %v3594_v25 }
 0x55a   :  { %1188 = vmatpush1.bf16.msra.mxu0 %v3600_v26  ;;  %1231 = vmatpush1.bf16.msra.mxu1 %v3606_v27 }
 0x55b   :  { %1189 = vmatprep.subr.bf16.mxu0 %v3612_v28  ;;  %1232 = vmatprep.subr.bf16.mxu1 %v3618_v29 }
 0x55e   :  { %1190 = vmatpush1.bf16.msra.mxu0 %v3624_v36  ;;  %1233 = vmatpush1.bf16.msra.mxu1 %v3704_v46 }
 0x55f   :  { %1191 = vmatprep.subr.bf16.mxu0 %v3631_v50  ;;  %1234 = vmatprep.subr.bf16.mxu1 %v3711_v51 }
 0x562   :  { %1192 = vmatpush1.bf16.msra.mxu0 %v3638_v43  ;;  %1235 = vmatpush1.bf16.msra.mxu1 %v3718_v32 }
 0x563   :  { %1333 = vmatprep.subr.bf16.mxu0 %v3645_v30  ;;  %1376 = vmatprep.subr.bf16.mxu1 %v3651_v31 }
 0x618   :  { %v1055_v56 = vpop.f32.mrb[20].mxu0  ;;  %v1098_v58 = vpop.f32.mrb[20].mxu1 }
 0x619   :  { %v1107_v48 = vadd.f32 %v1055_v56, %v1012_v53  ;;  %v1057_v33 = vpop.f32.mrb[21].mxu0  ;;  %v1100_v34 = vpop.f32.mrb[21].mxu1  ;;  %v1109_v54 = vadd.f32 %v1098_v58, %v1014_v4 }
 0x61a   :  { %v1108_v35 = vadd.f32 %v1057_v33, %v1013_v55  ;;  %v1059_v37 = vpop.f32.mrb[22].mxu0  ;;  %v1102_v59 = vpop.f32.mrb[22].mxu1  ;;  %v1110_v5 = vadd.f32 %v1100_v34, %v1015_v47 }
 0x61b   :  { %v2353_v39 = vmul.f32 -1.442695, %v1107_v48  ;;  %v1111_v40 = vadd.f32 %v1059_v37, %v1016_v57  ;;  %v1061_v41 = vpop.f32.mrb[23].mxu0  ;;  %v1104_v62 = vpop.f32.mrb[23].mxu1  ;;  %v1113_v55 = vadd.f32 %v1102_v59, %v1018_v8 }
 0x61c   :  { %v2354_v45 = vmul.f32 -1.442695, %v1108_v35  ;;  %v1112_v49 = vadd.f32 %v1061_v41, %v1017_v61  ;;  %v2357_v52 = vmul.f32 -1.442695, %v1110_v5  ;;  %v1114_v53 = vadd.f32 %v1104_v62, %v1019_v7 }
 0x61d   :  { %2720 = vpow2.f32 %v2353_v39  ;;  %v2355_v3 = vmul.f32 -1.442695, %v1111_v40 }
 0x61e   :  { %2722 = vpow2.f32 %v2354_v45  ;;  %v2356_v44 = vmul.f32 -1.442695, %v1112_v49  ;;  %v2358_v48 = vmul.f32 -1.442695, %v1114_v53 }
 0x61f   :  { %2724 = vpow2.f32 %v2355_v3 }
 0x620   :  { %2726 = vpow2.f32 %v2356_v44 }
 0x621   :  { %2728 = vtanh.f32 %v1109_v54 }
 0x622   :  { %2730 = vpow2.f32 %v2357_v52 }
 0x623   :  { %2732 = vtanh.f32 %v1113_v55 }
 0x627   :  { %v2721_v57 = vpop.eup %2720 }
 0x628   :  { %v2723_v56 = vpop.eup %2722  ;;  %v1127_v61 = vadd.f32 1.0, %v2721_v57 }
 0x629   :  { %v1128_v33 = vadd.f32 1.0, %v2723_v56  ;;  %v2725_v35 = vpop.eup %2724 }
 0x62a   :  { %2734 = vrcp.f32 %v1127_v61  ;;  %v1129_v63 = vadd.f32 1.0, %v2725_v35  ;;  %v2727_v34 = vpop.eup %2726  ;;  %v2361_v61 = vld [vmem:[%s4246_s0 + $0xd0] sm:$0xff] }
 0x62b   :  { %2736 = vrcp.f32 %v1128_v33  ;;  %v1130_v37 = vadd.f32 1.0, %v2727_v34  ;;  %v2729_v58 = vpop.eup %2728  ;;  %v1172_v35 = vunpack.c.l.bf16 %v2361_v61 }
 0x62c   :  { %2738 = vpow2.f32 %v2358_v48  ;;  %v2731_v39 = vpop.eup %2730 }
 0x62d   :  { %2740 = vrcp.f32 %v1129_v63  ;;  %v2733_v59 = vpop.eup %2732  ;;  %v1147_v3 = vadd.f32 1.0, %v2731_v39  ;;  %v2360_v39 = vld [vmem:[%s4246_s0 + $0xc8] sm:$0xff] }
 0x62e   :  { %2742 = vrcp.f32 %v1130_v37  ;;  %v1173_v37 = vunpack.c.h.bf16 %v2361_v61 }
 0x62f   :  { %2744 = vrcp.f32 %v1147_v3 }
 0x634   :  { %v2735_v40 = vpop.eup %2734 }
 0x635   :  { %v2737_v41 = vpop.eup %2736  ;;  %v1155_v62 = vmul.f32 %v2735_v40, %v2729_v58 }
 0x636   :  { %v2739_v45 = vpop.eup %2738  ;;  %v1153_v47 = vmul.f32 %v2737_v41, %v3667_v60 }
 0x637   :  { %v2741_v49 = vpop.eup %2740  ;;  %v1148_v5 = vadd.f32 1.0, %v2739_v45 }
 0x638   :  { %v3736_v38 = vadd.f32 %v1155_v62, %v1153_v47  ;;  %v1156_v44 = vmul.f32 %v2741_v49, %v2733_v59  ;;  %v2743_v4 = vpop.eup %2742 }
 0x639   :  { %v1154_v7 = vmul.f32 %v2743_v4, %v3671_v2  ;;  %v2745_v54 = vpop.eup %2744  ;;  %v2359_v2 = vld [vmem:[%s4246_s0 + $0xc0] sm:$0xff] }
 0x63a   :  { %2746 = vtanh.f32 %v3736_v38  ;;  %v1168_v48 = vunpack.c.l.bf16 %v2359_v2  ;;  %v1169_v33 = vunpack.c.h.bf16 %v2359_v2 }
 0x63b   :  { %v3740_v8 = vadd.f32 %v1156_v44, %v1154_v7  ;;  %2748 = vrcp.f32 %v1148_v5  ;;  %v1171_v5 = vunpack.c.h.bf16 %v2360_v39 }
 0x63d   :  { %2750 = vtanh.f32 %v3740_v8 }
 0x644   :  { %v2747_v52 = vpop.eup %2746 }
 0x645   :  { %v2749_v60 = vpop.eup %2748  ;;  %v1161_v55 = vmul.f32 %v2747_v52, %v2745_v54  ;;  %v2362_v52 = vld [vmem:[%s4246_s0 + $0xd8] sm:$0xff] }
 0x647   :  { %v2751_v53 = vpop.eup %2750 }
 0x648   :  { %v1162_v57 = vmul.f32 %v2751_v53, %v2749_v60  ;;  %v1170_v53 = vunpack.c.l.bf16 %v2360_v39 }
 0x64a   :  { %v1176_v56 = vpack.c.bf16 %v1162_v57, %v1161_v55  ;;  %v1175_v57 = vunpack.c.h.bf16 %v2362_v52 }
 0x64c   :  { %1210 = vmatmul.mubr.bf16.vlgmr.msra.gmra.mrb[24].mxu0 %v1176_v56  ;;  %1253 = vmatmul.mubr.bf16.vlgmr.msra.gmra.mrb[24].mxu1 %v1176_v56  ;;  %v1174_v56 = vunpack.c.l.bf16 %v2362_v52 }
 0x64d   :  { %1334 = vmatpush1.bf16.msra.mxu0 %v3478_v42  ;;  %1377 = vmatpush1.bf16.msra.mxu1 %v3484_v9 }
 0x64e   :  { %1335 = vmatprep.subr.bf16.mxu0 %v3490_v10  ;;  %1378 = vmatprep.subr.bf16.mxu1 %v3496_v11 }
 0x64f   :  { %1365 = vmatprep.mubr.bf16.mxu0 %v3020_v1  ;;  %1408 = vmatprep.mubr.bf16.mxu1 %v3020_v1 }
 0x651   :  { %1336 = vmatpush1.bf16.msra.mxu0 %v3504_v0  ;;  %1379 = vmatpush1.bf16.msra.mxu1 %v3510_v6 }
 0x652   :  { %1337 = vmatprep.subr.bf16.mxu0 %v3516_v12  ;;  %1380 = vmatprep.subr.bf16.mxu1 %v3522_v13 }
 0x655   :  { %1338 = vmatpush1.bf16.msra.mxu0 %v3528_v14  ;;  %1381 = vmatpush1.bf16.msra.mxu1 %v3534_v15 }
 0x656   :  { %1339 = vmatprep.subr.bf16.mxu0 %v3540_v16  ;;  %1382 = vmatprep.subr.bf16.mxu1 %v3546_v17 }
 0x659   :  { %1340 = vmatpush1.bf16.msra.mxu0 %v3552_v18  ;;  %1383 = vmatpush1.bf16.msra.mxu1 %v3558_v19 }
 0x65a   :  { %1341 = vmatprep.subr.bf16.mxu0 %v3564_v20  ;;  %1384 = vmatprep.subr.bf16.mxu1 %v3570_v21 }
 0x65d   :  { %1342 = vmatpush1.bf16.msra.mxu0 %v3576_v22  ;;  %1385 = vmatpush1.bf16.msra.mxu1 %v3582_v23 }
 0x65e   :  { %1343 = vmatprep.subr.bf16.mxu0 %v3588_v24  ;;  %1386 = vmatprep.subr.bf16.mxu1 %v3594_v25 }
 0x661   :  { %1344 = vmatpush1.bf16.msra.mxu0 %v3600_v26  ;;  %1387 = vmatpush1.bf16.msra.mxu1 %v3606_v27 }
 0x662   :  { %1345 = vmatprep.subr.bf16.mxu0 %v3612_v28  ;;  %1388 = vmatprep.subr.bf16.mxu1 %v3618_v29 }
 0x665   :  { %1346 = vmatpush1.bf16.msra.mxu0 %v3624_v36  ;;  %1389 = vmatpush1.bf16.msra.mxu1 %v3704_v46 }
 0x666   :  { %1347 = vmatprep.subr.bf16.mxu0 %v3631_v50  ;;  %1390 = vmatprep.subr.bf16.mxu1 %v3711_v51 }
 0x669   :  { %1348 = vmatpush1.bf16.msra.mxu0 %v3638_v43  ;;  %1391 = vmatpush1.bf16.msra.mxu1 %v3718_v32 }
 0x66a   :  { %1489 = vmatprep.subr.bf16.mxu0 %v3645_v30  ;;  %1532 = vmatprep.subr.bf16.mxu1 %v3651_v31 }
 0x71f   :  { %v1211_v63 = vpop.f32.mrb[24].mxu0  ;;  %v1254_v34 = vpop.f32.mrb[24].mxu1 }
 0x720   :  { %v1263_v58 = vadd.f32 %v1211_v63, %v1168_v48  ;;  %v1213_v59 = vpop.f32.mrb[25].mxu0  ;;  %v1256_v40 = vpop.f32.mrb[25].mxu1  ;;  %v1265_v2 = vadd.f32 %v1254_v34, %v1170_v53 }
 0x721   :  { %v1264_v41 = vadd.f32 %v1213_v59, %v1169_v33  ;;  %v1215_v62 = vpop.f32.mrb[26].mxu0  ;;  %v1258_v45 = vpop.f32.mrb[26].mxu1  ;;  %v1266_v55 = vadd.f32 %v1256_v40, %v1171_v5 }
 0x722   :  { %v2363_v47 = vmul.f32 -1.442695, %v1263_v58  ;;  %v1267_v49 = vadd.f32 %v1215_v62, %v1172_v35  ;;  %v1217_v3 = vpop.f32.mrb[27].mxu0  ;;  %v1260_v44 = vpop.f32.mrb[27].mxu1  ;;  %v1269_v33 = vadd.f32 %v1258_v45, %v1174_v56 }
 0x723   :  { %v2364_v4 = vmul.f32 -1.442695, %v1264_v41  ;;  %v1268_v7 = vadd.f32 %v1217_v3, %v1173_v37  ;;  %v2367_v61 = vmul.f32 -1.442695, %v1266_v55  ;;  %v1270_v48 = vadd.f32 %v1260_v44, %v1175_v57 }
 0x724   :  { %2752 = vpow2.f32 %v2363_v47  ;;  %v2365_v54 = vmul.f32 -1.442695, %v1267_v49 }
 0x725   :  { %2754 = vpow2.f32 %v2364_v4  ;;  %v2366_v60 = vmul.f32 -1.442695, %v1268_v7  ;;  %v2368_v58 = vmul.f32 -1.442695, %v1270_v48 }
 0x726   :  { %2756 = vpow2.f32 %v2365_v54 }
 0x727   :  { %2758 = vpow2.f32 %v2366_v60 }
 0x728   :  { %2760 = vtanh.f32 %v1265_v2 }
 0x729   :  { %2762 = vpow2.f32 %v2367_v61 }
 0x72a   :  { %2764 = vtanh.f32 %v1269_v33 }
 0x72e   :  { %v2753_v35 = vpop.eup %2752 }
 0x72f   :  { %v2755_v63 = vpop.eup %2754  ;;  %v1283_v37 = vadd.f32 1.0, %v2753_v35 }
 0x730   :  { %v1284_v59 = vadd.f32 1.0, %v2755_v63  ;;  %v2757_v41 = vpop.eup %2756 }
 0x731   :  { %2766 = vrcp.f32 %v1283_v37  ;;  %v1285_v39 = vadd.f32 1.0, %v2757_v41  ;;  %v2759_v40 = vpop.eup %2758  ;;  %v2371_v37 = vld [vmem:[%s4246_s0 + $0xf0] sm:$0xff] }
 0x732   :  { %2768 = vrcp.f32 %v1284_v59  ;;  %v1286_v62 = vadd.f32 1.0, %v2759_v40  ;;  %v2761_v34 = vpop.eup %2760  ;;  %v1328_v41 = vunpack.c.l.bf16 %v2371_v37 }
 0x733   :  { %2770 = vpow2.f32 %v2368_v58  ;;  %v2763_v47 = vpop.eup %2762 }
 0x734   :  { %2772 = vrcp.f32 %v1285_v39  ;;  %v2765_v45 = vpop.eup %2764  ;;  %v1303_v54 = vadd.f32 1.0, %v2763_v47  ;;  %v2370_v47 = vld [vmem:[%s4246_s0 + $0xe8] sm:$0xff] }
 0x735   :  { %2774 = vrcp.f32 %v1286_v62  ;;  %v1329_v62 = vunpack.c.h.bf16 %v2371_v37 }
 0x736   :  { %2776 = vrcp.f32 %v1303_v54 }
 0x73b   :  { %v2767_v49 = vpop.eup %2766 }
 0x73c   :  { %v2769_v3 = vpop.eup %2768  ;;  %v1311_v44 = vmul.f32 %v2767_v49, %v2761_v34 }
 0x73d   :  { %v2771_v4 = vpop.eup %2770  ;;  %v1309_v5 = vmul.f32 %v2769_v3, %v3736_v38 }
 0x73e   :  { %v2773_v7 = vpop.eup %2772  ;;  %v1304_v55 = vadd.f32 1.0, %v2771_v4 }
 0x73f   :  { %v3790_v52 = vadd.f32 %v1311_v44, %v1309_v5  ;;  %v1312_v60 = vmul.f32 %v2773_v7, %v2765_v45  ;;  %v2775_v53 = vpop.eup %2774 }
 0x740   :  { %v1310_v57 = vmul.f32 %v2775_v53, %v3740_v8  ;;  %v2777_v2 = vpop.eup %2776  ;;  %v2369_v8 = vld [vmem:[%s4246_s0 + $0xe0] sm:$0xff] }
 0x741   :  { %2778 = vtanh.f32 %v3790_v52  ;;  %v1324_v58 = vunpack.c.l.bf16 %v2369_v8  ;;  %v1325_v59 = vunpack.c.h.bf16 %v2369_v8 }
 0x742   :  { %v3794_v56 = vadd.f32 %v1312_v60, %v1310_v57  ;;  %2780 = vrcp.f32 %v1304_v55  ;;  %v1327_v55 = vunpack.c.h.bf16 %v2370_v47 }
 0x744   :  { %2782 = vtanh.f32 %v3794_v56 }
 0x74b   :  { %v2779_v61 = vpop.eup %2778 }
 0x74c   :  { %v2781_v38 = vpop.eup %2780  ;;  %v1317_v33 = vmul.f32 %v2779_v61, %v2777_v2  ;;  %v2372_v61 = vld [vmem:[%s4246_s0 + $0xf8] sm:$0xff] }
 0x74e   :  { %v2783_v48 = vpop.eup %2782 }
 0x74f   :  { %v1318_v35 = vmul.f32 %v2783_v48, %v2781_v38  ;;  %v1326_v48 = vunpack.c.l.bf16 %v2370_v47 }
 0x751   :  { %v1332_v63 = vpack.c.bf16 %v1318_v35, %v1317_v33  ;;  %v1331_v35 = vunpack.c.h.bf16 %v2372_v61 }
 0x753   :  { %1366 = vmatmul.mubr.bf16.vlgmr.msra.gmra.mrb[28].mxu0 %v1332_v63  ;;  %1409 = vmatmul.mubr.bf16.vlgmr.msra.gmra.mrb[28].mxu1 %v1332_v63  ;;  %v1330_v63 = vunpack.c.l.bf16 %v2372_v61 }
 0x754   :  { %1490 = vmatpush1.bf16.msra.mxu0 %v3478_v42  ;;  %1533 = vmatpush1.bf16.msra.mxu1 %v3484_v9 }
 0x755   :  { %1491 = vmatprep.subr.bf16.mxu0 %v3490_v10  ;;  %1534 = vmatprep.subr.bf16.mxu1 %v3496_v11 }
 0x756   :  { %1521 = vmatprep.mubr.bf16.mxu0 %v3020_v1  ;;  %1564 = vmatprep.mubr.bf16.mxu1 %v3020_v1 }
 0x758   :  { %1492 = vmatpush1.bf16.msra.mxu0 %v3504_v0  ;;  %1535 = vmatpush1.bf16.msra.mxu1 %v3510_v6 }
 0x759   :  { %1493 = vmatprep.subr.bf16.mxu0 %v3516_v12  ;;  %1536 = vmatprep.subr.bf16.mxu1 %v3522_v13 }
 0x75c   :  { %1494 = vmatpush1.bf16.msra.mxu0 %v3528_v14  ;;  %1537 = vmatpush1.bf16.msra.mxu1 %v3534_v15 }
 0x75d   :  { %1495 = vmatprep.subr.bf16.mxu0 %v3540_v16  ;;  %1538 = vmatprep.subr.bf16.mxu1 %v3546_v17 }
 0x760   :  { %1496 = vmatpush1.bf16.msra.mxu0 %v3552_v18  ;;  %1539 = vmatpush1.bf16.msra.mxu1 %v3558_v19 }
 0x761   :  { %1497 = vmatprep.subr.bf16.mxu0 %v3564_v20  ;;  %1540 = vmatprep.subr.bf16.mxu1 %v3570_v21 }
 0x764   :  { %1498 = vmatpush1.bf16.msra.mxu0 %v3576_v22  ;;  %1541 = vmatpush1.bf16.msra.mxu1 %v3582_v23 }
 0x765   :  { %1499 = vmatprep.subr.bf16.mxu0 %v3588_v24  ;;  %1542 = vmatprep.subr.bf16.mxu1 %v3594_v25 }
 0x768   :  { %1500 = vmatpush1.bf16.msra.mxu0 %v3600_v26  ;;  %1543 = vmatpush1.bf16.msra.mxu1 %v3606_v27 }
 0x769   :  { %1501 = vmatprep.subr.bf16.mxu0 %v3612_v28  ;;  %1544 = vmatprep.subr.bf16.mxu1 %v3618_v29 }
 0x76c   :  { %1502 = vmatpush1.bf16.msra.mxu0 %v3624_v36  ;;  %1545 = vmatpush1.bf16.msra.mxu1 %v3704_v46 }
 0x76d   :  { %1503 = vmatprep.subr.bf16.mxu0 %v3631_v50  ;;  %1546 = vmatprep.subr.bf16.mxu1 %v3711_v51 }
 0x770   :  { %1504 = vmatpush1.bf16.msra.mxu0 %v3638_v43  ;;  %1547 = vmatpush1.bf16.msra.mxu1 %v3718_v32 }
 0x771   :  { %1645 = vmatprep.subr.bf16.mxu0 %v3645_v30  ;;  %1688 = vmatprep.subr.bf16.mxu1 %v3651_v31 }
 0x826   :  { %v1367_v39 = vpop.f32.mrb[28].mxu0  ;;  %v1410_v40 = vpop.f32.mrb[28].mxu1 }
 0x827   :  { %v1419_v34 = vadd.f32 %v1367_v39, %v1324_v58  ;;  %v1369_v45 = vpop.f32.mrb[29].mxu0  ;;  %v1412_v49 = vpop.f32.mrb[29].mxu1  ;;  %v1421_v8 = vadd.f32 %v1410_v40, %v1326_v48 }
 0x828   :  { %v1420_v3 = vadd.f32 %v1369_v45, %v1325_v59  ;;  %v1371_v44 = vpop.f32.mrb[30].mxu0  ;;  %v1414_v4 = vpop.f32.mrb[30].mxu1  ;;  %v1422_v33 = vadd.f32 %v1412_v49, %v1327_v55 }
 0x829   :  { %v2373_v5 = vmul.f32 -1.442695, %v1419_v34  ;;  %v1423_v7 = vadd.f32 %v1371_v44, %v1328_v41  ;;  %v1373_v54 = vpop.f32.mrb[31].mxu0  ;;  %v1416_v60 = vpop.f32.mrb[31].mxu1  ;;  %v1425_v59 = vadd.f32 %v1414_v4, %v1330_v63 }
 0x82a   :  { %v2374_v53 = vmul.f32 -1.442695, %v1420_v3  ;;  %v1424_v57 = vadd.f32 %v1373_v54, %v1329_v62  ;;  %v2377_v37 = vmul.f32 -1.442695, %v1422_v33  ;;  %v1426_v58 = vadd.f32 %v1416_v60, %v1331_v35 }
 0x82b   :  { %2784 = vpow2.f32 %v2373_v5  ;;  %v2375_v2 = vmul.f32 -1.442695, %v1423_v7 }
 0x82c   :  { %2786 = vpow2.f32 %v2374_v53  ;;  %v2376_v38 = vmul.f32 -1.442695, %v1424_v57  ;;  %v2378_v34 = vmul.f32 -1.442695, %v1426_v58 }
 0x82d   :  { %2788 = vpow2.f32 %v2375_v2 }
 0x82e   :  { %2790 = vpow2.f32 %v2376_v38 }
 0x82f   :  { %2792 = vtanh.f32 %v1421_v8 }
 0x830   :  { %2794 = vpow2.f32 %v2377_v37 }
 0x831   :  { %2796 = vtanh.f32 %v1425_v59 }
 0x835   :  { %v2785_v41 = vpop.eup %2784 }
 0x836   :  { %v2787_v39 = vpop.eup %2786  ;;  %v1439_v62 = vadd.f32 1.0, %v2785_v41 }
 0x837   :  { %v1440_v45 = vadd.f32 1.0, %v2787_v39  ;;  %v2789_v3 = vpop.eup %2788 }
 0x838   :  { %2798 = vrcp.f32 %v1439_v62  ;;  %v1441_v47 = vadd.f32 1.0, %v2789_v3  ;;  %v2791_v49 = vpop.eup %2790 }
 0x839   :  { %2800 = vrcp.f32 %v1440_v45  ;;  %v1442_v44 = vadd.f32 1.0, %v2791_v49  ;;  %v2793_v40 = vpop.eup %2792 }
 0x83a   :  { %2802 = vpow2.f32 %v2378_v34  ;;  %v2795_v5 = vpop.eup %2794 }
 0x83b   :  { %2804 = vrcp.f32 %v1441_v47  ;;  %v2797_v4 = vpop.eup %2796  ;;  %v1459_v2 = vadd.f32 1.0, %v2795_v5 }
 0x83c   :  { %2806 = vrcp.f32 %v1442_v44 }
 0x83d   :  { %2808 = vrcp.f32 %v1459_v2 }
 0x842   :  { %v2799_v7 = vpop.eup %2798 }
 0x843   :  { %v2801_v54 = vpop.eup %2800  ;;  %v1467_v60 = vmul.f32 %v2799_v7, %v2793_v40 }
 0x844   :  { %v2803_v53 = vpop.eup %2802  ;;  %v1465_v55 = vmul.f32 %v2801_v54, %v3790_v52 }
 0x845   :  { %v2805_v57 = vpop.eup %2804  ;;  %v1460_v33 = vadd.f32 1.0, %v2803_v53 }
 0x846   :  { %v3844_v61 = vadd.f32 %v1467_v60, %v1465_v55  ;;  %v1468_v38 = vmul.f32 %v2805_v57, %v2797_v4  ;;  %v2807_v48 = vpop.eup %2806 }
 0x847   :  { %v1466_v35 = vmul.f32 %v2807_v48, %v3794_v56  ;;  %v2809_v8 = vpop.eup %2808 }
 0x848   :  { %2810 = vtanh.f32 %v3844_v61 }
 0x849   :  { %v3848_v63 = vadd.f32 %v1468_v38, %v1466_v35  ;;  %2812 = vrcp.f32 %v1460_v33 }
 0x84b   :  { %2814 = vtanh.f32 %v3848_v63 }
 0x852   :  { %v2811_v37 = vpop.eup %2810 }
 0x853   :  { %v2813_v52 = vpop.eup %2812  ;;  %v1473_v59 = vmul.f32 %v2811_v37, %v2809_v8 }
 0x855   :  { %v2815_v58 = vpop.eup %2814 }
 0x856   :  { %v1474_v41 = vmul.f32 %v2815_v58, %v2813_v52 }
 0x858   :  { %v1488_v39 = vpack.c.bf16 %v1474_v41, %v1473_v59 }
 0x85a   :  { %1522 = vmatmul.mubr.bf16.vlgmr.msra.gmra.mrb[32].mxu0 %v1488_v39  ;;  %1565 = vmatmul.mubr.bf16.vlgmr.msra.gmra.mrb[32].mxu1 %v1488_v39 }
 0x85b   :  { %1646 = vmatpush1.bf16.msra.mxu0 %v3478_v42  ;;  %1689 = vmatpush1.bf16.msra.mxu1 %v3484_v9  ;;  %v2379_v42 = vld [vmem:[%s4246_s0 + $0x100] sm:$0xff]  ;;  %v2381_v9 = vld [vmem:[%s4246_s0 + $0x110] sm:$0xff] }
 0x85c   :  { %1647 = vmatprep.subr.bf16.mxu0 %v3490_v10  ;;  %1690 = vmatprep.subr.bf16.mxu1 %v3496_v11  ;;  %v1480_v10 = vunpack.c.l.bf16 %v2379_v42  ;;  %v1481_v11 = vunpack.c.h.bf16 %v2379_v42 }
 0x85d   :  { %1677 = vmatprep.mubr.bf16.mxu0 %v3020_v1  ;;  %1720 = vmatprep.mubr.bf16.mxu1 %v3020_v1 }
 0x85f   :  { %1648 = vmatpush1.bf16.msra.mxu0 %v3504_v0  ;;  %1691 = vmatpush1.bf16.msra.mxu1 %v3510_v6  ;;  %v1484_v0 = vunpack.c.l.bf16 %v2381_v9 }
 0x860   :  { %1649 = vmatprep.subr.bf16.mxu0 %v3516_v12  ;;  %1692 = vmatprep.subr.bf16.mxu1 %v3522_v13  ;;  %v1485_v13 = vunpack.c.h.bf16 %v2381_v9 }
 0x863   :  { %1650 = vmatpush1.bf16.msra.mxu0 %v3528_v14  ;;  %1693 = vmatpush1.bf16.msra.mxu1 %v3534_v15  ;;  %v2380_v15 = vld [vmem:[%s4246_s0 + $0x108] sm:$0xff] }
 0x864   :  { %1651 = vmatprep.subr.bf16.mxu0 %v3540_v16  ;;  %1694 = vmatprep.subr.bf16.mxu1 %v3546_v17 }
 0x867   :  { %1652 = vmatpush1.bf16.msra.mxu0 %v3552_v18  ;;  %1695 = vmatpush1.bf16.msra.mxu1 %v3558_v19 }
 0x868   :  { %1653 = vmatprep.subr.bf16.mxu0 %v3564_v20  ;;  %1696 = vmatprep.subr.bf16.mxu1 %v3570_v21 }
 0x86b   :  { %1654 = vmatpush1.bf16.msra.mxu0 %v3576_v22  ;;  %1697 = vmatpush1.bf16.msra.mxu1 %v3582_v23 }
 0x86c   :  { %1655 = vmatprep.subr.bf16.mxu0 %v3588_v24  ;;  %1698 = vmatprep.subr.bf16.mxu1 %v3594_v25 }
 0x86f   :  { %1656 = vmatpush1.bf16.msra.mxu0 %v3600_v26  ;;  %1699 = vmatpush1.bf16.msra.mxu1 %v3606_v27  ;;  %v1483_v26 = vunpack.c.h.bf16 %v2380_v15 }
 0x870   :  { %1657 = vmatprep.subr.bf16.mxu0 %v3612_v28  ;;  %1700 = vmatprep.subr.bf16.mxu1 %v3618_v29  ;;  %v2382_v29 = vld [vmem:[%s4246_s0 + $0x118] sm:$0xff] }
 0x873   :  { %1658 = vmatpush1.bf16.msra.mxu0 %v3624_v36  ;;  %1701 = vmatpush1.bf16.msra.mxu1 %v3704_v46 }
 0x874   :  { %1659 = vmatprep.subr.bf16.mxu0 %v3631_v50  ;;  %1702 = vmatprep.subr.bf16.mxu1 %v3711_v51  ;;  %v1482_v50 = vunpack.c.l.bf16 %v2380_v15  ;;  %v3934_v15 = vld [vmem:[%s4245_s1 + $0x20] ss:$16 sps:$4 sm:$0xff]  }
 0x877   :  { %1660 = vmatpush1.bf16.msra.mxu0 %v3638_v43  ;;  %1703 = vmatpush1.bf16.msra.mxu1 %v3718_v32 }
 0x878   :  { %1801 = vmatprep.subr.bf16.mxu0 %v3645_v30  ;;  %1844 = vmatprep.subr.bf16.mxu1 %v3651_v31  ;;  %v1487_v30 = vunpack.c.h.bf16 %v2382_v29  ;;  %v1486_v31 = vunpack.c.l.bf16 %v2382_v29  ;;  %v4018_v29 = vld [vmem:[%s4245_s1 + $0xa4] ss:$16 sps:$4 sm:$0xff]  }
 0x92d   :  { %v1523_v6 = vpop.f32.mrb[32].mxu0  ;;  %v1566_v12 = vpop.f32.mrb[32].mxu1 }
 0x92e   :  { %v1575_v14 = vadd.f32 %v1523_v6, %v1480_v10  ;;  %v1525_v16 = vpop.f32.mrb[33].mxu0  ;;  %v1568_v17 = vpop.f32.mrb[33].mxu1  ;;  %v1577_v56 = vadd.f32 %v1566_v12, %v1482_v50  ;;  %v3914_v12 = vld [vmem:[%s4245_s1 + $0x8] ss:$16 sps:$4 sm:$0xff]   ;;  %v4030_v50 = vld [vmem:[%s4245_s1 + $0xa0] ss:$16 sps:$4 sm:$0xff]  }
 0x92f   :  { %v1576_v18 = vadd.f32 %v1525_v16, %v1481_v11  ;;  %v1527_v19 = vpop.f32.mrb[34].mxu0  ;;  %v1570_v20 = vpop.f32.mrb[34].mxu1  ;;  %v1578_v43 = vadd.f32 %v1568_v17, %v1483_v26  ;;  %v3940_v16 = vld [vmem:[%s4245_s1 + $0x28] ss:$16 sps:$4 sm:$0xff]   ;;  %v3946_v17 = vld [vmem:[%s4245_s1 + $0x44] ss:$16 sps:$4 sm:$0xff]  }
 0x930   :  { %v2383_v21 = vmul.f32 -1.442695, %v1575_v14  ;;  %v1579_v22 = vadd.f32 %v1527_v19, %v1484_v0  ;;  %v1529_v23 = vpop.f32.mrb[35].mxu0  ;;  %v1572_v24 = vpop.f32.mrb[35].mxu1  ;;  %v1581_v45 = vadd.f32 %v1570_v20, %v1486_v31  ;;  %v3926_v14 = vld [vmem:[%s4245_s1 + $0x2c] ss:$16 sps:$4 sm:$0xff]  }
 0x931   :  { %v2384_v25 = vmul.f32 -1.442695, %v1576_v18  ;;  %v1580_v27 = vadd.f32 %v1529_v23, %v1485_v13  ;;  %v2387_v62 = vmul.f32 -1.442695, %v1578_v43  ;;  %v1582_v34 = vadd.f32 %v1572_v24, %v1487_v30  ;;  %v3920_v13 = vld [vmem:[%s4245_s1 + $0x24] ss:$16 sps:$4 sm:$0xff]  }
 0x932   :  { %2816 = vpow2.f32 %v2383_v21  ;;  %v2385_v28 = vmul.f32 -1.442695, %v1579_v22  ;;  %v3952_v18 = vld [vmem:[%s4245_s1 + $0x4c] ss:$16 sps:$4 sm:$0xff]   ;;  %v3958_v19 = vld [vmem:[%s4245_s1 + $0x40] ss:$16 sps:$4 sm:$0xff]  }
 0x933   :  { %2818 = vpow2.f32 %v2384_v25  ;;  %v2386_v36 = vmul.f32 -1.442695, %v1580_v27  ;;  %v2388_v44 = vmul.f32 -1.442695, %v1582_v34  ;;  %v3964_v20 = vld [vmem:[%s4245_s1 + $0x48] ss:$16 sps:$4 sm:$0xff]  }
 0x934   :  { %2820 = vpow2.f32 %v2385_v28  ;;  %v3970_v21 = vld [vmem:[%s4245_s1 + $0x64] ss:$16 sps:$4 sm:$0xff]   ;;  %v3976_v22 = vld [vmem:[%s4245_s1 + $0x6c] ss:$16 sps:$4 sm:$0xff]   ;;  %v3982_v23 = vld [vmem:[%s4245_s1 + $0x60] ss:$16 sps:$4 sm:$0xff]  }
 0x935   :  { %2822 = vpow2.f32 %v2386_v36  ;;  %v3988_v24 = vld [vmem:[%s4245_s1 + $0x68] ss:$16 sps:$4 sm:$0xff]   ;;  %v3994_v25 = vld [vmem:[%s4245_s1 + $0x84] ss:$16 sps:$4 sm:$0xff]   ;;  %v4000_v26 = vld [vmem:[%s4245_s1 + $0x8c] ss:$16 sps:$4 sm:$0xff]  }
 0x936   :  { %2824 = vtanh.f32 %v1577_v56  ;;  %v4006_v27 = vld [vmem:[%s4245_s1 + $0x80] ss:$16 sps:$4 sm:$0xff]   ;;  %v4012_v28 = vld [vmem:[%s4245_s1 + $0x88] ss:$16 sps:$4 sm:$0xff]   ;;  %v4024_v36 = vld [vmem:[%s4245_s1 + $0xac] ss:$16 sps:$4 sm:$0xff]  }
 0x937   :  { %2826 = vpow2.f32 %v2387_v62  ;;  %v4036_v43 = vld [vmem:[%s4245_s1 + $0xa8] ss:$16 sps:$4 sm:$0xff]   ;;  %v4042_v30 = vld [vmem:[%s4245_s1 + $0xc4] ss:$16 sps:$4 sm:$0xff]   ;;  %v4048_v31 = vld [vmem:[%s4245_s1 + $0xcc] ss:$16 sps:$4 sm:$0xff]  }
 0x938   :  { %2828 = vtanh.f32 %v1581_v45  ;;  %v4054_v56 = vld [vmem:[%s4245_s1 + $0xc0] ss:$16 sps:$4 sm:$0xff]   ;;  %v4061_v62 = vld [vmem:[%s4245_s1 + $0xe4] ss:$16 sps:$4 sm:$0xff]   ;;  %v3016_v45 = vld [vmem:[%s4245_s1 + $0xc] ss:$16 sps:$4 sm:$0xff]  }
 0x939   :  { %v4068_v34 = vld [vmem:[%s4245_s1 + $0xe0] ss:$16 sps:$4 sm:$0xff]  }
 0x93c   :  { %v2817_v3 = vpop.eup %2816 }
 0x93d   :  { %v2819_v47 = vpop.eup %2818  ;;  %v1595_v49 = vadd.f32 1.0, %v2817_v3  ;;  %v2391_v3 = vld [vmem:[%s4246_s0 + $0x130] sm:$0xff] }
 0x93e   :  { %v1596_v40 = vadd.f32 1.0, %v2819_v47  ;;  %v2821_v5 = vpop.eup %2820 }
 0x93f   :  { %2830 = vrcp.f32 %v1595_v49  ;;  %v1597_v4 = vadd.f32 1.0, %v2821_v5  ;;  %v2823_v7 = vpop.eup %2822  ;;  %v1640_v49 = vunpack.c.l.bf16 %v2391_v3  ;;  %v1641_v5 = vunpack.c.h.bf16 %v2391_v3 }
 0x940   :  { %2832 = vrcp.f32 %v1596_v40  ;;  %v1598_v54 = vadd.f32 1.0, %v2823_v7  ;;  %v2825_v60 = vpop.eup %2824  ;;  %v2390_v7 = vld [vmem:[%s4246_s0 + $0x128] sm:$0xff] }
 0x941   :  { %2834 = vpow2.f32 %v2388_v44  ;;  %v2827_v53 = vpop.eup %2826 }
 0x942   :  { %2836 = vrcp.f32 %v1597_v4  ;;  %v2829_v55 = vpop.eup %2828  ;;  %v1615_v8 = vadd.f32 1.0, %v2827_v53 }
 0x943   :  { %2838 = vrcp.f32 %v1598_v54 }
 0x944   :  { %2840 = vrcp.f32 %v1615_v8  ;;  %v1639_v8 = vunpack.c.h.bf16 %v2390_v7 }
 0x949   :  { %v2831_v57 = vpop.eup %2830 }
 0x94a   :  { %v2833_v2 = vpop.eup %2832  ;;  %v1623_v38 = vmul.f32 %v2831_v57, %v2825_v60 }
 0x94b   :  { %v2835_v48 = vpop.eup %2834  ;;  %v1621_v33 = vmul.f32 %v2833_v2, %v3844_v61 }
 0x94c   :  { %v2837_v35 = vpop.eup %2836  ;;  %v1616_v59 = vadd.f32 1.0, %v2835_v48 }
 0x94d   :  { %v3898_v37 = vadd.f32 %v1623_v38, %v1621_v33  ;;  %v1624_v52 = vmul.f32 %v2837_v35, %v2829_v55  ;;  %v2839_v58 = vpop.eup %2838 }
 0x94e   :  { %v1622_v41 = vmul.f32 %v2839_v58, %v3848_v63  ;;  %v2841_v42 = vpop.eup %2840  ;;  %v3908_v63 = vld [vmem:[%s4245_s1] ss:$16 sps:$4 sm:$0xff]  }
 0x94f   :  { %2842 = vtanh.f32 %v3898_v37 }
 0x950   :  { %v3902_v39 = vadd.f32 %v1624_v52, %v1622_v41  ;;  %2844 = vrcp.f32 %v1616_v59  ;;  %v2392_v59 = vld [vmem:[%s4246_s0 + $0x138] sm:$0xff] }
 0x952   :  { %2846 = vtanh.f32 %v3902_v39 }
 0x959   :  { %v2843_v9 = vpop.eup %2842 }
 0x95a   :  { %v2845_v61 = vpop.eup %2844  ;;  %v1629_v11 = vmul.f32 %v2843_v9, %v2841_v42  ;;  %v1638_v42 = vunpack.c.l.bf16 %v2390_v7 }
 0x95c   :  { %v2847_v10 = vpop.eup %2846 }
 0x95d   :  { %v1630_v0 = vmul.f32 %v2847_v10, %v2845_v61  ;;  %v1643_v61 = vunpack.c.h.bf16 %v2392_v59  ;;  %v1642_v10 = vunpack.c.l.bf16 %v2392_v59 }
 0x95f   :  { %v1644_v6 = vpack.c.bf16 %v1630_v0, %v1629_v11 }
 0x961   :  { %1678 = vmatmul.mubr.bf16.vlgmr.msra.gmra.mrb[36].mxu0 %v1644_v6  ;;  %1721 = vmatmul.mubr.bf16.vlgmr.msra.gmra.mrb[36].mxu1 %v1644_v6 }
 0x962   :  { %1802 = vmatpush1.bf16.msra.mxu0 %v3908_v63  ;;  %1845 = vmatpush1.bf16.msra.mxu1 %v3914_v12 }
 0x963   :  { %1803 = vmatprep.subr.bf16.mxu0 %v3920_v13  ;;  %1846 = vmatprep.subr.bf16.mxu1 %v3926_v14 }
 0x964   :  { %1833 = vmatprep.mubr.bf16.mxu0 %v3020_v1  ;;  %1876 = vmatprep.mubr.bf16.mxu1 %v3020_v1 }
 0x966   :  { %1804 = vmatpush1.bf16.msra.mxu0 %v3934_v15  ;;  %1847 = vmatpush1.bf16.msra.mxu1 %v3940_v16 }
 0x967   :  { %1805 = vmatprep.subr.bf16.mxu0 %v3946_v17  ;;  %1848 = vmatprep.subr.bf16.mxu1 %v3952_v18 }
 0x96a   :  { %1806 = vmatpush1.bf16.msra.mxu0 %v3958_v19  ;;  %1849 = vmatpush1.bf16.msra.mxu1 %v3964_v20 }
 0x96b   :  { %1807 = vmatprep.subr.bf16.mxu0 %v3970_v21  ;;  %1850 = vmatprep.subr.bf16.mxu1 %v3976_v22 }
 0x96e   :  { %1808 = vmatpush1.bf16.msra.mxu0 %v3982_v23  ;;  %1851 = vmatpush1.bf16.msra.mxu1 %v3988_v24 }
 0x96f   :  { %1809 = vmatprep.subr.bf16.mxu0 %v3994_v25  ;;  %1852 = vmatprep.subr.bf16.mxu1 %v4000_v26 }
 0x972   :  { %1810 = vmatpush1.bf16.msra.mxu0 %v4006_v27  ;;  %1853 = vmatpush1.bf16.msra.mxu1 %v4012_v28 }
 0x973   :  { %1811 = vmatprep.subr.bf16.mxu0 %v4018_v29  ;;  %1854 = vmatprep.subr.bf16.mxu1 %v4024_v36 }
 0x976   :  { %1812 = vmatpush1.bf16.msra.mxu0 %v4030_v50  ;;  %1855 = vmatpush1.bf16.msra.mxu1 %v4036_v43 }
 0x977   :  { %1813 = vmatprep.subr.bf16.mxu0 %v4042_v30  ;;  %1856 = vmatprep.subr.bf16.mxu1 %v4048_v31 }
 0x97a   :  { %1814 = vmatpush1.bf16.msra.mxu0 %v4054_v56  ;;  %1857 = vmatpush1.bf16.msra.mxu1 %v3704_v46  ;;  %v3015_v46 = vld [vmem:[%s4245_s1 + $0x4] ss:$16 sps:$4 sm:$0xff]  }
 0x97b   :  { %1815 = vmatprep.subr.bf16.mxu0 %v4061_v62  ;;  %1858 = vmatprep.subr.bf16.mxu1 %v3711_v51  ;;  %v2389_v51 = vld [vmem:[%s4246_s0 + $0x120] sm:$0xff] }
 0x97c   :  { %v1636_v47 = vunpack.c.l.bf16 %v2389_v51 }
 0x97e   :  { %1816 = vmatpush1.bf16.msra.mxu0 %v4068_v34  ;;  %1859 = vmatpush1.bf16.msra.mxu1 %v3718_v32  ;;  %v1637_v32 = vunpack.c.h.bf16 %v2389_v51 }
 0x97f   :  { %1957 = vmatprep.subr.bf16.mxu0 %v3015_v46  ;;  %2000 = vmatprep.subr.bf16.mxu1 %v3016_v45 }
 0xa34   :  { %v1679_v44 = vpop.f32.mrb[36].mxu0  ;;  %v1722_v40 = vpop.f32.mrb[36].mxu1 }
 0xa35   :  { %v1731_v4 = vadd.f32 %v1679_v44, %v1636_v47  ;;  %v1681_v54 = vpop.f32.mrb[37].mxu0  ;;  %v1724_v60 = vpop.f32.mrb[37].mxu1  ;;  %v1733_v11 = vadd.f32 %v1722_v40, %v1638_v42 }
 0xa36   :  { %v1732_v53 = vadd.f32 %v1681_v54, %v1637_v32  ;;  %v1683_v55 = vpop.f32.mrb[38].mxu0  ;;  %v1726_v57 = vpop.f32.mrb[38].mxu1  ;;  %v1734_v9 = vadd.f32 %v1724_v60, %v1639_v8 }
 0xa37   :  { %v2393_v2 = vmul.f32 -1.442695, %v1731_v4  ;;  %v1735_v38 = vadd.f32 %v1683_v55, %v1640_v49  ;;  %v1685_v48 = vpop.f32.mrb[39].mxu0  ;;  %v1728_v33 = vpop.f32.mrb[39].mxu1  ;;  %v1737_v46 = vadd.f32 %v1726_v57, %v1642_v10 }
 0xa38   :  { %v2394_v35 = vmul.f32 -1.442695, %v1732_v53  ;;  %v1736_v52 = vadd.f32 %v1685_v48, %v1641_v5  ;;  %v2397_v0 = vmul.f32 -1.442695, %v1734_v9  ;;  %v1738_v6 = vadd.f32 %v1728_v33, %v1643_v61 }
 0xa39   :  { %2848 = vpow2.f32 %v2393_v2  ;;  %v2395_v58 = vmul.f32 -1.442695, %v1735_v38 }
 0xa3a   :  { %2850 = vpow2.f32 %v2394_v35  ;;  %v2396_v41 = vmul.f32 -1.442695, %v1736_v52  ;;  %v2398_v47 = vmul.f32 -1.442695, %v1738_v6 }
 0xa3b   :  { %2852 = vpow2.f32 %v2395_v58 }
 0xa3c   :  { %2854 = vpow2.f32 %v2396_v41 }
 0xa3d   :  { %2856 = vtanh.f32 %v1733_v11 }
 0xa3e   :  { %2858 = vpow2.f32 %v2397_v0 }
 0xa3f   :  { %2860 = vtanh.f32 %v1737_v46 }
 0xa43   :  { %v2849_v45 = vpop.eup %2848 }
 0xa44   :  { %v2851_v51 = vpop.eup %2850  ;;  %v1751_v3 = vadd.f32 1.0, %v2849_v45 }
 0xa45   :  { %v1752_v32 = vadd.f32 1.0, %v2851_v51  ;;  %v2853_v49 = vpop.eup %2852 }
 0xa46   :  { %2862 = vrcp.f32 %v1751_v3  ;;  %v1753_v44 = vadd.f32 1.0, %v2853_v49  ;;  %v2855_v5 = vpop.eup %2854 }
 0xa47   :  { %2864 = vrcp.f32 %v1752_v32  ;;  %v1754_v4 = vadd.f32 1.0, %v2855_v5  ;;  %v2857_v40 = vpop.eup %2856 }
 0xa48   :  { %2866 = vpow2.f32 %v2398_v47  ;;  %v2859_v7 = vpop.eup %2858 }
 0xa49   :  { %2868 = vrcp.f32 %v1753_v44  ;;  %v2861_v54 = vpop.eup %2860  ;;  %v1771_v48 = vadd.f32 1.0, %v2859_v7 }
 0xa4a   :  { %2870 = vrcp.f32 %v1754_v4 }
 0xa4b   :  { %2872 = vrcp.f32 %v1771_v48 }
 0xa50   :  { %v2863_v60 = vpop.eup %2862 }
 0xa51   :  { %v2865_v53 = vpop.eup %2864  ;;  %v1779_v55 = vmul.f32 %v2863_v60, %v2857_v40 }
 0xa52   :  { %v2867_v57 = vpop.eup %2866  ;;  %v1777_v2 = vmul.f32 %v2865_v53, %v3898_v37 }
 0xa53   :  { %v2869_v38 = vpop.eup %2868  ;;  %v1772_v52 = vadd.f32 1.0, %v2867_v57 }
 0xa54   :  { %v4091_v33 = vadd.f32 %v1779_v55, %v1777_v2  ;;  %v1780_v35 = vmul.f32 %v2869_v38, %v2861_v54  ;;  %v2871_v8 = vpop.eup %2870 }
 0xa55   :  { %v1778_v58 = vmul.f32 %v2871_v8, %v3902_v39  ;;  %v2873_v41 = vpop.eup %2872  ;;  %v3018_v39 = vld [vmem:[%s4245_s1 + $0xec] ss:$16 sps:$4 sm:$0xff]  }
 0xa56   :  { %2874 = vtanh.f32 %v4091_v33 }
 0xa57   :  { %v4095_v59 = vadd.f32 %v1780_v35, %v1778_v58  ;;  %2876 = vrcp.f32 %v1772_v52 }
 0xa59   :  { %2878 = vtanh.f32 %v4095_v59 }
 0xa60   :  { %v2875_v42 = vpop.eup %2874 }
 0xa61   :  { %v2877_v37 = vpop.eup %2876  ;;  %v1785_v61 = vmul.f32 %v2875_v42, %v2873_v41 }
 0xa63   :  { %v2879_v9 = vpop.eup %2878 }
 0xa64   :  { %v1786_v10 = vmul.f32 %v2879_v9, %v2877_v37 }
 0xa66   :  { %v1800_v11 = vpack.c.bf16 %v1786_v10, %v1785_v61 }
 0xa68   :  { %1834 = vmatmul.mubr.bf16.vlgmr.msra.gmra.mrb[40].mxu0 %v1800_v11  ;;  %1877 = vmatmul.mubr.bf16.vlgmr.msra.gmra.mrb[40].mxu1 %v1800_v11 }
 0xa69   :  { %1958 = vmatpush1.bf16.msra.mxu0 %v3908_v63  ;;  %2001 = vmatpush1.bf16.msra.mxu1 %v3914_v12  ;;  %v3019_v63 = vld [vmem:[%s4245_s1 + $0xe8] ss:$16 sps:$4 sm:$0xff]   ;;  %v2399_v12 = vld [vmem:[%s4246_s0 + $0x140] sm:$0xff] }
 0xa6a   :  { %1959 = vmatprep.subr.bf16.mxu0 %v3920_v13  ;;  %2002 = vmatprep.subr.bf16.mxu1 %v3926_v14  ;;  %v2401_v13 = vld [vmem:[%s4246_s0 + $0x150] sm:$0xff]  ;;  %v1792_v14 = vunpack.c.l.bf16 %v2399_v12 }
 0xa6b   :  { %1989 = vmatprep.mubr.bf16.mxu0 %v3020_v1  ;;  %2032 = vmatprep.mubr.bf16.mxu1 %v3020_v1  ;;  %v3017_v1 = vld [vmem:[%s4245_s1 + $0xc8] ss:$16 sps:$4 sm:$0xff]  }
 0xa6d   :  { %1960 = vmatpush1.bf16.msra.mxu0 %v3934_v15  ;;  %2003 = vmatpush1.bf16.msra.mxu1 %v3940_v16  ;;  %v1793_v15 = vunpack.c.h.bf16 %v2399_v12  ;;  %v1796_v16 = vunpack.c.l.bf16 %v2401_v13 }
 0xa6e   :  { %1961 = vmatprep.subr.bf16.mxu0 %v3946_v17  ;;  %2004 = vmatprep.subr.bf16.mxu1 %v3952_v18 }
 0xa71   :  { %1962 = vmatpush1.bf16.msra.mxu0 %v3958_v19  ;;  %2005 = vmatpush1.bf16.msra.mxu1 %v3964_v20  ;;  %v1797_v19 = vunpack.c.h.bf16 %v2401_v13 }
 0xa72   :  { %1963 = vmatprep.subr.bf16.mxu0 %v3970_v21  ;;  %2006 = vmatprep.subr.bf16.mxu1 %v3976_v22  ;;  %v2400_v21 = vld [vmem:[%s4246_s0 + $0x148] sm:$0xff] }
 0xa75   :  { %1964 = vmatpush1.bf16.msra.mxu0 %v3982_v23  ;;  %2007 = vmatpush1.bf16.msra.mxu1 %v3988_v24 }
 0xa76   :  { %1965 = vmatprep.subr.bf16.mxu0 %v3994_v25  ;;  %2008 = vmatprep.subr.bf16.mxu1 %v4000_v26 }
 0xa79   :  { %1966 = vmatpush1.bf16.msra.mxu0 %v4006_v27  ;;  %2009 = vmatpush1.bf16.msra.mxu1 %v4012_v28 }
 0xa7a   :  { %1967 = vmatprep.subr.bf16.mxu0 %v4018_v29  ;;  %2010 = vmatprep.subr.bf16.mxu1 %v4024_v36 }
 0xa7d   :  { %1968 = vmatpush1.bf16.msra.mxu0 %v4030_v50  ;;  %2011 = vmatpush1.bf16.msra.mxu1 %v4036_v43  ;;  %v1795_v43 = vunpack.c.h.bf16 %v2400_v21 }
 0xa7e   :  { %1969 = vmatprep.subr.bf16.mxu0 %v4042_v30  ;;  %2012 = vmatprep.subr.bf16.mxu1 %v4048_v31 }
 0xa81   :  { %1970 = vmatpush1.bf16.msra.mxu0 %v4054_v56  ;;  %2013 = vmatpush1.bf16.msra.mxu1 %v3017_v1  ;;  %v2402_v56 = vld [vmem:[%s4246_s0 + $0x158] sm:$0xff] }
 0xa82   :  { %1971 = vmatprep.subr.bf16.mxu0 %v4061_v62  ;;  %2014 = vmatprep.subr.bf16.mxu1 %v3018_v39  ;;  %v1799_v6 = vunpack.c.h.bf16 %v2402_v56  ;;  %v1798_v46 = vunpack.c.l.bf16 %v2402_v56  ;;  %v2121_v56 = vld [vmem:[%s4247_s2 + $0x78] sm:$0xff] }
 0xa85   :  { %1972 = vmatpush1.bf16.msra.mxu0 %v4068_v34  ;;  %2015 = vmatpush1.bf16.msra.mxu1 %v3019_v63  ;;  %v1794_v34 = vunpack.c.l.bf16 %v2400_v21 }
 0xb3b   :  { %v1835_v17 = vpop.f32.mrb[40].mxu0  ;;  %v1878_v18 = vpop.f32.mrb[40].mxu1 }
 0xb3c   :  { %v1887_v20 = vadd.f32 %v1835_v17, %v1792_v14  ;;  %v1837_v22 = vpop.f32.mrb[41].mxu0  ;;  %v1880_v23 = vpop.f32.mrb[41].mxu1  ;;  %v1889_v45 = vadd.f32 %v1878_v18, %v1794_v34  ;;  %v2107_v14 = vld [vmem:[%s4247_s2 + $0x8] sm:$0xff]  ;;  %v2109_v17 = vld [vmem:[%s4247_s2 + $0x18] sm:$0xff]  ;;  %v2409_v34 = vld [vmem:[%s4246_s0 + $0x160] sm:$0xff] }
 0xb3d   :  { %v1888_v24 = vadd.f32 %v1837_v22, %v1793_v15  ;;  %v1839_v25 = vpop.f32.mrb[42].mxu0  ;;  %v1882_v26 = vpop.f32.mrb[42].mxu1  ;;  %v1890_v0 = vadd.f32 %v1880_v23, %v1795_v43  ;;  %v2112_v22 = vld [vmem:[%s4247_s2 + $0x30] sm:$0xff]  ;;  %v2113_v23 = vld [vmem:[%s4247_s2 + $0x38] sm:$0xff]  ;;  %v2119_v43 = vld [vmem:[%s4247_s2 + $0x68] sm:$0xff] }
 0xb3e   :  { %v2403_v27 = vmul.f32 -1.442695, %v1887_v20  ;;  %v1891_v28 = vadd.f32 %v1839_v25, %v1796_v16  ;;  %v1841_v29 = vpop.f32.mrb[43].mxu0  ;;  %v1884_v36 = vpop.f32.mrb[43].mxu1  ;;  %v1893_v47 = vadd.f32 %v1882_v26, %v1798_v46  ;;  %v2108_v16 = vld [vmem:[%s4247_s2 + $0x10] sm:$0xff]  ;;  %v2111_v20 = vld [vmem:[%s4247_s2 + $0x28] sm:$0xff]  ;;  %v1949_v46 = vunpack.c.h.bf16 %v2409_v34 }
 0xb3f   :  { %v2404_v50 = vmul.f32 -1.442695, %v1888_v24  ;;  %v1892_v30 = vadd.f32 %v1841_v29, %v1797_v19  ;;  %v2407_v51 = vmul.f32 -1.442695, %v1890_v0  ;;  %v1894_v3 = vadd.f32 %v1884_v36, %v1799_v6  ;;  %v2110_v19 = vld [vmem:[%s4247_s2 + $0x20] sm:$0xff]  ;;  %v2115_v26 = vld [vmem:[%s4247_s2 + $0x48] sm:$0xff] }
 0xb40   :  { %2880 = vpow2.f32 %v2403_v27  ;;  %v2405_v31 = vmul.f32 -1.442695, %v1891_v28  ;;  %v2479_v18 = vpack.c.bf16 %v2109_v17, %v2108_v16  ;;  %v2483_v21 = vpack.c.bf16 %v2111_v20, %v2110_v19  ;;  %v2114_v25 = vld [vmem:[%s4247_s2 + $0x40] sm:$0xff]  ;;  %v2116_v28 = vld [vmem:[%s4247_s2 + $0x50] sm:$0xff]  ;;  %v2117_v29 = vld [vmem:[%s4247_s2 + $0x58] sm:$0xff] }
 0xb41   :  { %2882 = vpow2.f32 %v2404_v50  ;;  %v2406_v62 = vmul.f32 -1.442695, %v1892_v30  ;;  %v2408_v5 = vmul.f32 -1.442695, %v1894_v3  ;;  %v2487_v24 = vpack.c.bf16 %v2113_v23, %v2112_v22  ;;  %v2118_v36 = vld [vmem:[%s4247_s2 + $0x60] sm:$0xff]  ;;  %v2411_v0 = vld [vmem:[%s4246_s0 + $0x170] sm:$0xff] }
 0xb42   :  { %2884 = vpow2.f32 %v2405_v31  ;;  %v2491_v27 = vpack.c.bf16 %v2115_v26, %v2114_v25  ;;  %v2495_v50 = vpack.c.bf16 %v2117_v29, %v2116_v28  ;;  %v2499_v30 = vpack.c.bf16 %v2119_v43, %v2118_v36  ;;  %v2120_v31 = vld [vmem:[%s4247_s2 + $0x70] sm:$0xff] }
 0xb43   :  { %2886 = vpow2.f32 %v2406_v62  ;;  %v2503_v62 = vpack.c.bf16 %v2121_v56, %v2120_v31  ;;  %v1948_v6 = vunpack.c.l.bf16 %v2409_v34 }
 0xb44   :  { %2888 = vtanh.f32 %v1889_v45  ;;  %v1952_v45 = vunpack.c.l.bf16 %v2411_v0 }
 0xb45   :  { %2890 = vpow2.f32 %v2407_v51 }
 0xb46   :  { %2892 = vtanh.f32 %v1893_v47  ;;  %v1953_v47 = vunpack.c.h.bf16 %v2411_v0 }
 0xb4a   :  { %v2881_v32 = vpop.eup %2880 }
 0xb4b   :  { %v2883_v49 = vpop.eup %2882  ;;  %v1907_v44 = vadd.f32 1.0, %v2881_v32 }
 0xb4c   :  { %v1908_v4 = vadd.f32 1.0, %v2883_v49  ;;  %v2885_v40 = vpop.eup %2884  ;;  %v2410_v49 = vld [vmem:[%s4246_s0 + $0x168] sm:$0xff] }
 0xb4d   :  { %2894 = vrcp.f32 %v1907_v44  ;;  %v1909_v7 = vadd.f32 1.0, %v2885_v40  ;;  %v2887_v54 = vpop.eup %2886 }
 0xb4e   :  { %2896 = vrcp.f32 %v1908_v4  ;;  %v1910_v60 = vadd.f32 1.0, %v2887_v54  ;;  %v2889_v53 = vpop.eup %2888 }
 0xb4f   :  { %2898 = vpow2.f32 %v2408_v5  ;;  %v2891_v55 = vpop.eup %2890 }
 0xb50   :  { %2900 = vrcp.f32 %v1909_v7  ;;  %v2893_v57 = vpop.eup %2892  ;;  %v1927_v58 = vadd.f32 1.0, %v2891_v55 }
 0xb51   :  { %2902 = vrcp.f32 %v1910_v60 }
 0xb52   :  { %2904 = vrcp.f32 %v1927_v58 }
 0xb57   :  { %v2895_v2 = vpop.eup %2894 }
 0xb58   :  { %v2897_v38 = vpop.eup %2896  ;;  %v1935_v48 = vmul.f32 %v2895_v2, %v2889_v53  ;;  %v1951_v2 = vunpack.c.h.bf16 %v2410_v49 }
 0xb59   :  { %v2899_v35 = vpop.eup %2898  ;;  %v1933_v8 = vmul.f32 %v2897_v38, %v4091_v33 }
 0xb5a   :  { %v2901_v52 = vpop.eup %2900  ;;  %v1928_v9 = vadd.f32 1.0, %v2899_v35  ;;  %v2412_v35 = vld [vmem:[%s4246_s0 + $0x178] sm:$0xff] }
 0xb5b   :  { %v4149_v41 = vadd.f32 %v1935_v48, %v1933_v8  ;;  %v1936_v42 = vmul.f32 %v2901_v52, %v2893_v57  ;;  %v2903_v37 = vpop.eup %2902  ;;  %v1950_v52 = vunpack.c.l.bf16 %v2410_v49 }
 0xb5c   :  { %v1934_v61 = vmul.f32 %v2903_v37, %v4095_v59  ;;  %v2905_v11 = vpop.eup %2904  ;;  %v2106_v59 = vld [vmem:[%s4247_s2] sm:$0xff]  ;;  %v1954_v37 = vunpack.c.l.bf16 %v2412_v35 }
 0xb5d   :  { %2906 = vtanh.f32 %v4149_v41  ;;  %v2475_v15 = vpack.c.bf16 %v2107_v14, %v2106_v59 }
 0xb5e   :  { %v4153_v10 = vadd.f32 %v1936_v42, %v1934_v61  ;;  %2908 = vrcp.f32 %v1928_v9  ;;  %v1955_v42 = vunpack.c.h.bf16 %v2412_v35 }
 0xb5f   :  { %2476 = vmatprep.subr.bf16.mxu0 %v2475_v15 }
 0xb60   :  { %2910 = vtanh.f32 %v4153_v10 }
 0xb67   :  { %v2907_v1 = vpop.eup %2906 }
 0xb68   :  { %v2909_v33 = vpop.eup %2908  ;;  %v1941_v63 = vmul.f32 %v2907_v1, %v2905_v11 }
 0xb6a   :  { %v2911_v39 = vpop.eup %2910 }
 0xb6b   :  { %v1942_v12 = vmul.f32 %v2911_v39, %v2909_v33 }
 0xb6d   :  { %v1956_v13 = vpack.c.bf16 %v1942_v12, %v1941_v63 }
 0xb6f   :  { %1990 = vmatmul.mubr.bf16.vlgmr.msra.gmra.mrb[44].mxu0 %v1956_v13  ;;  %2033 = vmatmul.mubr.bf16.vlgmr.msra.gmra.mrb[44].mxu1 %v1956_v13 }
 0xb70   :  { %2478 = vmatpush3.bf16.msra.mxu0 %v2475_v15 }
 0xb71   :  { %2480 = vmatprep.subr.bf16.mxu0 %v2479_v18 }
 0xb74   :  { %2482 = vmatpush3.bf16.msra.mxu0 %v2479_v18 }
 0xb75   :  { %2484 = vmatprep.subr.bf16.mxu0 %v2483_v21 }
 0xb78   :  { %2486 = vmatpush3.bf16.msra.mxu0 %v2483_v21 }
 0xb79   :  { %2488 = vmatprep.subr.bf16.mxu0 %v2487_v24 }
 0xb7c   :  { %2490 = vmatpush3.bf16.msra.mxu0 %v2487_v24 }
 0xb7d   :  { %2492 = vmatprep.subr.bf16.mxu0 %v2491_v27 }
 0xb80   :  { %2494 = vmatpush3.bf16.msra.mxu0 %v2491_v27 }
 0xb81   :  { %2496 = vmatprep.subr.bf16.mxu0 %v2495_v50 }
 0xb84   :  { %2498 = vmatpush3.bf16.msra.mxu0 %v2495_v50 }
 0xb85   :  { %2500 = vmatprep.subr.bf16.mxu0 %v2499_v30 }
 0xb88   :  { %2502 = vmatpush3.bf16.msra.mxu0 %v2499_v30 }
 0xb89   :  { %2504 = vmatprep.subr.bf16.mxu0 %v2503_v62 }
 0xb8c   :  { %2506 = vmatpush3.bf16.msra.mxu0 %v2503_v62 }
 0xc42   :  { %v1991_v51 = vpop.f32.mrb[44].mxu0  ;;  %v2034_v3 = vpop.f32.mrb[44].mxu1 }
 0xc43   :  { %v2043_v32 = vadd.f32 %v1991_v51, %v1948_v6  ;;  %v1993_v44 = vpop.f32.mrb[45].mxu0  ;;  %v2036_v5 = vpop.f32.mrb[45].mxu1  ;;  %v2045_v9 = vadd.f32 %v2034_v3, %v1950_v52  ;;  %v2228_v51 = vld [vmem:[%s4250_s4] sm:$0xff]  ;;  %v3022_v52 = vmov 0.0  }
 0xc44   :  { %v2044_v4 = vadd.f32 %v1993_v44, %v1949_v46  ;;  %v1995_v40 = vpop.f32.mrb[46].mxu0  ;;  %v2038_v7 = vpop.f32.mrb[46].mxu1  ;;  %v2046_v58 = vadd.f32 %v2036_v5, %v1951_v2 }
 0xc45   :  { %v2413_v54 = vmul.f32 -1.442695, %v2043_v32  ;;  %v2047_v60 = vadd.f32 %v1995_v40, %v1952_v45  ;;  %v1997_v53 = vpop.f32.mrb[47].mxu0  ;;  %v2040_v55 = vpop.f32.mrb[47].mxu1  ;;  %v2049_v1 = vadd.f32 %v2038_v7, %v1954_v37  ;;  %v2229_v7 = vld [vmem:[%s4250_s4 + $0x8] sm:$0xff] }
 0xc46   :  { %v2414_v57 = vmul.f32 -1.442695, %v2044_v4  ;;  %v2048_v38 = vadd.f32 %v1997_v53, %v1953_v47  ;;  %v2417_v61 = vmul.f32 -1.442695, %v2046_v58  ;;  %v2050_v11 = vadd.f32 %v2040_v55, %v1955_v42 }
 0xc47   :  { %2912 = vpow2.f32 %v2413_v54  ;;  %v2415_v48 = vmul.f32 -1.442695, %v2047_v60  ;;  %v2226_v60 = vlaneseq }
 0xc48   :  { %2914 = vpow2.f32 %v2414_v57  ;;  %v2416_v8 = vmul.f32 -1.442695, %v2048_v38  ;;  %v2418_v12 = vmul.f32 -1.442695, %v2050_v11 }
 0xc49   :  { %2916 = vpow2.f32 %v2415_v48  ;;  %v2227_v55 = vand.u32 127, %v2226_v60 }
 0xc4a   :  { %2918 = vpow2.f32 %v2416_v8 }
 0xc4b   :  { %2920 = vtanh.f32 %v2045_v9 }
 0xc4c   :  { %2922 = vpow2.f32 %v2417_v61 }
 0xc4d   :  { %2924 = vtanh.f32 %v2049_v1 }
 0xc51   :  { %v2913_v33 = vpop.eup %2912 }
 0xc52   :  { %v2915_v39 = vpop.eup %2914  ;;  %v2063_v63 = vadd.f32 1.0, %v2913_v33 }
 0xc53   :  { %v2064_v13 = vadd.f32 1.0, %v2915_v39  ;;  %v2917_v59 = vpop.eup %2916 }
 0xc54   :  { %2926 = vrcp.f32 %v2063_v63  ;;  %v2065_v14 = vadd.f32 1.0, %v2917_v59  ;;  %v2919_v15 = vpop.eup %2918 }
 0xc55   :  { %2928 = vrcp.f32 %v2064_v13  ;;  %v2066_v16 = vadd.f32 1.0, %v2919_v15  ;;  %v2921_v17 = vpop.eup %2920 }
 0xc56   :  { %2930 = vpow2.f32 %v2418_v12  ;;  %v2923_v18 = vpop.eup %2922 }
 0xc57   :  { %2932 = vrcp.f32 %v2065_v14  ;;  %v2925_v19 = vpop.eup %2924  ;;  %v2083_v23 = vadd.f32 1.0, %v2923_v18 }
 0xc58   :  { %2934 = vrcp.f32 %v2066_v16 }
 0xc59   :  { %2936 = vrcp.f32 %v2083_v23 }
 0xc5e   :  { %v2927_v20 = vpop.eup %2926 }
 0xc5f   :  { %v2929_v21 = vpop.eup %2928  ;;  %v2091_v22 = vmul.f32 %v2927_v20, %v2921_v17 }
 0xc60   :  { %v2931_v24 = vpop.eup %2930  ;;  %v2089_v25 = vmul.f32 %v2929_v21, %v4149_v41  ;;  %v2419_v41 = vld [vmem:[%s4248_s3] ss:$0 sm:$0xff] }
 0xc61   :  { %v2933_v26 = vpop.eup %2932  ;;  %v2084_v36 = vadd.f32 1.0, %v2931_v24 }
 0xc62   :  { %v2092_v27 = vmul.f32 %v2933_v26, %v2925_v19  ;;  %v2093_v28 = vadd.f32 %v2091_v22, %v2089_v25  ;;  %v2935_v29 = vpop.eup %2934 }
 0xc63   :  { %v2090_v50 = vmul.f32 %v2935_v29, %v4153_v10  ;;  %v2937_v30 = vpop.eup %2936 }
 0xc64   :  { %2938 = vtanh.f32 %v2093_v28 }
 0xc65   :  { %v2094_v43 = vadd.f32 %v2092_v27, %v2090_v50  ;;  %2940 = vrcp.f32 %v2084_v36 }
 0xc67   :  { %2942 = vtanh.f32 %v2094_v43 }
 0xc6e   :  { %v2939_v31 = vpop.eup %2938 }
 0xc6f   :  { %v2097_v56 = vmul.f32 %v2939_v31, %v2937_v30  ;;  %v2941_v62 = vpop.eup %2940 }
 0xc71   :  { %2472 = vmatprep.mubr.f32.mxu0 %v2097_v56  ;;  %v2943_v34 = vpop.eup %2942 }
 0xc72   :  { %v2098_v0 = vmul.f32 %v2943_v34, %v2941_v62 }
 0xc74   :  { %2473 = vmatmul.mubr.f32.vlgmr.msra.gmra.mrb[48].mxu0 %v2098_v0 }
 0xd47   :  { %v2474_v6 = vpop.f32.mrb[48].mxu0 }
 0xd48   :  { %v2201_v46 = vadd.f32 %v2474_v6, %v2419_v41  ;;  %v2195_v45 = vpop.f32.mrb[49].mxu0 }
 0xd49   :  { %v2196_v10 = vadd.f32 %v2419_v41, %v2195_v45 }
 0xd4a   :  { %2205 = vst [vmem:[%s4249_s5 + $0x8] sm:$0xff] %v2201_v46 }
 0xd4b   :  { %2204 = vst [vmem:[%s4249_s5] sm:$0xff] %v2196_v10  ;;  %2206 = vmax.xlane.f32.xlu0 %v2196_v10 }
 0xd4f   :  { %2208 = vmax.xlane.f32.xlu0 %v2201_v46 }
 0xd65   :  { %2231 = vperm.xlu0 %2510, %v2228_v51  }
 0xdd8   :  { %v2207_v3 = vpop.xlane.xlu0 %2206 }
 0xdd9   :  { %v2210_v32 = vsub.f32 %v2196_v10, %v2207_v3 }
 0xddb   :  { %v2212_v5 = vmul.f32 1.442695, %v2210_v32 }
 0xddc   :  { %v2209_v47 = vpop.xlane.xlu0 %2208 }
 0xddd   :  { %v2211_v49 = vsub.f32 %v2201_v46, %v2209_v47 }
 0xddf   :  { %v2214_v44 = vmul.f32 1.442695, %v2211_v49 }
 0xde1   :  { %2944 = vpow2.f32 %v2214_v44 }
 0xde2   :  { %2946 = vpow2.f32 %v2212_v5 }
 0xde4   :  { %v2232_v35 = vpop.permute.xlu0 %2231 }
 0xde5   :  { %vm2236_vm1 = vcmp.eq.s32.totalorder %v2227_v55, %v2232_v35 }
 0xde6   :  { %v2420_v33 = vsel %vm2236_vm1, 1.0, %v3022_v52 }
 0xdeb   :  { %v2945_v4 = vpop.eup %2944 }
 0xdec   :  { %2218 = vadd.xlane.f32.xlu1 %v2945_v4  ;;  %v2947_v40 = vpop.eup %2946 }
 0xdf0   :  { %2216 = vadd.xlane.f32.xlu1 %v2947_v40 }
 0xe01   :  { %2234 = vperm.xlu1 %2511, %v2229_v7  }
 0xe79   :  { %v2219_v54 = vpop.xlane.xlu1 %2218 }
 0xe7a   :  { %2948 = vrcp.f32 %v2219_v54 }
 0xe7b   :  { %2950 = vlog2.f32 %v2219_v54 }
 0xe7d   :  { %v2217_v53 = vpop.xlane.xlu1 %2216 }
 0xe7e   :  { %2952 = vrcp.f32 %v2217_v53 }
 0xe7f   :  { %2954 = vlog2.f32 %v2217_v53 }
 0xe81   :  { %v2235_v57 = vpop.permute.xlu1 %2234 }
 0xe82   :  { %vm2237_vm0 = vcmp.eq.s32.totalorder %v2227_v55, %v2235_v57 }
 0xe83   :  { %v2421_v58 = vsel %vm2237_vm0, 1.0, %v3022_v52 }
 0xe84   :  { %v2949_v2 = vpop.eup %2948 }
 0xe85   :  { %v2951_v38 = vpop.eup %2950  ;;  %v2223_v48 = vmul.f32 %v2949_v2, %v2945_v4 }
 0xe86   :  { %v2245_v8 = vmul.f32 0.6931472, %v2951_v38 }
 0xe87   :  { %2225 = vst [vmem:[%s4251_s6 + $0x8] sm:$0xff] %v2223_v48 }
 0xe88   :  { %v2953_v42 = vpop.eup %2952  ;;  %v2247_v37 = vsub.f32 %v2211_v49, %v2245_v8 }
 0xe89   :  { %v2955_v9 = vpop.eup %2954  ;;  %v2221_v61 = vmul.f32 %v2953_v42, %v2947_v40 }
 0xe8a   :  { %v2243_v11 = vmul.f32 0.6931472, %v2955_v9  ;;  %v2249_v1 = vmul.f32 %v2421_v58, %v2247_v37 }
 0xe8b   :  { %2224 = vst [vmem:[%s4251_s6] sm:$0xff] %v2221_v61 }
 0xe8c   :  { %2252 = vadd.xlane.f32.xlu0 %v2249_v1  ;;  %v2246_v39 = vsub.f32 %v2210_v32, %v2243_v11 }
 0xe8e   :  { %v2248_v63 = vmul.f32 %v2420_v33, %v2246_v39 }
 0xe90   :  { %2250 = vadd.xlane.f32.xlu1 %v2248_v63 }
 0xf19   :  { %v2253_v12 = vpop.xlane.xlu0 %2252 }
 0xf1a   :  { %v2255_v13 = vsub.f32 0.0, %v2253_v12 }
 0xf1c   :  { %2258 = vst.msk [vmem:[%s4252_s7 + $0x8] sm:$0xff] %vm2256_vm2, %v2255_v13 }
 0xf1d   :  { %v2251_v59 = vpop.xlane.xlu1 %2250 }
 0xf1e   :  { %v2254_v14 = vsub.f32 0.0, %v2251_v59 }
 0xf20   :  { %2257 = vst.msk [vmem:[%s4252_s7] sm:$0xff] %vm2256_vm2, %v2254_v14 }

</bundles_post_ra>
